<compile_context>
chip_gen: v7x
topology: tpu7x:2x2x1
jax: 0.10.0
libtpu: 0.0.40
codegen_flags: <defaults>
</compile_context>

<pallas_src>
import jax
import jax.numpy as jnp
import numpy as np
from jax.experimental import pallas as pl
from jax.experimental.pallas import tpu as pltpu

EPS = 1e-5
COMPUTE_DTYPE = jnp.bfloat16  # MXU input dtype; accumulation / BN stay f32.


# ----------------------------------------------------------------------------
# In-kernel helpers
# ----------------------------------------------------------------------------
def _conv3x3_im2col(a, w_ref):
    """3x3 'same' convolution of one image as a single im2col matmul.

    a     : (H, W, Cin) f32 activation (already post-BN/ReLU where relevant).
    w_ref : (9*Cin, Cout) ref in COMPUTE_DTYPE, rows ordered (ky, kx, cin).
    Returns (H*W, Cout) f32.
    """
    H, W, Cin = a.shape
    # Zero-pad H and W by 1 on in-register values (no scratch, no full zero-fill).
    zr = jnp.zeros((1, W, Cin), a.dtype)
    ap = jnp.concatenate([zr, a, zr], axis=0)          # (H+2, W, Cin)
    zc = jnp.zeros((H + 2, 1, Cin), a.dtype)
    ap = jnp.concatenate([zc, ap, zc], axis=1)         # (H+2, W+2, Cin)

    # im2col: the 9 shifted taps concatenated along channels -> one K=9*Cin
    # MXU matmul (instead of 9 short-K matmuls + 9 strided-slice reshapes).
    taps = [ap[ky:ky + H, kx:kx + W, :] for ky in range(3) for kx in range(3)]
    patches = jnp.concatenate(taps, axis=-1)           # (H, W, 9*Cin)
    patches = patches.reshape(H * W, 9 * Cin).astype(COMPUTE_DTYPE)

    return jax.lax.dot_general(
        patches, w_ref[...],
        dimension_numbers=(((1,), (0,)), ((), ())),
        preferred_element_type=jnp.float32)            # (H*W, Cout) f32


def _conv1_kernel(x_ref, w_ref, y_ref, sum_ref, sq_ref):
    """Pass 1: y = conv1(x); per-image channel sum / sum-of-squares for BN1."""
    _, H, W, _ = x_ref.shape
    Cout = y_ref.shape[-1]
    y2d = _conv3x3_im2col(x_ref[0], w_ref)             # (H*W, Cout) f32
    y_ref[0] = y2d.reshape(H, W, Cout)
    sum_ref[0] = jnp.sum(y2d, axis=0, keepdims=True)
    sq_ref[0] = jnp.sum(y2d * y2d, axis=0, keepdims=True)


def _bn_relu_conv2_kernel(y1_ref, w_ref, scale_ref, shift_ref,
                          y_ref, sum_ref, sq_ref):
    """Pass 2: a = relu(bn1(y1)) with precomputed global scale/shift,
    y = conv2(a); per-image channel sum / sum-of-squares for BN2."""
    _, H, W, _ = y1_ref.shape
    Cout = y_ref.shape[-1]
    a = jnp.maximum(y1_ref[0] * scale_ref[0, 0] + shift_ref[0, 0], 0.0)
    y2d = _conv3x3_im2col(a, w_ref)                    # (H*W, Cout) f32
    y_ref[0] = y2d.reshape(H, W, Cout)
    sum_ref[0] = jnp.sum(y2d, axis=0, keepdims=True)
    sq_ref[0] = jnp.sum(y2d * y2d, axis=0, keepdims=True)


def _bn_add_relu_kernel(y2_ref, x_ref, scale_ref, shift_ref, out_ref):
    """Pass 3 (pointwise): out = relu(bn2(y2) + identity)."""
    out_ref[...] = jnp.maximum(
        y2_ref[...] * scale_ref[...] + shift_ref[...] + x_ref[...], 0.0
    ).astype(out_ref.dtype)


# ----------------------------------------------------------------------------
# Wrapper
# ----------------------------------------------------------------------------
def _bn_scale_shift(ssum, ssq, gamma, beta, count):
    """Fold global train-mode BN stats into per-channel scale/shift (tiny op)."""
    s = jnp.sum(ssum[:, 0, :], axis=0)
    q = jnp.sum(ssq[:, 0, :], axis=0)
    mean = s / count
    var = jnp.maximum(q / count - mean * mean, 0.0)    # biased variance
    scale = gamma.astype(jnp.float32) * jax.lax.rsqrt(var + EPS)
    shift = beta.astype(jnp.float32) - mean * scale
    c = scale.shape[0]
    return scale.reshape(1, 1, 1, c), shift.reshape(1, 1, 1, c)


@jax.jit
def basic_block_nhwc(x, w1, g1, b1, w2, g2, b2):
    """BasicBlock forward, NHWC activations (transpose-free entry point).

    x  : (N, H, W, Cin) f32
    w1 : (3, 3, Cin, Cout) HWIO, w2 : (3, 3, Cout, Cout) HWIO (bias=False)
    g*/b* : (Cout,) BatchNorm weight / bias.
    """
    N, H, W, Cin = x.shape
    Cout = w1.shape[-1]
    if Cin != Cout:
        raise ValueError("identity path requires Cin == Cout (downsample=None)")
    x = x.astype(jnp.float32)

    # (3,3,Cin,Cout) -> (9*Cin, Cout); row order (ky, kx, cin) == im2col order.
    w1m = w1.reshape(9 * Cin, Cout).astype(COMPUTE_DTYPE)
    w2m = w2.reshape(9 * Cout, Cout).astype(COMPUTE_DTYPE)

    act_in = pl.BlockSpec((1, H, W, Cin), lambda n: (n, 0, 0, 0))
    act_out = pl.BlockSpec((1, H, W, Cout), lambda n: (n, 0, 0, 0))
    w1_spec = pl.BlockSpec((9 * Cin, Cout), lambda n: (0, 0))
    w2_spec = pl.BlockSpec((9 * Cout, Cout), lambda n: (0, 0))
    vec_spec = pl.BlockSpec((1, 1, 1, Cout), lambda n: (0, 0, 0, 0))
    stat_spec = pl.BlockSpec((1, 1, Cout), lambda n: (n, 0, 0))
    params = pltpu.CompilerParams(dimension_semantics=("parallel",))

    act_shape = jax.ShapeDtypeStruct((N, H, W, Cout), jnp.float32)
    stat_shape = jax.ShapeDtypeStruct((N, 1, Cout), jnp.float32)
    count = float(N * H * W)

    # Pass 1: conv1 + BN1 partial statistics (per image).
    y1, s1, q1 = pl.pallas_call(
        _conv1_kernel,
        grid=(N,),
        in_specs=[act_in, w1_spec],
        out_specs=(act_out, stat_spec, stat_spec),
        out_shape=(act_shape, stat_shape, stat_shape),
        compiler_params=params,
    )(x, w1m)
    scale1, shift1 = _bn_scale_shift(s1, q1, g1, b1, count)

    # Pass 2: BN1 + ReLU + conv2 + BN2 partial statistics (per image).
    y2, s2, q2 = pl.pallas_call(
        _bn_relu_conv2_kernel,
        grid=(N,),
        in_specs=[act_out, w2_spec, vec_spec, vec_spec],
        out_specs=(act_out, stat_spec, stat_spec),
        out_shape=(act_shape, stat_shape, stat_shape),
        compiler_params=params,
    )(y1, w2m, scale1, shift1)
    scale2, shift2 = _bn_scale_shift(s2, q2, g2, b2, count)

    # Pass 3: BN2 + identity add + ReLU (pointwise).
    out = pl.pallas_call(
        _bn_add_relu_kernel,
        grid=(N,),
        in_specs=[act_out, act_in, vec_spec, vec_spec],
        out_specs=act_out,
        out_shape=act_shape,
        compiler_params=params,
    )(y2, x, scale2, shift2)
    return out


def basic_block(x_nchw, w1, g1, b1, w2, g2, b2):
    """PyTorch-interface adapter: NCHW in / NCHW out.

    In a full NHWC model call basic_block_nhwc directly and drop these two
    full-tensor HBM transposes; they exist only for interface parity.
    """
    x = jnp.transpose(x_nchw, (0, 2, 3, 1))
    out = basic_block_nhwc(x, w1, g1, b1, w2, g2, b2)
    return jnp.transpose(out, (0, 3, 1, 2))


# ----------------------------------------------------------------------------
# Pure-JAX (XLA) reference with matching quantization points
# (bf16 conv operands, f32 accumulation and BN), NCHW interface.
# ----------------------------------------------------------------------------
def basic_block_ref(x_nchw, w1, g1, b1, w2, g2, b2):
    def conv(x, w):
        return jax.lax.conv_general_dilated(
            x.astype(COMPUTE_DTYPE), w.astype(COMPUTE_DTYPE),
            window_strides=(1, 1), padding=((1, 1), (1, 1)),
            dimension_numbers=("NCHW", "HWIO", "NCHW"),
            preferred_element_type=jnp.float32)

    def bn(y, g, b):
        mean = jnp.mean(y, axis=(0, 2, 3), keepdims=True)
        var = jnp.mean((y - mean) ** 2, axis=(0, 2, 3), keepdims=True)
        return ((y - mean) * jax.lax.rsqrt(var + EPS) * g.reshape(1, -1, 1, 1)
                + b.reshape(1, -1, 1, 1))

    x_nchw = x_nchw.astype(jnp.float32)
    out = jnp.maximum(bn(conv(x_nchw, w1), g1, b1), 0.0)
    out = bn(conv(out, w2), g2, b2) + x_nchw
    return jnp.maximum(out, 0.0)


if __name__ == "__main__":
    # Small shapes consistent with BasicBlock(in_planes=4, planes=4, stride=1).
    # NOTE: C=4 means only 4/128 lanes are used -- fine for a correctness run,
    # real ResNet widths (64..512) fill the lanes (see review item on alignment).
    N, C, H, W = 2, 4, 16, 16
    planes = 4

    key = jax.random.PRNGKey(0)
    kx, k1, k2 = jax.random.split(key, 3)

    x = jax.random.normal(kx, (N, C, H, W), dtype=jnp.float32)
    # conv weights in HWIO layout (3, 3, Cin, Cout); bias=False as in conv_layer.
    w1 = jax.random.normal(k1, (3, 3, C, planes), dtype=jnp.float32) * 0.1
    w2 = jax.random.normal(k2, (3, 3, planes, planes), dtype=jnp.float32) * 0.1
    # BatchNorm2d default init: weight=1, bias=0.
    g1 = jnp.ones((planes,), jnp.float32)
    b1 = jnp.zeros((planes,), jnp.float32)
    g2 = jnp.ones((planes,), jnp.float32)
    b2 = jnp.zeros((planes,), jnp.float32)

    out = jax.block_until_ready(basic_block(x, w1, g1, b1, w2, g2, b2))
    ref = jax.block_until_ready(basic_block_ref(x, w1, g1, b1, w2, g2, b2))

    # Tolerance accounts for bf16 MXU inputs (f32 accumulation) in both paths.
    np.testing.assert_allclose(np.asarray(out), np.asarray(ref),
                               rtol=1e-2, atol=1e-2)
    print("KERNEL_OK")
</pallas_src>

<mosaic_0001>
module attributes {stable_mosaic.version = 11 : i64} {
  func.func @_conv1_kernel(%arg0: i32, %arg1: memref<1x16x16x4xf32, #tpu.memory_space<vmem>>, %arg2: memref<36x4xbf16, #tpu.memory_space<vmem>>, %arg3: memref<1x16x16x4xf32, #tpu.memory_space<vmem>>, %arg4: memref<1x1x4xf32, #tpu.memory_space<vmem>>, %arg5: memref<1x1x4xf32, #tpu.memory_space<vmem>>) attributes {dimension_semantics = [#tpu.dimension_semantics<parallel>], iteration_bounds = array<i64: 2>, scalar_prefetch = 0 : i64, scratch_operands = 0 : i64, tpu.core_type = #tpu.core_type<tc>, window_params = [{transform_indices = @transform_0, window_bounds = array<i64: 1, 16, 16, 4>}, {pipeline_mode = #tpu.pipeline_mode<synchronous>, transform_indices = @transform_1, window_bounds = array<i64: 36, 4>}, {transform_indices = @transform_2, window_bounds = array<i64: 1, 16, 16, 4>}, {transform_indices = @transform_3, window_bounds = array<i64: 1, 1, 4>}, {transform_indices = @transform_4, window_bounds = array<i64: 1, 1, 4>}]} {
    %c0 = arith.constant 0 : index
    %c0_0 = arith.constant 0 : index
    %c0_1 = arith.constant 0 : index
    %c0_2 = arith.constant 0 : index
    %0 = vector.load %arg1[%c0, %c0_0, %c0_1, %c0_2] : memref<1x16x16x4xf32, #tpu.memory_space<vmem>>, vector<1x16x16x4xf32>
    %1 = vector.shape_cast %0 : vector<1x16x16x4xf32> to vector<16x16x4xf32>
    %cst = arith.constant 0.000000e+00 : f32
    %2 = vector.broadcast %cst : f32 to vector<1x16x4xf32>
    %3 = tpu.concatenate %2, %1, %2 in 0 : vector<1x16x4xf32>, vector<16x16x4xf32>, vector<1x16x4xf32> -> vector<18x16x4xf32>
    %cst_3 = arith.constant 0.000000e+00 : f32
    %4 = vector.broadcast %cst_3 : f32 to vector<18x1x4xf32>
    %5 = tpu.concatenate %4, %3, %4 in 1 : vector<18x1x4xf32>, vector<18x16x4xf32>, vector<18x1x4xf32> -> vector<18x18x4xf32>
    %6 = vector.extract_strided_slice %5 {offsets = [0, 0, 0], sizes = [16, 16, 4], strides = [1, 1, 1]} : vector<18x18x4xf32> to vector<16x16x4xf32>
    %7 = vector.extract_strided_slice %5 {offsets = [0, 1, 0], sizes = [16, 16, 4], strides = [1, 1, 1]} : vector<18x18x4xf32> to vector<16x16x4xf32>
    %8 = vector.extract_strided_slice %5 {offsets = [0, 2, 0], sizes = [16, 16, 4], strides = [1, 1, 1]} : vector<18x18x4xf32> to vector<16x16x4xf32>
    %9 = vector.extract_strided_slice %5 {offsets = [1, 0, 0], sizes = [16, 16, 4], strides = [1, 1, 1]} : vector<18x18x4xf32> to vector<16x16x4xf32>
    %10 = vector.extract_strided_slice %5 {offsets = [1, 1, 0], sizes = [16, 16, 4], strides = [1, 1, 1]} : vector<18x18x4xf32> to vector<16x16x4xf32>
    %11 = vector.extract_strided_slice %5 {offsets = [1, 2, 0], sizes = [16, 16, 4], strides = [1, 1, 1]} : vector<18x18x4xf32> to vector<16x16x4xf32>
    %12 = vector.extract_strided_slice %5 {offsets = [2, 0, 0], sizes = [16, 16, 4], strides = [1, 1, 1]} : vector<18x18x4xf32> to vector<16x16x4xf32>
    %13 = vector.extract_strided_slice %5 {offsets = [2, 1, 0], sizes = [16, 16, 4], strides = [1, 1, 1]} : vector<18x18x4xf32> to vector<16x16x4xf32>
    %14 = vector.extract_strided_slice %5 {offsets = [2, 2, 0], sizes = [16, 16, 4], strides = [1, 1, 1]} : vector<18x18x4xf32> to vector<16x16x4xf32>
    %15 = tpu.concatenate %6, %7, %8, %9, %10, %11, %12, %13, %14 in 2 : vector<16x16x4xf32>, vector<16x16x4xf32>, vector<16x16x4xf32>, vector<16x16x4xf32>, vector<16x16x4xf32>, vector<16x16x4xf32>, vector<16x16x4xf32>, vector<16x16x4xf32>, vector<16x16x4xf32> -> vector<16x16x36xf32>
    %16 = vector.shape_cast %15 : vector<16x16x36xf32> to vector<256x36xf32>
    %17 = arith.truncf %16 : vector<256x36xf32> to vector<256x36xbf16>
    %c0_4 = arith.constant 0 : index
    %c0_5 = arith.constant 0 : index
    %18 = vector.load %arg2[%c0_4, %c0_5] : memref<36x4xbf16, #tpu.memory_space<vmem>>, vector<36x4xbf16>
    %cst_6 = arith.constant dense<0.000000e+00> : vector<256x4xf32>
    %19 = tpu.matmul %17, %18, %cst_6 {dimension_numbers = #tpu.dot_dimension_numbers<[1], [0], [0], [1], [0, 0, 1, 1], [], []>} : vector<256x36xbf16>, vector<36x4xbf16>, vector<256x4xf32> -> vector<256x4xf32>
    %20 = vector.shape_cast %19 : vector<256x4xf32> to vector<16x16x4xf32>
    %c0_7 = arith.constant 0 : index
    %c0_8 = arith.constant 0 : index
    %c0_9 = arith.constant 0 : index
    %c0_10 = arith.constant 0 : index
    %21 = vector.load %arg3[%c0_7, %c0_8, %c0_9, %c0_10] : memref<1x16x16x4xf32, #tpu.memory_space<vmem>>, vector<1x16x16x4xf32>
    %22 = vector.shape_cast %21 : vector<1x16x16x4xf32> to vector<16x16x4xf32>
    %23 = vector.shape_cast %20 : vector<16x16x4xf32> to vector<1x16x16x4xf32>
    tpu.vector_store %arg3[%c0_7, %c0_8, %c0_9, %c0_10], %23 {strides = array<i32>} : memref<1x16x16x4xf32, #tpu.memory_space<vmem>>, vector<1x16x16x4xf32>,
    %cst_11 = arith.constant dense<0.000000e+00> : vector<4xf32>
    %24 = vector.multi_reduction <add>, %19, %cst_11 [0] : vector<256x4xf32> to vector<4xf32>
    %25 = vector.shape_cast %24 : vector<4xf32> to vector<1x4xf32>
    %c0_12 = arith.constant 0 : index
    %c0_13 = arith.constant 0 : index
    %c0_14 = arith.constant 0 : index
    %26 = vector.load %arg4[%c0_12, %c0_13, %c0_14] : memref<1x1x4xf32, #tpu.memory_space<vmem>>, vector<1x1x4xf32>
    %27 = vector.shape_cast %26 : vector<1x1x4xf32> to vector<1x4xf32>
    %28 = vector.shape_cast %25 : vector<1x4xf32> to vector<1x1x4xf32>
    tpu.vector_store %arg4[%c0_12, %c0_13, %c0_14], %28 {strides = array<i32>} : memref<1x1x4xf32, #tpu.memory_space<vmem>>, vector<1x1x4xf32>,
    %29 = arith.mulf %19, %19 : vector<256x4xf32>
    %cst_15 = arith.constant dense<0.000000e+00> : vector<4xf32>
    %30 = vector.multi_reduction <add>, %29, %cst_15 [0] : vector<256x4xf32> to vector<4xf32>
    %31 = vector.shape_cast %30 : vector<4xf32> to vector<1x4xf32>
    %c0_16 = arith.constant 0 : index
    %c0_17 = arith.constant 0 : index
    %c0_18 = arith.constant 0 : index
    %32 = vector.load %arg5[%c0_16, %c0_17, %c0_18] : memref<1x1x4xf32, #tpu.memory_space<vmem>>, vector<1x1x4xf32>
    %33 = vector.shape_cast %32 : vector<1x1x4xf32> to vector<1x4xf32>
    %34 = vector.shape_cast %31 : vector<1x4xf32> to vector<1x1x4xf32>
    tpu.vector_store %arg5[%c0_16, %c0_17, %c0_18], %34 {strides = array<i32>} : memref<1x1x4xf32, #tpu.memory_space<vmem>>, vector<1x1x4xf32>,
    return
  }
  func.func @transform_0(%arg0: i32) -> (i32, i32, i32, i32) {
    %c0_i32 = arith.constant 0 : i32
    %c0_i32_0 = arith.constant 0 : i32
    %c0_i32_1 = arith.constant 0 : i32
    %c0_i32_2 = arith.constant 0 : i32
    return %arg0, %c0_i32, %c0_i32_0, %c0_i32_1 : i32, i32, i32, i32
  }
  func.func @transform_1(%arg0: i32) -> (i32, i32) {
    %c0_i32 = arith.constant 0 : i32
    %c0_i32_0 = arith.constant 0 : i32
    %c0_i32_1 = arith.constant 0 : i32
    return %c0_i32, %c0_i32_0 : i32, i32
  }
  func.func @transform_2(%arg0: i32) -> (i32, i32, i32, i32) {
    %c0_i32 = arith.constant 0 : i32
    %c0_i32_0 = arith.constant 0 : i32
    %c0_i32_1 = arith.constant 0 : i32
    %c0_i32_2 = arith.constant 0 : i32
    return %arg0, %c0_i32, %c0_i32_0, %c0_i32_1 : i32, i32, i32, i32
  }
  func.func @transform_3(%arg0: i32) -> (i32, i32, i32) {
    %c0_i32 = arith.constant 0 : i32
    %c0_i32_0 = arith.constant 0 : i32
    %c0_i32_1 = arith.constant 0 : i32
    return %arg0, %c0_i32, %c0_i32_0 : i32, i32, i32
  }
  func.func @transform_4(%arg0: i32) -> (i32, i32, i32) {
    %c0_i32 = arith.constant 0 : i32
    %c0_i32_0 = arith.constant 0 : i32
    %c0_i32_1 = arith.constant 0 : i32
    return %arg0, %c0_i32, %c0_i32_0 : i32, i32, i32
  }
}

module attributes {stable_mosaic.version = 11 : i64} {
  func.func @_bn_add_relu_kernel(%arg0: i32, %arg1: memref<1x16x16x4xf32, #tpu.memory_space<vmem>>, %arg2: memref<1x16x16x4xf32, #tpu.memory_space<vmem>>, %arg3: memref<1x1x1x4xf32, #tpu.memory_space<vmem>>, %arg4: memref<1x1x1x4xf32, #tpu.memory_space<vmem>>, %arg5: memref<1x16x16x4xf32, #tpu.memory_space<vmem>>) attributes {dimension_semantics = [#tpu.dimension_semantics<parallel>], iteration_bounds = array<i64: 2>, scalar_prefetch = 0 : i64, scratch_operands = 0 : i64, tpu.core_type = #tpu.core_type<tc>, window_params = [{transform_indices = @transform_0, window_bounds = array<i64: 1, 16, 16, 4>}, {transform_indices = @transform_1, window_bounds = array<i64: 1, 16, 16, 4>}, {pipeline_mode = #tpu.pipeline_mode<synchronous>, transform_indices = @transform_2, window_bounds = array<i64: 1, 1, 1, 4>}, {pipeline_mode = #tpu.pipeline_mode<synchronous>, transform_indices = @transform_3, window_bounds = array<i64: 1, 1, 1, 4>}, {transform_indices = @transform_4, window_bounds = array<i64: 1, 16, 16, 4>}]} {
    %c0 = arith.constant 0 : index
    %c0_0 = arith.constant 0 : index
    %c0_1 = arith.constant 0 : index
    %c0_2 = arith.constant 0 : index
    %0 = vector.load %arg1[%c0, %c0_0, %c0_1, %c0_2] : memref<1x16x16x4xf32, #tpu.memory_space<vmem>>, vector<1x16x16x4xf32>
    %c0_3 = arith.constant 0 : index
    %c0_4 = arith.constant 0 : index
    %c0_5 = arith.constant 0 : index
    %c0_6 = arith.constant 0 : index
    %1 = vector.load %arg3[%c0_3, %c0_4, %c0_5, %c0_6] : memref<1x1x1x4xf32, #tpu.memory_space<vmem>>, vector<1x1x1x4xf32>
    %2 = vector.broadcast %1 : vector<1x1x1x4xf32> to vector<1x16x16x4xf32>
    %3 = arith.mulf %0, %2 : vector<1x16x16x4xf32>
    %c0_7 = arith.constant 0 : index
    %c0_8 = arith.constant 0 : index
    %c0_9 = arith.constant 0 : index
    %c0_10 = arith.constant 0 : index
    %4 = vector.load %arg4[%c0_7, %c0_8, %c0_9, %c0_10] : memref<1x1x1x4xf32, #tpu.memory_space<vmem>>, vector<1x1x1x4xf32>
    %5 = vector.broadcast %4 : vector<1x1x1x4xf32> to vector<1x16x16x4xf32>
    %6 = arith.addf %3, %5 : vector<1x16x16x4xf32>
    %c0_11 = arith.constant 0 : index
    %c0_12 = arith.constant 0 : index
    %c0_13 = arith.constant 0 : index
    %c0_14 = arith.constant 0 : index
    %7 = vector.load %arg2[%c0_11, %c0_12, %c0_13, %c0_14] : memref<1x16x16x4xf32, #tpu.memory_space<vmem>>, vector<1x16x16x4xf32>
    %8 = arith.addf %6, %7 : vector<1x16x16x4xf32>
    %cst = arith.constant 0.000000e+00 : f32
    %9 = vector.broadcast %cst : f32 to vector<1x16x16x4xf32>
    %10 = arith.maximumf %8, %9 : vector<1x16x16x4xf32>
    %c0_15 = arith.constant 0 : index
    %c0_16 = arith.constant 0 : index
    %c0_17 = arith.constant 0 : index
    %c0_18 = arith.constant 0 : index
    %11 = vector.load %arg5[%c0_15, %c0_16, %c0_17, %c0_18] : memref<1x16x16x4xf32, #tpu.memory_space<vmem>>, vector<1x16x16x4xf32>
    tpu.vector_store %arg5[%c0_15, %c0_16, %c0_17, %c0_18], %10 {strides = array<i32>} : memref<1x16x16x4xf32, #tpu.memory_space<vmem>>, vector<1x16x16x4xf32>,
    return
  }
  func.func @transform_0(%arg0: i32) -> (i32, i32, i32, i32) {
    %c0_i32 = arith.constant 0 : i32
    %c0_i32_0 = arith.constant 0 : i32
    %c0_i32_1 = arith.constant 0 : i32
    %c0_i32_2 = arith.constant 0 : i32
    return %arg0, %c0_i32, %c0_i32_0, %c0_i32_1 : i32, i32, i32, i32
  }
  func.func @transform_1(%arg0: i32) -> (i32, i32, i32, i32) {
    %c0_i32 = arith.constant 0 : i32
    %c0_i32_0 = arith.constant 0 : i32
    %c0_i32_1 = arith.constant 0 : i32
    %c0_i32_2 = arith.constant 0 : i32
    return %arg0, %c0_i32, %c0_i32_0, %c0_i32_1 : i32, i32, i32, i32
  }
  func.func @transform_2(%arg0: i32) -> (i32, i32, i32, i32) {
    %c0_i32 = arith.constant 0 : i32
    %c0_i32_0 = arith.constant 0 : i32
    %c0_i32_1 = arith.constant 0 : i32
    %c0_i32_2 = arith.constant 0 : i32
    %c0_i32_3 = arith.constant 0 : i32
    return %c0_i32, %c0_i32_0, %c0_i32_1, %c0_i32_2 : i32, i32, i32, i32
  }
  func.func @transform_3(%arg0: i32) -> (i32, i32, i32, i32) {
    %c0_i32 = arith.constant 0 : i32
    %c0_i32_0 = arith.constant 0 : i32
    %c0_i32_1 = arith.constant 0 : i32
    %c0_i32_2 = arith.constant 0 : i32
    %c0_i32_3 = arith.constant 0 : i32
    return %c0_i32, %c0_i32_0, %c0_i32_1, %c0_i32_2 : i32, i32, i32, i32
  }
  func.func @transform_4(%arg0: i32) -> (i32, i32, i32, i32) {
    %c0_i32 = arith.constant 0 : i32
    %c0_i32_0 = arith.constant 0 : i32
    %c0_i32_1 = arith.constant 0 : i32
    %c0_i32_2 = arith.constant 0 : i32
    return %arg0, %c0_i32, %c0_i32_0, %c0_i32_1 : i32, i32, i32, i32
  }
}

module attributes {stable_mosaic.version = 11 : i64} {
  func.func @_bn_relu_conv2_kernel(%arg0: i32, %arg1: memref<1x16x16x4xf32, #tpu.memory_space<vmem>>, %arg2: memref<36x4xbf16, #tpu.memory_space<vmem>>, %arg3: memref<1x1x1x4xf32, #tpu.memory_space<vmem>>, %arg4: memref<1x1x1x4xf32, #tpu.memory_space<vmem>>, %arg5: memref<1x16x16x4xf32, #tpu.memory_space<vmem>>, %arg6: memref<1x1x4xf32, #tpu.memory_space<vmem>>, %arg7: memref<1x1x4xf32, #tpu.memory_space<vmem>>) attributes {dimension_semantics = [#tpu.dimension_semantics<parallel>], iteration_bounds = array<i64: 2>, scalar_prefetch = 0 : i64, scratch_operands = 0 : i64, tpu.core_type = #tpu.core_type<tc>, window_params = [{transform_indices = @transform_0, window_bounds = array<i64: 1, 16, 16, 4>}, {pipeline_mode = #tpu.pipeline_mode<synchronous>, transform_indices = @transform_1, window_bounds = array<i64: 36, 4>}, {pipeline_mode = #tpu.pipeline_mode<synchronous>, transform_indices = @transform_2, window_bounds = array<i64: 1, 1, 1, 4>}, {pipeline_mode = #tpu.pipeline_mode<synchronous>, transform_indices = @transform_3, window_bounds = array<i64: 1, 1, 1, 4>}, {transform_indices = @transform_4, window_bounds = array<i64: 1, 16, 16, 4>}, {transform_indices = @transform_5, window_bounds = array<i64: 1, 1, 4>}, {transform_indices = @transform_6, window_bounds = array<i64: 1, 1, 4>}]} {
    %c0 = arith.constant 0 : index
    %c0_0 = arith.constant 0 : index
    %c0_1 = arith.constant 0 : index
    %c0_2 = arith.constant 0 : index
    %0 = vector.load %arg1[%c0, %c0_0, %c0_1, %c0_2] : memref<1x16x16x4xf32, #tpu.memory_space<vmem>>, vector<1x16x16x4xf32>
    %1 = vector.shape_cast %0 : vector<1x16x16x4xf32> to vector<16x16x4xf32>
    %c0_3 = arith.constant 0 : index
    %c0_4 = arith.constant 0 : index
    %c0_5 = arith.constant 0 : index
    %c0_6 = arith.constant 0 : index
    %2 = vector.load %arg3[%c0_3, %c0_4, %c0_5, %c0_6] : memref<1x1x1x4xf32, #tpu.memory_space<vmem>>, vector<1x1x1x4xf32>
    %3 = vector.shape_cast %2 : vector<1x1x1x4xf32> to vector<1x4xf32>
    %4 = vector.shape_cast %3 : vector<1x4xf32> to vector<1x1x4xf32>
    %5 = vector.broadcast %4 : vector<1x1x4xf32> to vector<16x16x4xf32>
    %6 = arith.mulf %1, %5 : vector<16x16x4xf32>
    %c0_7 = arith.constant 0 : index
    %c0_8 = arith.constant 0 : index
    %c0_9 = arith.constant 0 : index
    %c0_10 = arith.constant 0 : index
    %7 = vector.load %arg4[%c0_7, %c0_8, %c0_9, %c0_10] : memref<1x1x1x4xf32, #tpu.memory_space<vmem>>, vector<1x1x1x4xf32>
    %8 = vector.shape_cast %7 : vector<1x1x1x4xf32> to vector<1x4xf32>
    %9 = vector.shape_cast %8 : vector<1x4xf32> to vector<1x1x4xf32>
    %10 = vector.broadcast %9 : vector<1x1x4xf32> to vector<16x16x4xf32>
    %11 = arith.addf %6, %10 : vector<16x16x4xf32>
    %cst = arith.constant 0.000000e+00 : f32
    %12 = vector.broadcast %cst : f32 to vector<16x16x4xf32>
    %13 = arith.maximumf %11, %12 : vector<16x16x4xf32>
    %cst_11 = arith.constant 0.000000e+00 : f32
    %14 = vector.broadcast %cst_11 : f32 to vector<1x16x4xf32>
    %15 = tpu.concatenate %14, %13, %14 in 0 : vector<1x16x4xf32>, vector<16x16x4xf32>, vector<1x16x4xf32> -> vector<18x16x4xf32>
    %cst_12 = arith.constant 0.000000e+00 : f32
    %16 = vector.broadcast %cst_12 : f32 to vector<18x1x4xf32>
    %17 = tpu.concatenate %16, %15, %16 in 1 : vector<18x1x4xf32>, vector<18x16x4xf32>, vector<18x1x4xf32> -> vector<18x18x4xf32>
    %18 = vector.extract_strided_slice %17 {offsets = [0, 0, 0], sizes = [16, 16, 4], strides = [1, 1, 1]} : vector<18x18x4xf32> to vector<16x16x4xf32>
    %19 = vector.extract_strided_slice %17 {offsets = [0, 1, 0], sizes = [16, 16, 4], strides = [1, 1, 1]} : vector<18x18x4xf32> to vector<16x16x4xf32>
    %20 = vector.extract_strided_slice %17 {offsets = [0, 2, 0], sizes = [16, 16, 4], strides = [1, 1, 1]} : vector<18x18x4xf32> to vector<16x16x4xf32>
    %21 = vector.extract_strided_slice %17 {offsets = [1, 0, 0], sizes = [16, 16, 4], strides = [1, 1, 1]} : vector<18x18x4xf32> to vector<16x16x4xf32>
    %22 = vector.extract_strided_slice %17 {offsets = [1, 1, 0], sizes = [16, 16, 4], strides = [1, 1, 1]} : vector<18x18x4xf32> to vector<16x16x4xf32>
    %23 = vector.extract_strided_slice %17 {offsets = [1, 2, 0], sizes = [16, 16, 4], strides = [1, 1, 1]} : vector<18x18x4xf32> to vector<16x16x4xf32>
    %24 = vector.extract_strided_slice %17 {offsets = [2, 0, 0], sizes = [16, 16, 4], strides = [1, 1, 1]} : vector<18x18x4xf32> to vector<16x16x4xf32>
    %25 = vector.extract_strided_slice %17 {offsets = [2, 1, 0], sizes = [16, 16, 4], strides = [1, 1, 1]} : vector<18x18x4xf32> to vector<16x16x4xf32>
    %26 = vector.extract_strided_slice %17 {offsets = [2, 2, 0], sizes = [16, 16, 4], strides = [1, 1, 1]} : vector<18x18x4xf32> to vector<16x16x4xf32>
    %27 = tpu.concatenate %18, %19, %20, %21, %22, %23, %24, %25, %26 in 2 : vector<16x16x4xf32>, vector<16x16x4xf32>, vector<16x16x4xf32>, vector<16x16x4xf32>, vector<16x16x4xf32>, vector<16x16x4xf32>, vector<16x16x4xf32>, vector<16x16x4xf32>, vector<16x16x4xf32> -> vector<16x16x36xf32>
    %28 = vector.shape_cast %27 : vector<16x16x36xf32> to vector<256x36xf32>
    %29 = arith.truncf %28 : vector<256x36xf32> to vector<256x36xbf16>
    %c0_13 = arith.constant 0 : index
    %c0_14 = arith.constant 0 : index
    %30 = vector.load %arg2[%c0_13, %c0_14] : memref<36x4xbf16, #tpu.memory_space<vmem>>, vector<36x4xbf16>
    %cst_15 = arith.constant dense<0.000000e+00> : vector<256x4xf32>
    %31 = tpu.matmul %29, %30, %cst_15 {dimension_numbers = #tpu.dot_dimension_numbers<[1], [0], [0], [1], [0, 0, 1, 1], [], []>} : vector<256x36xbf16>, vector<36x4xbf16>, vector<256x4xf32> -> vector<256x4xf32>
    %32 = vector.shape_cast %31 : vector<256x4xf32> to vector<16x16x4xf32>
    %c0_16 = arith.constant 0 : index
    %c0_17 = arith.constant 0 : index
    %c0_18 = arith.constant 0 : index
    %c0_19 = arith.constant 0 : index
    %33 = vector.load %arg5[%c0_16, %c0_17, %c0_18, %c0_19] : memref<1x16x16x4xf32, #tpu.memory_space<vmem>>, vector<1x16x16x4xf32>
    %34 = vector.shape_cast %33 : vector<1x16x16x4xf32> to vector<16x16x4xf32>
    %35 = vector.shape_cast %32 : vector<16x16x4xf32> to vector<1x16x16x4xf32>
    tpu.vector_store %arg5[%c0_16, %c0_17, %c0_18, %c0_19], %35 {strides = array<i32>} : memref<1x16x16x4xf32, #tpu.memory_space<vmem>>, vector<1x16x16x4xf32>,
    %cst_20 = arith.constant dense<0.000000e+00> : vector<4xf32>
    %36 = vector.multi_reduction <add>, %31, %cst_20 [0] : vector<256x4xf32> to vector<4xf32>
    %37 = vector.shape_cast %36 : vector<4xf32> to vector<1x4xf32>
    %c0_21 = arith.constant 0 : index
    %c0_22 = arith.constant 0 : index
    %c0_23 = arith.constant 0 : index
    %38 = vector.load %arg6[%c0_21, %c0_22, %c0_23] : memref<1x1x4xf32, #tpu.memory_space<vmem>>, vector<1x1x4xf32>
    %39 = vector.shape_cast %38 : vector<1x1x4xf32> to vector<1x4xf32>
    %40 = vector.shape_cast %37 : vector<1x4xf32> to vector<1x1x4xf32>
    tpu.vector_store %arg6[%c0_21, %c0_22, %c0_23], %40 {strides = array<i32>} : memref<1x1x4xf32, #tpu.memory_space<vmem>>, vector<1x1x4xf32>,
    %41 = arith.mulf %31, %31 : vector<256x4xf32>
    %cst_24 = arith.constant dense<0.000000e+00> : vector<4xf32>
    %42 = vector.multi_reduction <add>, %41, %cst_24 [0] : vector<256x4xf32> to vector<4xf32>
    %43 = vector.shape_cast %42 : vector<4xf32> to vector<1x4xf32>
    %c0_25 = arith.constant 0 : index
    %c0_26 = arith.constant 0 : index
    %c0_27 = arith.constant 0 : index
    %44 = vector.load %arg7[%c0_25, %c0_26, %c0_27] : memref<1x1x4xf32, #tpu.memory_space<vmem>>, vector<1x1x4xf32>
    %45 = vector.shape_cast %44 : vector<1x1x4xf32> to vector<1x4xf32>
    %46 = vector.shape_cast %43 : vector<1x4xf32> to vector<1x1x4xf32>
    tpu.vector_store %arg7[%c0_25, %c0_26, %c0_27], %46 {strides = array<i32>} : memref<1x1x4xf32, #tpu.memory_space<vmem>>, vector<1x1x4xf32>,
    return
  }
  func.func @transform_0(%arg0: i32) -> (i32, i32, i32, i32) {
    %c0_i32 = arith.constant 0 : i32
    %c0_i32_0 = arith.constant 0 : i32
    %c0_i32_1 = arith.constant 0 : i32
    %c0_i32_2 = arith.constant 0 : i32
    return %arg0, %c0_i32, %c0_i32_0, %c0_i32_1 : i32, i32, i32, i32
  }
  func.func @transform_1(%arg0: i32) -> (i32, i32) {
    %c0_i32 = arith.constant 0 : i32
    %c0_i32_0 = arith.constant 0 : i32
    %c0_i32_1 = arith.constant 0 : i32
    return %c0_i32, %c0_i32_0 : i32, i32
  }
  func.func @transform_2(%arg0: i32) -> (i32, i32, i32, i32) {
    %c0_i32 = arith.constant 0 : i32
    %c0_i32_0 = arith.constant 0 : i32
    %c0_i32_1 = arith.constant 0 : i32
    %c0_i32_2 = arith.constant 0 : i32
    %c0_i32_3 = arith.constant 0 : i32
    return %c0_i32, %c0_i32_0, %c0_i32_1, %c0_i32_2 : i32, i32, i32, i32
  }
  func.func @transform_3(%arg0: i32) -> (i32, i32, i32, i32) {
    %c0_i32 = arith.constant 0 : i32
    %c0_i32_0 = arith.constant 0 : i32
    %c0_i32_1 = arith.constant 0 : i32
    %c0_i32_2 = arith.constant 0 : i32
    %c0_i32_3 = arith.constant 0 : i32
    return %c0_i32, %c0_i32_0, %c0_i32_1, %c0_i32_2 : i32, i32, i32, i32
  }
  func.func @transform_4(%arg0: i32) -> (i32, i32, i32, i32) {
    %c0_i32 = arith.constant 0 : i32
    %c0_i32_0 = arith.constant 0 : i32
    %c0_i32_1 = arith.constant 0 : i32
    %c0_i32_2 = arith.constant 0 : i32
    return %arg0, %c0_i32, %c0_i32_0, %c0_i32_1 : i32, i32, i32, i32
  }
  func.func @transform_5(%arg0: i32) -> (i32, i32, i32) {
    %c0_i32 = arith.constant 0 : i32
    %c0_i32_0 = arith.constant 0 : i32
    %c0_i32_1 = arith.constant 0 : i32
    return %arg0, %c0_i32, %c0_i32_0 : i32, i32, i32
  }
  func.func @transform_6(%arg0: i32) -> (i32, i32, i32) {
    %c0_i32 = arith.constant 0 : i32
    %c0_i32_0 = arith.constant 0 : i32
    %c0_i32_1 = arith.constant 0 : i32
    return %arg0, %c0_i32, %c0_i32_0 : i32, i32, i32
  }
}

</mosaic_0001>

<bundles_post_ra>
// kernel: basic_block_nhwc.5
= control target key start
LH: loop header
LB: loop body
LE: loop exit
PB: predicated region body
PF: predicated region fallthrough
CT: control target
= control target key end

     0   :  { %s583_s15 = smov 0   ;;  %s816_s0 = inlined_call_operand.vmem [shape: f32[2,16,16,4], index: 0, kind: input, shape index: {}]   ;;  %s817_s1 = inlined_call_operand.vmem [shape: f32[2,16,16,4], index: 1, kind: input, shape index: {}]   ;;  %s818_s2 = inlined_call_operand.vmem [shape: f32[1,1,1,4], index: 2, kind: input, shape index: {}]   ;;  %s819_s3 = inlined_call_operand.vmem [shape: f32[1,1,1,4], index: 3, kind: input, shape index: {}]   ;;  %s820_s4 = inlined_call_operand.vmem [shape: f32[2,16,16,4], index: 4, kind: output, shape index: {}]  }
   0x1 LB: > { %s524_s16 = sadd.s32 4294967295, %s556_s15   ;;  %p528_p0 = scmp.ge.s32.totalorder %s556_s15, 1  ;;  %s556_s15 = sphi %s583_s15, %s14_s15  }
   0x2   : > { %p172_p1 = scmp.lt.s32.totalorder %s556_s15, 3 }
   0x4   : > { %p173_p2 = pnand %p528_p0, %p172_p1 }
   0x5   : > { %p203_p3 = scmp.lt.s32.totalorder (!%p173_p2), %s524_s16, 1  ;;  %v596_v0 = vld [vmem:[%s818_s2] ss:$0 sm:$0xff] (!%p173_p2)  ;;  %vm424_vm0 = vcmask (!%p173_p2), 31744  }
   0x6   : > { %176 = sbr.rel (%p173_p2) target bundleno = 55 (0x37), region = 36  ;;  %v614_v2 = vld [vmem:[%s819_s3] ss:$0 sm:$0xff] (!%p173_p2) }
   0xd   : > { %s822_s16 = smov (!%p203_p3, %s524_s16), 1 }
   0xe   : > { %s591_s17 = sshll.u32 %s822_s16, 8 }
   0xf   : > { %s602_s22 = scalar_lea.vmem %s816_s0, %s591_s17  ;;  %s608_s25 = scalar_lea.vmem %s817_s1, %s591_s17 }
  0x10   : > { %v218_v1 = vld [vmem:[%s602_s22] sm:$0xff]  ;;  %v219_v3 = vld [vmem:[%s602_s22 + $0x8] sm:$0xff]  ;;  %v220_v7 = vld [vmem:[%s602_s22 + $0x10] sm:$0xff]  ;;  %s644_s30 = scalar_lea.vmem %s820_s4, %s591_s17 }
  0x11   : > { %v257_v4 = vmul.f32 %v596_v0, %v218_v1  ;;  %v328_v5 = vld [vmem:[%s608_s25] sm:$0xff]  ;;  %v258_v6 = vmul.f32 %v596_v0, %v219_v3  ;;  %v329_v8 = vld [vmem:[%s608_s25 + $0x8] sm:$0xff]  ;;  %v259_v9 = vmul.f32 %v596_v0, %v220_v7  ;;  %v221_v10 = vld [vmem:[%s602_s22 + $0x18] sm:$0xff] }
  0x12   : > { %v222_v11 = vld [vmem:[%s602_s22 + $0x20] sm:$0xff]  ;;  %v330_v14 = vld [vmem:[%s608_s25 + $0x10] sm:$0xff]  ;;  %v260_v15 = vmul.f32 %v596_v0, %v221_v10  ;;  %v331_v16 = vld [vmem:[%s608_s25 + $0x18] sm:$0xff] }
  0x13   : > { %v296_v12 = vadd.f32 %v614_v2, %v257_v4  ;;  %v297_v13 = vadd.f32 %v614_v2, %v258_v6  ;;  %v261_v17 = vmul.f32 %v596_v0, %v222_v11  ;;  %v223_v18 = vld [vmem:[%s602_s22 + $0x28] sm:$0xff]  ;;  %v298_v19 = vadd.f32 %v614_v2, %v259_v9  ;;  %v332_v20 = vld [vmem:[%s608_s25 + $0x20] sm:$0xff]  ;;  %v224_v22 = vld [vmem:[%s602_s22 + $0x30] sm:$0xff] }
  0x14   : > { %v262_v21 = vmul.f32 %v596_v0, %v223_v18  ;;  %v225_v23 = vld [vmem:[%s602_s22 + $0x38] sm:$0xff]  ;;  %v299_v26 = vadd.f32 %v614_v2, %v260_v15  ;;  %v333_v28 = vld [vmem:[%s608_s25 + $0x28] sm:$0xff]  ;;  %v263_v31 = vmul.f32 %v596_v0, %v224_v22  ;;  %v226_v33 = vld [vmem:[%s602_s22 + $0x40] sm:$0xff] }
  0x15   : > { %v360_v24 = vadd.f32 %v328_v5, %v296_v12  ;;  %v361_v25 = vadd.f32 %v329_v8, %v297_v13  ;;  %v300_v27 = vadd.f32 %v614_v2, %v261_v17  ;;  %v362_v29 = vadd.f32 %v330_v14, %v298_v19  ;;  %v227_v34 = vld [vmem:[%s602_s22 + $0x48] sm:$0xff]  ;;  %v334_v39 = vld [vmem:[%s608_s25 + $0x30] sm:$0xff]  ;;  %v335_v40 = vld [vmem:[%s608_s25 + $0x38] sm:$0xff] }
  0x16   : > { %v301_v30 = vadd.f32 %v614_v2, %v262_v21  ;;  %v264_v32 = vmul.f32 %v596_v0, %v225_v23  ;;  %v363_v37 = vadd.f32 %v331_v16, %v299_v26  ;;  %v228_v41 = vld [vmem:[%s602_s22 + $0x50] sm:$0xff]  ;;  %v302_v44 = vadd.f32 %v614_v2, %v263_v31  ;;  %v229_v46 = vld [vmem:[%s602_s22 + $0x58] sm:$0xff]  ;;  %v230_v47 = vld [vmem:[%s602_s22 + $0x60] sm:$0xff] }
  0x17   : > { %v392_v35 = vmax.f32 %v360_v24, 0.0  ;;  %v393_v36 = vmax.f32 %v361_v25, 0.0  ;;  %v364_v38 = vadd.f32 %v332_v20, %v300_v27  ;;  %v394_v42 = vmax.f32 %v362_v29, 0.0  ;;  %v231_v52 = vld [vmem:[%s602_s22 + $0x68] sm:$0xff]  ;;  %v336_v56 = vld [vmem:[%s608_s25 + $0x40] sm:$0xff]  ;;  %v338_v61 = vld [vmem:[%s608_s25 + $0x50] sm:$0xff] }
  0x18   : > { %v365_v43 = vadd.f32 %v333_v28, %v301_v30  ;;  %v303_v45 = vadd.f32 %v614_v2, %v264_v32  ;;  %v395_v48 = vmax.f32 %v363_v37, 0.0  ;;  %v265_v50 = vmul.f32 %v596_v0, %v226_v33  ;;  %v337_v57 = vld [vmem:[%s608_s25 + $0x48] sm:$0xff]  ;;  %v232_v1 = vld [vmem:[%s602_s22 + $0x70] sm:$0xff]  ;;  %v233_v3 = vld [vmem:[%s602_s22 + $0x78] sm:$0xff] }
  0x19   : > { %425 = vst.msk [vmem:[%s644_s30] sm:$0xff] %vm424_vm0, %v392_v35  ;;  %426 = vst.msk [vmem:[%s644_s30 + $0x8] sm:$0xff] %vm424_vm0, %v393_v36  ;;  %v396_v49 = vmax.f32 %v364_v38, 0.0  ;;  %v266_v51 = vmul.f32 %v596_v0, %v227_v34  ;;  %v366_v54 = vadd.f32 %v334_v39, %v302_v44  ;;  %v267_v58 = vmul.f32 %v596_v0, %v228_v41  ;;  %v339_v7 = vld [vmem:[%s608_s25 + $0x58] sm:$0xff]  ;;  %v340_v8 = vld [vmem:[%s608_s25 + $0x60] sm:$0xff] }
  0x1a   : > { %427 = vst.msk [vmem:[%s644_s30 + $0x10] sm:$0xff] %vm424_vm0, %v394_v42  ;;  %v397_v53 = vmax.f32 %v365_v43, 0.0  ;;  %v367_v55 = vadd.f32 %v335_v40, %v303_v45  ;;  %428 = vst.msk [vmem:[%s644_s30 + $0x18] sm:$0xff] %vm424_vm0, %v395_v48  ;;  %v304_v59 = vadd.f32 %v614_v2, %v265_v50  ;;  %v268_v62 = vmul.f32 %v596_v0, %v229_v46  ;;  %v341_v14 = vld [vmem:[%s608_s25 + $0x68] sm:$0xff]  ;;  %v234_v19 = vld [vmem:[%s602_s22 + $0x80] sm:$0xff] }
  0x1b   : > { %429 = vst.msk [vmem:[%s644_s30 + $0x20] sm:$0xff] %vm424_vm0, %v396_v49  ;;  %v305_v60 = vadd.f32 %v614_v2, %v266_v51  ;;  %v269_v63 = vmul.f32 %v596_v0, %v230_v47  ;;  %v398_v4 = vmax.f32 %v366_v54, 0.0  ;;  %v306_v6 = vadd.f32 %v614_v2, %v267_v58  ;;  %v235_v20 = vld [vmem:[%s602_s22 + $0x88] sm:$0xff]  ;;  %v342_v25 = vld [vmem:[%s608_s25 + $0x70] sm:$0xff]  ;;  %v343_v26 = vld [vmem:[%s608_s25 + $0x78] sm:$0xff] }
  0x1c   : > { %430 = vst.msk [vmem:[%s644_s30 + $0x28] sm:$0xff] %vm424_vm0, %v397_v53  ;;  %v399_v5 = vmax.f32 %v367_v55, 0.0  ;;  %v270_v9 = vmul.f32 %v596_v0, %v231_v52  ;;  %v368_v10 = vadd.f32 %v336_v56, %v304_v59  ;;  %v307_v12 = vadd.f32 %v614_v2, %v268_v62  ;;  %v236_v27 = vld [vmem:[%s602_s22 + $0x90] sm:$0xff]  ;;  %v237_v32 = vld [vmem:[%s602_s22 + $0x98] sm:$0xff]  ;;  %v238_v33 = vld [vmem:[%s602_s22 + $0xa0] sm:$0xff] }
  0x1d   : > { %v369_v11 = vadd.f32 %v337_v57, %v305_v60  ;;  %v308_v13 = vadd.f32 %v614_v2, %v269_v63  ;;  %431 = vst.msk [vmem:[%s644_s30 + $0x30] sm:$0xff] %vm424_vm0, %v398_v4  ;;  %v370_v15 = vadd.f32 %v338_v61, %v306_v6  ;;  %v271_v17 = vmul.f32 %v596_v0, %v232_v1  ;;  %v239_v38 = vld [vmem:[%s602_s22 + $0xa8] sm:$0xff]  ;;  %v344_v42 = vld [vmem:[%s608_s25 + $0x80] sm:$0xff]  ;;  %v346_v47 = vld [vmem:[%s608_s25 + $0x90] sm:$0xff] }
  0x1e   : > { %432 = vst.msk [vmem:[%s644_s30 + $0x38] sm:$0xff] %vm424_vm0, %v399_v5  ;;  %v309_v16 = vadd.f32 %v614_v2, %v270_v9  ;;  %v272_v18 = vmul.f32 %v596_v0, %v233_v3  ;;  %v400_v21 = vmax.f32 %v368_v10, 0.0  ;;  %v371_v23 = vadd.f32 %v339_v7, %v307_v12  ;;  %v345_v43 = vld [vmem:[%s608_s25 + $0x88] sm:$0xff]  ;;  %v240_v50 = vld [vmem:[%s602_s22 + $0xb0] sm:$0xff]  ;;  %v241_v51 = vld [vmem:[%s602_s22 + $0xb8] sm:$0xff] }
  0x1f   : > { %v401_v22 = vmax.f32 %v369_v11, 0.0  ;;  %v372_v24 = vadd.f32 %v340_v8, %v308_v13  ;;  %v402_v28 = vmax.f32 %v370_v15, 0.0  ;;  %v310_v30 = vadd.f32 %v614_v2, %v271_v17  ;;  %v347_v55 = vld [vmem:[%s608_s25 + $0x98] sm:$0xff]  ;;  %v348_v56 = vld [vmem:[%s608_s25 + $0xa0] sm:$0xff]  ;;  %v349_v62 = vld [vmem:[%s608_s25 + $0xa8] sm:$0xff] }
  0x20   : > { %v373_v29 = vadd.f32 %v341_v14, %v309_v16  ;;  %v311_v31 = vadd.f32 %v614_v2, %v272_v18  ;;  %433 = vst.msk [vmem:[%s644_s30 + $0x40] sm:$0xff] %vm424_vm0, %v400_v21  ;;  %v403_v34 = vmax.f32 %v371_v23, 0.0  ;;  %v273_v36 = vmul.f32 %v596_v0, %v234_v19  ;;  %v242_v5 = vld [vmem:[%s602_s22 + $0xc0] sm:$0xff]  ;;  %v243_v6 = vld [vmem:[%s602_s22 + $0xc8] sm:$0xff]  ;;  %v350_v11 = vld [vmem:[%s608_s25 + $0xb0] sm:$0xff] }
  0x21   : > { %434 = vst.msk [vmem:[%s644_s30 + $0x48] sm:$0xff] %vm424_vm0, %v401_v22  ;;  %v404_v35 = vmax.f32 %v372_v24, 0.0  ;;  %v274_v37 = vmul.f32 %v596_v0, %v235_v20  ;;  %435 = vst.msk [vmem:[%s644_s30 + $0x50] sm:$0xff] %vm424_vm0, %v402_v28  ;;  %v374_v40 = vadd.f32 %v342_v25, %v310_v30  ;;  %v275_v44 = vmul.f32 %v596_v0, %v236_v27  ;;  %v351_v12 = vld [vmem:[%s608_s25 + $0xb8] sm:$0xff]  ;;  %v244_v13 = vld [vmem:[%s602_s22 + $0xd0] sm:$0xff] }
  0x22   : > { %v405_v39 = vmax.f32 %v373_v29, 0.0  ;;  %v375_v41 = vadd.f32 %v343_v26, %v311_v31  ;;  %436 = vst.msk [vmem:[%s644_s30 + $0x58] sm:$0xff] %vm424_vm0, %v403_v34  ;;  %v312_v45 = vadd.f32 %v614_v2, %v273_v36  ;;  %v276_v48 = vmul.f32 %v596_v0, %v237_v32  ;;  %v245_v18 = vld [vmem:[%s602_s22 + $0xd8] sm:$0xff]  ;;  %v246_v19 = vld [vmem:[%s602_s22 + $0xe0] sm:$0xff]  ;;  %v247_v24 = vld [vmem:[%s602_s22 + $0xe8] sm:$0xff] }
  0x23   : > { %437 = vst.msk [vmem:[%s644_s30 + $0x60] sm:$0xff] %vm424_vm0, %v404_v35  ;;  %v313_v46 = vadd.f32 %v614_v2, %v274_v37  ;;  %v277_v49 = vmul.f32 %v596_v0, %v238_v33  ;;  %v406_v52 = vmax.f32 %v374_v40, 0.0  ;;  %v314_v54 = vadd.f32 %v614_v2, %v275_v44  ;;  %v352_v28 = vld [vmem:[%s608_s25 + $0xc0] sm:$0xff]  ;;  %v353_v29 = vld [vmem:[%s608_s25 + $0xc8] sm:$0xff]  ;;  %v354_v33 = vld [vmem:[%s608_s25 + $0xd0] sm:$0xff] }
  0x24   : > { %438 = vst.msk [vmem:[%s644_s30 + $0x68] sm:$0xff] %vm424_vm0, %v405_v39  ;;  %v407_v53 = vmax.f32 %v375_v41, 0.0  ;;  %v278_v57 = vmul.f32 %v596_v0, %v239_v38  ;;  %v376_v58 = vadd.f32 %v344_v42, %v312_v45  ;;  %v315_v60 = vadd.f32 %v614_v2, %v276_v48  ;;  %v248_v36 = vld [vmem:[%s602_s22 + $0xf0] sm:$0xff]  ;;  %v249_v37 = vld [vmem:[%s602_s22 + $0xf8] sm:$0xff]  ;;  %v356_v42 = vld [vmem:[%s608_s25 + $0xe0] sm:$0xff] }
  0x25   : > { %v377_v59 = vadd.f32 %v345_v43, %v313_v46  ;;  %v316_v61 = vadd.f32 %v614_v2, %v277_v49  ;;  %439 = vst.msk [vmem:[%s644_s30 + $0x70] sm:$0xff] %vm424_vm0, %v406_v52  ;;  %v378_v63 = vadd.f32 %v346_v47, %v314_v54  ;;  %v279_v3 = vmul.f32 %v596_v0, %v240_v50  ;;  %v355_v41 = vld [vmem:[%s608_s25 + $0xd8] sm:$0xff]  ;;  %v357_v48 = vld [vmem:[%s608_s25 + $0xe8] sm:$0xff] }
  0x26   : > { %440 = vst.msk [vmem:[%s644_s30 + $0x78] sm:$0xff] %vm424_vm0, %v407_v53  ;;  %v317_v1 = vadd.f32 %v614_v2, %v278_v57  ;;  %v280_v4 = vmul.f32 %v596_v0, %v241_v51  ;;  %v408_v7 = vmax.f32 %v376_v58, 0.0  ;;  %v379_v9 = vadd.f32 %v347_v55, %v315_v60  ;;  %v358_v57 = vld [vmem:[%s608_s25 + $0xf0] sm:$0xff]  ;;  %v359_v58 = vld [vmem:[%s608_s25 + $0xf8] sm:$0xff] }
  0x27   : > { %v409_v8 = vmax.f32 %v377_v59, 0.0  ;;  %v380_v10 = vadd.f32 %v348_v56, %v316_v61  ;;  %v410_v14 = vmax.f32 %v378_v63, 0.0  ;;  %v318_v16 = vadd.f32 %v614_v2, %v279_v3 }
  0x28   : > { %v381_v15 = vadd.f32 %v349_v62, %v317_v1  ;;  %v319_v17 = vadd.f32 %v614_v2, %v280_v4  ;;  %441 = vst.msk [vmem:[%s644_s30 + $0x80] sm:$0xff] %vm424_vm0, %v408_v7  ;;  %v411_v20 = vmax.f32 %v379_v9, 0.0  ;;  %v281_v22 = vmul.f32 %v596_v0, %v242_v5 }
  0x29   : > { %442 = vst.msk [vmem:[%s644_s30 + $0x88] sm:$0xff] %vm424_vm0, %v409_v8  ;;  %v412_v21 = vmax.f32 %v380_v10, 0.0  ;;  %v282_v23 = vmul.f32 %v596_v0, %v243_v6  ;;  %443 = vst.msk [vmem:[%s644_s30 + $0x90] sm:$0xff] %vm424_vm0, %v410_v14  ;;  %v382_v26 = vadd.f32 %v350_v11, %v318_v16  ;;  %v283_v30 = vmul.f32 %v596_v0, %v244_v13 }
  0x2a   : > { %v413_v25 = vmax.f32 %v381_v15, 0.0  ;;  %v383_v27 = vadd.f32 %v351_v12, %v319_v17  ;;  %444 = vst.msk [vmem:[%s644_s30 + $0x98] sm:$0xff] %vm424_vm0, %v411_v20  ;;  %v320_v31 = vadd.f32 %v614_v2, %v281_v22  ;;  %v284_v34 = vmul.f32 %v596_v0, %v245_v18 }
  0x2b   : > { %445 = vst.msk [vmem:[%s644_s30 + $0xa0] sm:$0xff] %vm424_vm0, %v412_v21  ;;  %v321_v32 = vadd.f32 %v614_v2, %v282_v23  ;;  %v285_v35 = vmul.f32 %v596_v0, %v246_v19  ;;  %v414_v38 = vmax.f32 %v382_v26, 0.0  ;;  %v322_v40 = vadd.f32 %v614_v2, %v283_v30 }
  0x2c   : > { %446 = vst.msk [vmem:[%s644_s30 + $0xa8] sm:$0xff] %vm424_vm0, %v413_v25  ;;  %v415_v39 = vmax.f32 %v383_v27, 0.0  ;;  %v286_v43 = vmul.f32 %v596_v0, %v247_v24  ;;  %v384_v44 = vadd.f32 %v352_v28, %v320_v31  ;;  %v323_v46 = vadd.f32 %v614_v2, %v284_v34 }
  0x2d   : > { %v385_v45 = vadd.f32 %v353_v29, %v321_v32  ;;  %v324_v47 = vadd.f32 %v614_v2, %v285_v35  ;;  %447 = vst.msk [vmem:[%s644_s30 + $0xb0] sm:$0xff] %vm424_vm0, %v414_v38  ;;  %v386_v49 = vadd.f32 %v354_v33, %v322_v40  ;;  %v287_v51 = vmul.f32 %v596_v0, %v248_v36 }
  0x2e   : > { %448 = vst.msk [vmem:[%s644_s30 + $0xb8] sm:$0xff] %vm424_vm0, %v415_v39  ;;  %v325_v50 = vadd.f32 %v614_v2, %v286_v43  ;;  %v288_v52 = vmul.f32 %v596_v0, %v249_v37  ;;  %v416_v53 = vmax.f32 %v384_v44, 0.0  ;;  %v387_v55 = vadd.f32 %v355_v41, %v323_v46 }
  0x2f   : > { %v417_v54 = vmax.f32 %v385_v45, 0.0  ;;  %v388_v56 = vadd.f32 %v356_v42, %v324_v47  ;;  %v418_v59 = vmax.f32 %v386_v49, 0.0  ;;  %v326_v61 = vadd.f32 %v614_v2, %v287_v51 }
  0x30   : > { %v389_v60 = vadd.f32 %v357_v48, %v325_v50  ;;  %v327_v62 = vadd.f32 %v614_v2, %v288_v52  ;;  %449 = vst.msk [vmem:[%s644_s30 + $0xc0] sm:$0xff] %vm424_vm0, %v416_v53  ;;  %v419_v0 = vmax.f32 %v387_v55, 0.0 }
  0x31   : > { %450 = vst.msk [vmem:[%s644_s30 + $0xc8] sm:$0xff] %vm424_vm0, %v417_v54  ;;  %v420_v63 = vmax.f32 %v388_v56, 0.0  ;;  %451 = vst.msk [vmem:[%s644_s30 + $0xd0] sm:$0xff] %vm424_vm0, %v418_v59  ;;  %v390_v3 = vadd.f32 %v358_v57, %v326_v61 }
  0x32   : > { %v421_v1 = vmax.f32 %v389_v60, 0.0  ;;  %v391_v4 = vadd.f32 %v359_v58, %v327_v62  ;;  %452 = vst.msk [vmem:[%s644_s30 + $0xd8] sm:$0xff] %vm424_vm0, %v419_v0 }
  0x33   : > { %453 = vst.msk [vmem:[%s644_s30 + $0xe0] sm:$0xff] %vm424_vm0, %v420_v63  ;;  %v422_v5 = vmax.f32 %v390_v3, 0.0 }
  0x34   : > { %454 = vst.msk [vmem:[%s644_s30 + $0xe8] sm:$0xff] %vm424_vm0, %v421_v1  ;;  %v423_v6 = vmax.f32 %v391_v4, 0.0 }
  0x35   : > { %455 = vst.msk [vmem:[%s644_s30 + $0xf0] sm:$0xff] %vm424_vm0, %v422_v5 }
  0x36   : > { %456 = vst.msk [vmem:[%s644_s30 + $0xf8] sm:$0xff] %vm424_vm0, %v423_v6 }
  0x37 PF: > { %s14_s15 = sadd.s32 1, %s556_s15  }
  0x38   : > { %p11_p4 = scmp.ge.s32.totalorder %s14_s15, 4  }
  0x3a   :  { %13 = sbr.rel (!%p11_p4) target bundleno = 1 (0x1), region = 69 }

// kernel: basic_block_nhwc.4
= control target key start
LH: loop header
LB: loop body
LE: loop exit
PB: predicated region body
PF: predicated region fallthrough
CT: control target
= control target key end

     0   :  { %s3190_s21 = smov 0   ;;  %s4630_s0 = inlined_call_operand.vmem [shape: f32[2,16,16,4], index: 0, kind: input, shape index: {}]   ;;  %s4631_s1 = inlined_call_operand.vmem [shape: bf16[36,4], index: 1, kind: input, shape index: {}]   ;;  %s4632_s2 = inlined_call_operand.vmem [shape: f32[1,1,1,4], index: 2, kind: input, shape index: {}]   ;;  %s4633_s3 = inlined_call_operand.vmem [shape: f32[1,1,1,4], index: 3, kind: input, shape index: {}]   ;;  %s4634_s4 = inlined_call_operand.vmem [shape: f32[2,16,16,4], index: 4, kind: output, shape index: {0}]   ;;  %s4635_s5 = inlined_call_operand.vmem [shape: f32[2,1,4], index: 5, kind: output, shape index: {1}]   ;;  %s4636_s6 = inlined_call_operand.vmem [shape: f32[2,1,4], index: 6, kind: output, shape index: {2}]  }
   0x1 LB: > { %s2377_s22 = sadd.s32 4294967295, %s3144_s21   ;;  %p2381_p0 = scmp.ge.s32.totalorder %s3144_s21, 1  ;;  %s3144_s21 = sphi %s3190_s21, %s17_s21  }
   0x2   : > { %p217_p1 = scmp.lt.s32.totalorder %s3144_s21, 3 }
   0x4   : > { %p218_p2 = pnand %p2381_p0, %p217_p1 }
   0x6   : > { %221 = sbr.rel (%p218_p2) target bundleno = 672 (0x2a0), region = 36 }
   0xd   : > { %vm445_vm0 = vcmask 1040384   ;;  %p253_p3 = scmp.lt.s32.totalorder %s2377_s22, 1  ;;  %v3146_v0 = vmov 0.0   ;;  %vm611_vm1 = vcmask 1046528   ;;  %vm788_vm2 = vcmask 1045504   ;;  %s3147_s7 = smov 4  }
   0xe   : > { %v3198_v1 = vrot.slane %v3146_v0, 7  ;;  %v3215_v8 = vld [vmem:[%s4632_s2] ss:$0 sm:$0xff]  ;;  %s3148_s8 = smov 8   ;;  %s3149_s9 = smov 12   ;;  %vm1902_vm3 = vcmask 1041408  }
   0xf   : > { %s4805_s22 = smov (!%p253_p3, %s2377_s22), 1  ;;  %v3228_v10 = vld [vmem:[%s4633_s3] ss:$0 sm:$0xff]  ;;  %s3150_s12 = smov 16   ;;  %vm1553_vm4 = vcmask 31744   ;;  %vm1586_vm5 = vcmask 64512  }
  0x10   : > { %4698 = vst [vmem:[#allocation2_spill] sm:$0xff] %v3198_v1  ;;  %v3204_v2 = vsel %vm445_vm0, 0.0, %v3198_v1  ;;  %v562_v3 = vsel %vm445_vm0, %v3198_v1, 0.0  ;;  %v613_v4 = vrot.slane %v3198_v1, 1  ;;  %v790_v5 = vrot.slane %v3198_v1, 2  ;;  %s2409_s23 = sshll.u32 %s4805_s22, 8  ;;  %s268_s11 = scalar_lea.vmem %s4636_s6, %s4805_s22 }
  0x11   : > { %4699 = vst [vmem:[#allocation3_spill] sm:$0xff] %v3204_v2  ;;  %v612_v6 = vrot.slane %v3204_v2, 1  ;;  %v615_v7 = vrot.slane %v562_v3, 1  ;;  %v789_v9 = vrot.slane %v3204_v2, 2  ;;  %s3223_s28 = scalar_lea.vmem %s4630_s0, %s2409_s23  ;;  %v792_v13 = vrot.slane %v562_v3, 2  ;;  %s3151_s15 = smov 20  }
  0x12   : > { %v272_v14 = vld [vmem:[%s3223_s28 + $0x10] sm:$0xff]  ;;  %v273_v15 = vld [vmem:[%s3223_s28 + $0x18] sm:$0xff]  ;;  %v270_v16 = vld [vmem:[%s3223_s28] sm:$0xff]  ;;  %s3152_s18 = smov 24   ;;  %s3153_s19 = smov 28   ;;  %vm1619_vm6 = vcmask 97280  }
  0x13   : > { %v614_v11 = vsel %vm611_vm1, %v612_v6, %v613_v4  ;;  %v616_v12 = vsel %vm611_vm1, %v613_v4, %v615_v7  ;;  %v3236_v17 = vsel %vm788_vm2, %v789_v9, %v790_v5  ;;  %v311_v19 = vmul.f32 %v3215_v8, %v272_v14  ;;  %v271_v21 = vld [vmem:[%s3223_s28 + $0x8] sm:$0xff]  ;;  %v274_v22 = vld [vmem:[%s3223_s28 + $0x20] sm:$0xff]  ;;  %v276_v28 = vld [vmem:[%s3223_s28 + $0x30] sm:$0xff]  ;;  %s3154_s20 = smov 32   ;;  %s4489_s30 = scalar_lea.vmem %s4634_s4, %s2409_s23 }
  0x14   : > { %v3238_v18 = vpack.i.bf16 %v616_v12, %v614_v11  ;;  %v312_v20 = vmul.f32 %v3215_v8, %v273_v15  ;;  %v275_v23 = vld [vmem:[%s3223_s28 + $0x28] sm:$0xff]  ;;  %v309_v24 = vmul.f32 %v3215_v8, %v270_v16  ;;  %v310_v25 = vmul.f32 %v3215_v8, %v271_v21  ;;  %v277_v29 = vld [vmem:[%s3223_s28 + $0x38] sm:$0xff]  ;;  %v278_v9 = vld [vmem:[%s3223_s28 + $0x40] sm:$0xff] }
  0x15   : > { %v313_v26 = vmul.f32 %v3215_v8, %v274_v22  ;;  %v314_v27 = vmul.f32 %v3215_v8, %v275_v23  ;;  %v350_v30 = vadd.f32 %v3228_v10, %v311_v19  ;;  %v315_v32 = vmul.f32 %v3215_v8, %v276_v28  ;;  %v279_v21 = vld [vmem:[%s3223_s28 + $0x48] sm:$0xff] }
  0x16   : > { %4700 = vst [vmem:[#allocation4_spill] sm:$0xff] %v3238_v18  ;;  %2494 = vrot.lane.b32.xlu0 %v3238_v18, %s3147_s7  ;;  %v351_v31 = vadd.f32 %v3228_v10, %v312_v20  ;;  %v316_v33 = vmul.f32 %v3215_v8, %v277_v29  ;;  %v348_v34 = vadd.f32 %v3228_v10, %v309_v24  ;;  %vm1652_vm7 = vcmask 130048  }
  0x17   : > { %v349_v35 = vadd.f32 %v3228_v10, %v310_v25  ;;  %v352_v36 = vadd.f32 %v3228_v10, %v313_v26  ;;  %v353_v37 = vadd.f32 %v3228_v10, %v314_v27  ;;  %v382_v38 = vmax.f32 %v350_v30, 0.0  ;;  %v280_v26 = vld [vmem:[%s3223_s28 + $0x50] sm:$0xff] }
  0x18   : > { %v383_v39 = vmax.f32 %v351_v31, 0.0  ;;  %v354_v40 = vadd.f32 %v3228_v10, %v315_v32  ;;  %v355_v41 = vadd.f32 %v3228_v10, %v316_v33  ;;  %v380_v42 = vmax.f32 %v348_v34, 0.0  ;;  %v281_v31 = vld [vmem:[%s3223_s28 + $0x58] sm:$0xff]  ;;  %v282_v32 = vld [vmem:[%s3223_s28 + $0x60] sm:$0xff]  ;;  %v283_v33 = vld [vmem:[%s3223_s28 + $0x68] sm:$0xff] }
  0x19   : > { %v381_v43 = vmax.f32 %v349_v35, 0.0  ;;  %v384_v44 = vmax.f32 %v352_v36, 0.0  ;;  %v385_v45 = vmax.f32 %v353_v37, 0.0  ;;  %v451_v46 = vrot.slane %v382_v38, 7 }
  0x1a   : > { %v452_v47 = vrot.slane %v383_v39, 7  ;;  %v386_v48 = vmax.f32 %v354_v40, 0.0  ;;  %v3264_v49 = vsel %vm788_vm2, %v790_v5, %v792_v13  ;;  %v448_v50 = vrot.slane %v380_v42, 7 }
  0x1b   : > { %v449_v51 = vrot.slane %v381_v43, 7  ;;  %v454_v52 = vrot.slane %v384_v44, 7  ;;  %v455_v53 = vrot.slane %v385_v45, 7  ;;  %v3270_v55 = vsel %vm445_vm0, 0.0, %v451_v46 }
  0x1c   : > { %v3267_v54 = vsel %vm445_vm0, %v451_v46, %v452_v47  ;;  %v3273_v56 = vsel %vm445_vm0, %v452_v47, 0.0  ;;  %v387_v57 = vmax.f32 %v355_v41, 0.0  ;;  %v622_v58 = vrot.slane %v3270_v55, 1  ;;  %v284_v46 = vld [vmem:[%s3223_s28 + $0x70] sm:$0xff] }
  0x1d   : > { %v623_v59 = vrot.slane %v3267_v54, 1  ;;  %v625_v60 = vrot.slane %v3273_v56, 1  ;;  %v457_v61 = vrot.slane %v386_v48, 7  ;;  %v3279_v62 = vsel %vm445_vm0, %v448_v50, %v449_v51 }
  0x1e   : > { %v3282_v63 = vsel %vm445_vm0, 0.0, %v448_v50  ;;  %v3285_v0 = vsel %vm445_vm0, %v449_v51, 0.0  ;;  %v3288_v3 = vsel %vm445_vm0, %v454_v52, %v455_v53  ;;  %v618_v7 = vrot.slane %v3279_v62, 1 }
  0x1f   : > { %v624_v4 = vsel %vm611_vm1, %v622_v58, %v623_v59  ;;  %v626_v5 = vsel %vm611_vm1, %v623_v59, %v625_v60  ;;  %v617_v6 = vrot.slane %v3282_v63, 1  ;;  %v620_v12 = vrot.slane %v3285_v0, 1 }
  0x20   : > { %v3295_v11 = vpack.i.bf16 %v626_v5, %v624_v4  ;;  %v3299_v13 = vsel %vm445_vm0, 0.0, %v454_v52  ;;  %v3302_v14 = vsel %vm445_vm0, %v455_v53, 0.0  ;;  %v628_v19 = vrot.slane %v3288_v3, 1  ;;  %v285_v52 = vld [vmem:[%s3223_s28 + $0x78] sm:$0xff] }
  0x21   : > { %v619_v15 = vsel %vm611_vm1, %v617_v6, %v618_v7  ;;  %v627_v16 = vrot.slane %v3299_v13, 1  ;;  %v630_v20 = vrot.slane %v3302_v14, 1  ;;  %v621_v22 = vsel %vm611_vm1, %v618_v7, %v620_v12 }
  0x22   : > { %2504 = vrot.lane.b32.xlu1 %v3295_v11, %s3147_s7  ;;  %v458_v23 = vrot.slane %v387_v57, 7  ;;  %v3313_v24 = vsel %vm445_vm0, 0.0, %v457_v61  ;;  %v317_v25 = vmul.f32 %v3215_v8, %v278_v9  ;;  %v3317_v27 = vpack.i.bf16 %v621_v22, %v619_v15 }
  0x23   : > { %v629_v28 = vsel %vm611_vm1, %v627_v16, %v628_v19  ;;  %v631_v29 = vsel %vm611_vm1, %v628_v19, %v630_v20  ;;  %v632_v30 = vrot.slane %v3313_v24, 1  ;;  %v318_v37 = vmul.f32 %v3215_v8, %v279_v21 }
  0x24   : > { %v3325_v34 = vpack.i.bf16 %v631_v29, %v629_v28  ;;  %v3328_v35 = vsel %vm445_vm0, %v457_v61, %v458_v23  ;;  %v3331_v36 = vsel %vm445_vm0, %v458_v23, 0.0  ;;  %2499 = vrot.lane.b32.xlu0 %v3317_v27, %s3147_s7  ;;  %v356_v40 = vadd.f32 %v3228_v10, %v317_v25 }
  0x25   : > { %v633_v38 = vrot.slane %v3328_v35, 1  ;;  %v635_v39 = vrot.slane %v3331_v36, 1  ;;  %v319_v41 = vmul.f32 %v3215_v8, %v280_v26  ;;  %v357_v42 = vadd.f32 %v3228_v10, %v318_v37 }
  0x26   : > { %4701 = vst [vmem:[#allocation5_spill] sm:$0xff] %v3325_v34  ;;  %2509 = vrot.lane.b32.xlu1 %v3325_v34, %s3147_s7  ;;  %v320_v43 = vmul.f32 %v3215_v8, %v281_v31  ;;  %v321_v44 = vmul.f32 %v3215_v8, %v282_v32  ;;  %v322_v45 = vmul.f32 %v3215_v8, %v283_v33  ;;  %v388_v50 = vmax.f32 %v356_v40, 0.0 }
  0x27   : > { %v634_v47 = vsel %vm611_vm1, %v632_v30, %v633_v38  ;;  %v636_v48 = vsel %vm611_vm1, %v633_v38, %v635_v39  ;;  %v358_v51 = vadd.f32 %v3228_v10, %v319_v41  ;;  %v389_v57 = vmax.f32 %v357_v42, 0.0 }
  0x28   : > { %v3351_v53 = vpack.i.bf16 %v636_v48, %v634_v47  ;;  %v359_v58 = vadd.f32 %v3228_v10, %v320_v43  ;;  %v360_v59 = vadd.f32 %v3228_v10, %v321_v44  ;;  %v460_v60 = vrot.slane %v388_v50, 7  ;;  %v287_v47 = vld [vmem:[%s3223_s28 + $0x88] sm:$0xff]  ;;  %v288_v48 = vld [vmem:[%s3223_s28 + $0x90] sm:$0xff] }
  0x29   : > { %v390_v61 = vmax.f32 %v358_v51, 0.0  ;;  %v361_v4 = vadd.f32 %v3228_v10, %v322_v45  ;;  %v323_v5 = vmul.f32 %v3215_v8, %v284_v46  ;;  %v461_v6 = vrot.slane %v389_v57, 7  ;;  %v286_v46 = vld [vmem:[%s3223_s28 + $0x80] sm:$0xff] }
  0x2a   : > { %4702 = vst [vmem:[#allocation6_spill] sm:$0xff] %v3351_v53  ;;  %2514 = vrot.lane.b32.xlu0 %v3351_v53, %s3147_s7  ;;  %v391_v7 = vmax.f32 %v359_v58, 0.0  ;;  %v392_v9 = vmax.f32 %v360_v59, 0.0  ;;  %v324_v12 = vmul.f32 %v3215_v8, %v285_v52  ;;  %v3361_v15 = vsel %vm445_vm0, 0.0, %v460_v60  ;;  %v289_v58 = vld [vmem:[%s3223_s28 + $0x98] sm:$0xff] }
  0x2b   : > { %v463_v16 = vrot.slane %v390_v61, 7  ;;  %v393_v19 = vmax.f32 %v361_v4, 0.0  ;;  %v362_v20 = vadd.f32 %v3228_v10, %v323_v5  ;;  %v3365_v21 = vsel %vm445_vm0, %v460_v60, %v461_v6 }
  0x2c   : > { %v3368_v22 = vsel %vm445_vm0, %v461_v6, 0.0  ;;  %v637_v23 = vrot.slane %v3361_v15, 1  ;;  %v464_v25 = vrot.slane %v391_v7, 7  ;;  %v638_v26 = vrot.slane %v3365_v21, 1 }
  0x2d   : > { %v640_v28 = vrot.slane %v3368_v22, 1  ;;  %v3374_v29 = vsel %vm445_vm0, 0.0, %v463_v16  ;;  %v466_v30 = vrot.slane %v392_v9, 7  ;;  %v467_v37 = vrot.slane %v393_v19, 7 }
  0x2e   : > { %4703 = vst [vmem:[#allocation7_spill] sm:$0xff] %v3374_v29  ;;  %v3377_v31 = vsel %vm445_vm0, %v463_v16, %v464_v25  ;;  %v3380_v32 = vsel %vm445_vm0, %v464_v25, 0.0  ;;  %v642_v33 = vrot.slane %v3374_v29, 1  ;;  %v639_v38 = vsel %vm611_vm1, %v637_v23, %v638_v26  ;;  %v290_v16 = vld [vmem:[%s3223_s28 + $0xa0] sm:$0xff] }
  0x2f   : > { %4704 = vst [vmem:[#allocation8_spill] sm:$0xff] %v3377_v31  ;;  %v641_v39 = vsel %vm611_vm1, %v638_v26, %v640_v28  ;;  %v643_v40 = vrot.slane %v3377_v31, 1  ;;  %v645_v41 = vrot.slane %v3380_v32, 1  ;;  %v3390_v43 = vsel %vm445_vm0, %v466_v30, %v467_v37 }
  0x30   : > { %v3387_v42 = vpack.i.bf16 %v641_v39, %v639_v38  ;;  %4706 = vst [vmem:[#allocation10_spill] sm:$0xff] %v3390_v43  ;;  %v3393_v44 = vsel %vm445_vm0, 0.0, %v466_v30  ;;  %v3396_v45 = vsel %vm445_vm0, %v467_v37, 0.0  ;;  %v648_v57 = vrot.slane %v3390_v43, 1 }
  0x31   : > { %4707 = vst [vmem:[#allocation11_spill] sm:$0xff] %v3393_v44  ;;  %v644_v50 = vsel %vm611_vm1, %v642_v33, %v643_v40  ;;  %v646_v51 = vsel %vm611_vm1, %v643_v40, %v645_v41  ;;  %v647_v52 = vrot.slane %v3393_v44, 1  ;;  %v650_v60 = vrot.slane %v3396_v45, 1  ;;  %v291_v33 = vld [vmem:[%s3223_s28 + $0xa8] sm:$0xff] }
  0x32   : > { %4705 = vst [vmem:[#allocation9_spill] sm:$0xff] %v3387_v42  ;;  %2519 = vrot.lane.b32.xlu1 %v3387_v42, %s3147_s7  ;;  %v3408_v59 = vpack.i.bf16 %v646_v51, %v644_v50  ;;  %v363_v61 = vadd.f32 %v3228_v10, %v324_v12  ;;  %v394_v4 = vmax.f32 %v362_v20, 0.0  ;;  %v325_v6 = vmul.f32 %v3215_v8, %v286_v46 }
  0x33   : > { %v649_v5 = vsel %vm611_vm1, %v647_v52, %v648_v57  ;;  %v326_v7 = vmul.f32 %v3215_v8, %v287_v47  ;;  %v327_v9 = vmul.f32 %v3215_v8, %v288_v48  ;;  %v651_v19 = vsel %vm611_vm1, %v648_v57, %v650_v60 }
  0x34   : > { %4708 = vst [vmem:[#allocation12_spill] sm:$0xff] %v3408_v59  ;;  %2524 = vrot.lane.b32.xlu0 %v3408_v59, %s3147_s7  ;;  %v395_v23 = vmax.f32 %v363_v61, 0.0  ;;  %v469_v25 = vrot.slane %v394_v4, 7  ;;  %v328_v12 = vmul.f32 %v3215_v8, %v289_v58  ;;  %v3421_v26 = vpack.i.bf16 %v651_v19, %v649_v5 }
  0x35   : > { %v364_v20 = vadd.f32 %v3228_v10, %v325_v6  ;;  %v365_v28 = vadd.f32 %v3228_v10, %v326_v7  ;;  %v366_v30 = vadd.f32 %v3228_v10, %v327_v9  ;;  %v329_v40 = vmul.f32 %v3215_v8, %v290_v16 }
  0x36   : > { %4709 = vst [vmem:[#allocation13_spill] sm:$0xff] %v3421_v26  ;;  %v470_v37 = vrot.slane %v395_v23, 7  ;;  %v3428_v38 = vsel %vm445_vm0, 0.0, %v469_v25  ;;  %v367_v39 = vadd.f32 %v3228_v10, %v328_v12  ;;  %2529 = vrot.lane.b32.xlu1 %v3421_v26, %s3147_s7  ;;  %v330_v57 = vmul.f32 %v3215_v8, %v291_v33  ;;  %v292_v33 = vld [vmem:[%s3223_s28 + $0xb0] sm:$0xff]  ;;  %v298_v26 = vld [vmem:[%s3223_s28 + $0xe0] sm:$0xff] }
  0x37   : > { %4710 = vst [vmem:[#allocation14_spill] sm:$0xff] %v3428_v38  ;;  %v652_v41 = vrot.slane %v3428_v38, 1  ;;  %v396_v46 = vmax.f32 %v364_v20, 0.0  ;;  %v397_v47 = vmax.f32 %v365_v28, 0.0  ;;  %v398_v48 = vmax.f32 %v366_v30, 0.0 }
  0x38   : > { %v3436_v50 = vsel %vm445_vm0, %v469_v25, %v470_v37  ;;  %v3439_v51 = vsel %vm445_vm0, %v470_v37, 0.0  ;;  %v399_v52 = vmax.f32 %v367_v39, 0.0  ;;  %v368_v7 = vadd.f32 %v3228_v10, %v329_v40 }
  0x39   : > { %4711 = vst [vmem:[#allocation15_spill] sm:$0xff] %v3436_v50  ;;  %v653_v58 = vrot.slane %v3436_v50, 1  ;;  %v655_v60 = vrot.slane %v3439_v51, 1  ;;  %v472_v61 = vrot.slane %v396_v46, 7  ;;  %v473_v4 = vrot.slane %v397_v47, 7  ;;  %v293_v46 = vld [vmem:[%s3223_s28 + $0xb8] sm:$0xff] }
  0x3a   : > { %v475_v5 = vrot.slane %v398_v48, 7  ;;  %v476_v6 = vrot.slane %v399_v52, 7  ;;  %v369_v9 = vadd.f32 %v3228_v10, %v330_v57  ;;  %v332_v2 = vmul.f32 %v3215_v8, %v293_v46 }
  0x3b   : > { %v654_v16 = vsel %vm611_vm1, %v652_v41, %v653_v58  ;;  %v656_v19 = vsel %vm611_vm1, %v653_v58, %v655_v60  ;;  %v3449_v23 = vsel %vm445_vm0, %v472_v61, %v473_v4  ;;  %v3452_v25 = vsel %vm445_vm0, 0.0, %v472_v61 }
  0x3c   : > { %4712 = vst [vmem:[#allocation16_spill] sm:$0xff] %v3449_v23  ;;  %4713 = vst [vmem:[#allocation17_spill] sm:$0xff] %v3452_v25  ;;  %v3454_v12 = vpack.i.bf16 %v656_v19, %v654_v16  ;;  %v3457_v20 = vsel %vm445_vm0, %v473_v4, 0.0  ;;  %v657_v28 = vrot.slane %v3452_v25, 1  ;;  %v658_v30 = vrot.slane %v3449_v23, 1  ;;  %v296_v16 = vld [vmem:[%s3223_s28 + $0xd0] sm:$0xff] }
  0x3d   : > { %v660_v37 = vrot.slane %v3457_v20, 1  ;;  %v3464_v39 = vsel %vm445_vm0, %v475_v5, %v476_v6  ;;  %v3467_v40 = vsel %vm445_vm0, 0.0, %v475_v5  ;;  %v3470_v41 = vsel %vm445_vm0, %v476_v6, 0.0  ;;  %v294_v5 = vld [vmem:[%s3223_s28 + $0xc0] sm:$0xff]  ;;  %v295_v6 = vld [vmem:[%s3223_s28 + $0xc8] sm:$0xff] }
  0x3e   : > { %4714 = vst [vmem:[#allocation18_spill] sm:$0xff] %v3454_v12  ;;  %4715 = vst [vmem:[#allocation19_spill] sm:$0xff] %v3464_v39  ;;  %2534 = vrot.lane.b32.xlu0 %v3454_v12, %s3147_s7  ;;  %v659_v47 = vsel %vm611_vm1, %v657_v28, %v658_v30  ;;  %v662_v48 = vrot.slane %v3467_v40, 1  ;;  %v663_v52 = vrot.slane %v3464_v39, 1  ;;  %v665_v57 = vrot.slane %v3470_v41, 1 }
  0x3f   : > { %4716 = vst [vmem:[#allocation20_spill] sm:$0xff] %v3467_v40  ;;  %v661_v58 = vsel %vm611_vm1, %v658_v30, %v660_v37  ;;  %v400_v60 = vmax.f32 %v368_v7, 0.0  ;;  %v401_v61 = vmax.f32 %v369_v9, 0.0  ;;  %v331_v4 = vmul.f32 %v3215_v8, %v292_v33 }
  0x40   : > { %v3484_v19 = vpack.i.bf16 %v661_v58, %v659_v47  ;;  %v664_v28 = vsel %vm611_vm1, %v662_v48, %v663_v52  ;;  %v666_v18 = vsel %vm611_vm1, %v663_v52, %v665_v57  ;;  %v371_v9 = vadd.f32 %v3228_v10, %v332_v2  ;;  %v297_v47 = vld [vmem:[%s3223_s28 + $0xd8] sm:$0xff] }
  0x41   : > { %v3489_v1 = vpack.i.bf16 %v666_v18, %v664_v28  ;;  %v478_v12 = vrot.slane %v400_v60, 7  ;;  %v479_v30 = vrot.slane %v401_v61, 7  ;;  %v370_v7 = vadd.f32 %v3228_v10, %v331_v4 }
  0x42   : > { %4717 = vst [vmem:[#allocation21_spill] sm:$0xff] %v3484_v19  ;;  %2539 = vrot.lane.b32.xlu1 %v3484_v19, %s3147_s7  ;;  %v333_v33 = vmul.f32 %v3215_v8, %v294_v5  ;;  %v334_v37 = vmul.f32 %v3215_v8, %v295_v6  ;;  %v335_v48 = vmul.f32 %v3215_v8, %v296_v16  ;;  %v403_v61 = vmax.f32 %v371_v9, 0.0 }
  0x43   : > { %4718 = vst [vmem:[#allocation22_spill] sm:$0xff] %v3489_v1  ;;  %2544 = vrot.lane.b32.xlu0 %v3489_v1, %s3147_s7  ;;  %v3502_v18 = vsel %vm445_vm0, %v478_v12, %v479_v30  ;;  %v3505_v46 = vsel %vm445_vm0, 0.0, %v478_v12  ;;  %v3508_v52 = vsel %vm445_vm0, %v479_v30, 0.0  ;;  %v402_v2 = vmax.f32 %v370_v7, 0.0 }
  0x44   : > { %4719 = vst [vmem:[#allocation23_spill] sm:$0xff] %v3502_v18  ;;  %4720 = vst [vmem:[#allocation24_spill] sm:$0xff] %v3505_v46  ;;  %v667_v57 = vrot.slane %v3505_v46, 1  ;;  %v668_v58 = vrot.slane %v3502_v18, 1  ;;  %v670_v60 = vrot.slane %v3508_v52, 1  ;;  %v372_v5 = vadd.f32 %v3228_v10, %v333_v33  ;;  %v299_v33 = vld [vmem:[%s3223_s28 + $0xe8] sm:$0xff] }
  0x45   : > { %v481_v4 = vrot.slane %v402_v2, 7  ;;  %v373_v6 = vadd.f32 %v3228_v10, %v334_v37  ;;  %v336_v12 = vmul.f32 %v3215_v8, %v297_v47  ;;  %v482_v30 = vrot.slane %v403_v61, 7 }
  0x46   : > { %v669_v16 = vsel %vm611_vm1, %v667_v57, %v668_v58  ;;  %v671_v28 = vsel %vm611_vm1, %v668_v58, %v670_v60  ;;  %v374_v7 = vadd.f32 %v3228_v10, %v335_v48  ;;  %v404_v9 = vmax.f32 %v372_v5, 0.0 }
  0x47   : > { %v3519_v1 = vpack.i.bf16 %v671_v28, %v669_v16  ;;  %v3522_v19 = vsel %vm445_vm0, 0.0, %v481_v4  ;;  %v405_v2 = vmax.f32 %v373_v6, 0.0  ;;  %v3527_v37 = vsel %vm445_vm0, %v481_v4, %v482_v30 }
  0x48   : > { %4722 = vst [vmem:[#allocation26_spill] sm:$0xff] %v3522_v19  ;;  %4723 = vst [vmem:[#allocation27_spill] sm:$0xff] %v3527_v37  ;;  %v3530_v47 = vsel %vm445_vm0, %v482_v30, 0.0  ;;  %v672_v57 = vrot.slane %v3522_v19, 1  ;;  %v375_v58 = vadd.f32 %v3228_v10, %v336_v12  ;;  %v673_v48 = vrot.slane %v3527_v37, 1 }
  0x49   : > { %4721 = vst [vmem:[#allocation25_spill] sm:$0xff] %v3519_v1  ;;  %2549 = vrot.lane.b32.xlu1 %v3519_v1, %s3147_s7  ;;  %v675_v60 = vrot.slane %v3530_v47, 1  ;;  %v484_v61 = vrot.slane %v404_v9, 7  ;;  %v485_v5 = vrot.slane %v405_v2, 7  ;;  %v406_v6 = vmax.f32 %v374_v7, 0.0 }
  0x4a   : > { %v407_v16 = vmax.f32 %v375_v58, 0.0  ;;  %v337_v4 = vmul.f32 %v3215_v8, %v298_v26  ;;  %v338_v28 = vmul.f32 %v3215_v8, %v299_v33  ;;  %v674_v30 = vsel %vm611_vm1, %v672_v57, %v673_v48 }
  0x4b   : > { %v676_v59 = vsel %vm611_vm1, %v673_v48, %v675_v60  ;;  %v3543_v12 = vsel %vm445_vm0, %v484_v61, %v485_v5  ;;  %v3546_v1 = vsel %vm445_vm0, 0.0, %v484_v61  ;;  %v3551_v9 = vsel %vm445_vm0, %v485_v5, 0.0 }
  0x4c   : > { %4724 = vst [vmem:[#allocation28_spill] sm:$0xff] %v3543_v12  ;;  %4725 = vst [vmem:[#allocation29_spill] sm:$0xff] %v3546_v1  ;;  %v3548_v42 = vpack.i.bf16 %v676_v59, %v674_v30  ;;  %v677_v7 = vrot.slane %v3546_v1, 1  ;;  %v678_v26 = vrot.slane %v3543_v12, 1  ;;  %v680_v8 = vrot.slane %v3551_v9, 1 }
  0x4d   : > { %v487_v2 = vrot.slane %v406_v6, 7  ;;  %v488_v33 = vrot.slane %v407_v16, 7  ;;  %v376_v57 = vadd.f32 %v3228_v10, %v337_v4  ;;  %v377_v59 = vadd.f32 %v3228_v10, %v338_v28 }
  0x4e   : > { %4726 = vst [vmem:[#allocation30_spill] sm:$0xff] %v3548_v42  ;;  %2554 = vrot.lane.b32.xlu0 %v3548_v42, %s3147_s7  ;;  %v679_v58 = vsel %vm611_vm1, %v677_v7, %v678_v26  ;;  %v3563_v48 = vpack.i.bf16 %v3264_v49, %v3236_v17  ;;  %v681_v60 = vsel %vm611_vm1, %v678_v26, %v680_v8  ;;  %v794_v30 = vrot.slane %v3282_v63, 2 }
  0x4f   : > { %v3567_v61 = vsel %vm445_vm0, %v487_v2, %v488_v33  ;;  %v3570_v5 = vsel %vm445_vm0, 0.0, %v487_v2  ;;  %v3573_v6 = vsel %vm445_vm0, %v488_v33, 0.0  ;;  %v3575_v16 = vpack.i.bf16 %v681_v60, %v679_v58 }
  0x50   : > { %4727 = vst [vmem:[#allocation31_spill] sm:$0xff] %v3563_v48  ;;  %v682_v4 = vrot.slane %v3570_v5, 1  ;;  %v683_v10 = vrot.slane %v3567_v61, 1  ;;  %v685_v17 = vrot.slane %v3573_v6, 1  ;;  %v408_v49 = vmax.f32 %v376_v57, 0.0 }
  0x51   : > { %4728 = vst [vmem:[#allocation32_spill] sm:$0xff] %v3575_v16  ;;  %v409_v28 = vmax.f32 %v377_v59, 0.0  ;;  %v795_v7 = vrot.slane %v3279_v62, 2  ;;  %2559 = vrot.lane.b32.xlu1 %v3575_v16, %s3147_s7  ;;  %v797_v2 = vrot.slane %v3285_v0, 2  ;;  %v799_v33 = vrot.slane %v3270_v55, 2 }
  0x52   : > { %v684_v26 = vsel %vm611_vm1, %v682_v4, %v683_v10  ;;  %v686_v8 = vsel %vm611_vm1, %v683_v10, %v685_v17  ;;  %v802_v58 = vrot.slane %v3273_v56, 2  ;;  %v490_v57 = vrot.slane %v408_v49, 7 }
  0x53   : > { %v3589_v60 = vpack.i.bf16 %v686_v8, %v684_v26  ;;  %v491_v59 = vrot.slane %v409_v28, 7  ;;  %v796_v42 = vsel %vm788_vm2, %v794_v30, %v795_v7  ;;  %v800_v53 = vrot.slane %v3267_v54, 2 }
  0x54   : > { %v3599_v0 = vsel %vm445_vm0, 0.0, %v490_v57  ;;  %v798_v56 = vsel %vm788_vm2, %v795_v7, %v797_v2  ;;  %v804_v8 = vrot.slane %v3299_v13, 2  ;;  %v807_v2 = vrot.slane %v3302_v14, 2 }
  0x55   : > { %4729 = vst [vmem:[#allocation33_spill] sm:$0xff] %v3589_v60  ;;  %2564 = vrot.lane.b32.xlu0 %v3589_v60, %s3147_s7  ;;  %v3596_v4 = vsel %vm445_vm0, %v490_v57, %v491_v59  ;;  %v3602_v10 = vsel %vm445_vm0, %v491_v59, 0.0  ;;  %v687_v17 = vrot.slane %v3599_v0, 1  ;;  %v801_v30 = vsel %vm788_vm2, %v799_v33, %v800_v53 }
  0x56   : > { %v688_v49 = vrot.slane %v3596_v4, 1  ;;  %v690_v28 = vrot.slane %v3602_v10, 1  ;;  %v803_v26 = vsel %vm788_vm2, %v800_v53, %v802_v58  ;;  %v805_v57 = vrot.slane %v3288_v3, 2 }
  0x57   : > { %v809_v60 = vrot.slane %v3313_v24, 2  ;;  %v810_v16 = vrot.slane %v3328_v35, 2  ;;  %v3621_v53 = vpack.i.bf16 %v803_v26, %v801_v30  ;;  %v812_v33 = vrot.slane %v3331_v36, 2 }
  0x58   : > { %v689_v59 = vsel %vm611_vm1, %v687_v17, %v688_v49  ;;  %v691_v7 = vsel %vm611_vm1, %v688_v49, %v690_v28  ;;  %v3624_v58 = vpack.i.bf16 %v798_v56, %v796_v42  ;;  %v814_v49 = vrot.slane %v3361_v15, 2 }
  0x59   : > { %v3617_v34 = vpack.i.bf16 %v691_v7, %v689_v59  ;;  %2574 = vrot.lane.b32.xlu0 %v3563_v48, %s3148_s8  ;;  %v811_v17 = vsel %vm788_vm2, %v809_v60, %v810_v16  ;;  %v815_v14 = vrot.slane %v3365_v21, 2  ;;  %v813_v28 = vsel %vm788_vm2, %v810_v16, %v812_v33 }
  0x5a   : > { %v819_v59 = vrot.slane %v3374_v29, 2  ;;  %v820_v30 = vrot.slane %v3377_v31, 2  ;;  %v822_v26 = vrot.slane %v3380_v32, 2  ;;  %v806_v36 = vsel %vm788_vm2, %v804_v8, %v805_v57 }
  0x5b   : > { %2569 = vrot.lane.b32.xlu1 %v3617_v34, %s3147_s7  ;;  %v808_v42 = vsel %vm788_vm2, %v805_v57, %v807_v2  ;;  %v817_v60 = vrot.slane %v3368_v22, 2  ;;  %v3640_v56 = vpack.i.bf16 %v813_v28, %v811_v17  ;;  %v829_v33 = vrot.slane %v3428_v38, 2 }
  0x5c   : > { %v821_v7 = vsel %vm788_vm2, %v819_v59, %v820_v30  ;;  %v823_v16 = vsel %vm788_vm2, %v820_v30, %v822_v26  ;;  %v830_v48 = vrot.slane %v3436_v50, 2  ;;  %v3648_v32 = vpack.i.bf16 %v808_v42, %v806_v36 }
  0x5d   : > { %2584 = vrot.lane.b32.xlu0 %v3621_v53, %s3148_s8  ;;  %v816_v22 = vsel %vm788_vm2, %v814_v49, %v815_v14  ;;  %v832_v8 = vrot.slane %v3439_v51, 2  ;;  %v818_v57 = vsel %vm788_vm2, %v815_v14, %v817_v60  ;;  %v824_v2 = vrot.slane %v3393_v44, 2 }
  0x5e   : > { %v825_v17 = vrot.slane %v3390_v43, 2  ;;  %v827_v28 = vrot.slane %v3396_v45, 2  ;;  %v3658_v59 = vpack.i.bf16 %v823_v16, %v821_v7  ;;  %v831_v30 = vsel %vm788_vm2, %v829_v33, %v830_v48 }
  0x5f   : > { %2579 = vrot.lane.b32.xlu1 %v3624_v58, %s3148_s8  ;;  %v833_v26 = vsel %vm788_vm2, %v830_v48, %v832_v8  ;;  %v839_v49 = vrot.slane %v3467_v40, 2  ;;  %v840_v51 = vrot.slane %v3464_v39, 2  ;;  %v842_v14 = vrot.slane %v3470_v41, 2 }
  0x60   : > { %v3667_v36 = vpack.i.bf16 %v818_v57, %v816_v22  ;;  %v834_v45 = vrot.slane %v3452_v25, 2  ;;  %v835_v42 = vrot.slane %v3449_v23, 2  ;;  %v826_v60 = vsel %vm788_vm2, %v824_v2, %v825_v17 }
  0x61   : > { %2594 = vrot.lane.b32.xlu0 %v3640_v56, %s3148_s8  ;;  %v828_v7 = vsel %vm788_vm2, %v825_v17, %v827_v28  ;;  %v837_v48 = vrot.slane %v3457_v20, 2  ;;  %v3676_v16 = vpack.i.bf16 %v833_v26, %v831_v30  ;;  %v849_v41 = vrot.slane %v3522_v19, 2 }
  0x62   : > { %v850_v33 = vrot.slane %v3527_v37, 2  ;;  %v841_v22 = vsel %vm788_vm2, %v839_v49, %v840_v51  ;;  %v843_v8 = vsel %vm788_vm2, %v840_v51, %v842_v14  ;;  %v852_v57 = vrot.slane %v3530_v47, 2 }
  0x63   : > { %2589 = vrot.lane.b32.xlu1 %v3648_v32, %s3148_s8  ;;  %v3685_v2 = vpack.i.bf16 %v828_v7, %v826_v60  ;;  %v836_v20 = vsel %vm788_vm2, %v834_v45, %v835_v42  ;;  %v838_v17 = vsel %vm788_vm2, %v835_v42, %v837_v48  ;;  %v844_v28 = vrot.slane %v3505_v46, 2 }
  0x64   : > { %v845_v30 = vrot.slane %v3502_v18, 2  ;;  %v847_v26 = vrot.slane %v3508_v52, 2  ;;  %v3694_v49 = vpack.i.bf16 %v843_v8, %v841_v22  ;;  %v851_v47 = vsel %vm788_vm2, %v849_v41, %v850_v33 }
  0x65   : > { %2604 = vrot.lane.b32.xlu0 %v3658_v59, %s3148_s8  ;;  %v853_v51 = vsel %vm788_vm2, %v850_v33, %v852_v57  ;;  %v859_v14 = vrot.slane %v3570_v5, 2  ;;  %v860_v45 = vrot.slane %v3567_v61, 2  ;;  %v862_v42 = vrot.slane %v3573_v6, 2 }
  0x66   : > { %v3703_v60 = vpack.i.bf16 %v838_v17, %v836_v20  ;;  %v854_v52 = vrot.slane %v3546_v1, 2  ;;  %v855_v7 = vrot.slane %v3543_v12, 2  ;;  %v846_v48 = vsel %vm788_vm2, %v844_v28, %v845_v30 }
  0x67   : > { %2599 = vrot.lane.b32.xlu1 %v3667_v36, %s3148_s8  ;;  %v848_v41 = vsel %vm788_vm2, %v845_v30, %v847_v26  ;;  %v857_v33 = vrot.slane %v3551_v9, 2  ;;  %v3712_v22 = vpack.i.bf16 %v853_v51, %v851_v47  ;;  %v861_v6 = vsel %vm788_vm2, %v859_v14, %v860_v45 }
  0x68   : > { %v863_v8 = vsel %vm788_vm2, %v860_v45, %v862_v42  ;;  %v3718_v57 = vpack.i.bf16 %v848_v41, %v846_v48  ;;  %v856_v20 = vsel %vm788_vm2, %v854_v52, %v855_v7  ;;  %v864_v17 = vrot.slane %v3599_v0, 2 }
  0x69   : > { %2614 = vrot.lane.b32.xlu0 %v3676_v16, %s3148_s8  ;;  %v865_v9 = vrot.slane %v3596_v4, 2  ;;  %v858_v28 = vsel %vm788_vm2, %v855_v7, %v857_v33  ;;  %v867_v30 = vrot.slane %v3602_v10, 2  ;;  %v3727_v26 = vpack.i.bf16 %v863_v8, %v861_v6  ;;  %v3133_v6 = vld [vmem:[%s4631_s1] sm:$0xff]   ;;  %v3134_v8 = vld [vmem:[%s4631_s1 + $0x8] sm:$0xff]  }
  0x6a   : > { %v3731_v47 = vpack.i.bf16 %v858_v28, %v856_v20  ;;  %v2653_v10 = vpack.i.bf16 %v3279_v62, %v3282_v63  ;;  %v2663_v42 = vpack.i.bf16 %v3288_v3, %v3299_v13  ;;  %v2658_v52 = vpack.i.bf16 %v3267_v54, %v3270_v55  ;;  %2430 = vmatprep.subr.bf16.mxu0 %v3133_v6  ;;  %v3135_v20 = vld [vmem:[%s4631_s1 + $0x10] ss:$0 sps:$4 sm:$0x33]  }
  0x6b   : > { %2609 = vrot.lane.b32.xlu1 %v3685_v2, %s3148_s8  ;;  %v866_v51 = vsel %vm788_vm2, %v864_v17, %v865_v9  ;;  %v868_v14 = vsel %vm788_vm2, %v865_v9, %v867_v30  ;;  %v2673_v7 = vpack.i.bf16 %v3365_v21, %v3361_v15  ;;  %v2668_v48 = vpack.i.bf16 %v3328_v35, %v3313_v24 }
  0x6c   : > { %v3741_v45 = vpack.i.bf16 %v868_v14, %v866_v51  ;;  %v2683_v41 = vpack.i.bf16 %v3390_v43, %v3393_v44  ;;  %v2678_v33 = vpack.i.bf16 %v3377_v31, %v3374_v29  ;;  %2468 = vmatprep.subr.bf16.mxu1 %v3133_v6  ;;  %2431 = vmatpush3.bf16.msra.mxu0 %v3133_v6  ;;  %v1904_v17 = vsel %vm1902_vm3, %v3135_v20, 0 }
  0x6d   : > { %2624 = vrot.lane.b32.xlu0 %v3694_v49, %s3148_s8  ;;  %2471 = vmatpush3.bf16.msra.mxu1 %v3133_v6  ;;  %vm1685_vm8 = vcmask 162816   ;;  %vm1718_vm9 = vcmask 195584   ;;  %vm1751_vm10 = vcmask 228352   ;;  %vm1784_vm11 = vcmask 261120  }
  0x6e   : > { %2432 = vmatprep.subr.bf16.mxu0 %v3134_v8  ;;  %2469 = vmatprep.subr.bf16.mxu1 %v3134_v8  ;;  %vm1853_vm12 = vcmask 293888   ;;  %vm2168_vm13 = vcmask 24576  }
  0x6f   : > { %2619 = vrot.lane.b32.xlu1 %v3703_v60, %s3148_s8 }
  0x70   : > { %2433 = vmatpush3.bf16.msra.mxu0 %v3134_v8 }
  0x71   : > { %2634 = vrot.lane.b32.xlu0 %v3712_v22, %s3148_s8  ;;  %2472 = vmatpush3.bf16.msra.mxu1 %v3134_v8 }
  0x72   : > { %2474 = vmatprep.subr.msk.bf16.mxu0 %vm1902_vm3, %v3135_v20  ;;  %2475 = vmatprep.subr.msk.bf16.mxu1 %vm1902_vm3, %v3135_v20  ;;  %v4741_v20 = vld [vmem:[#allocation18_spill] sm:$0xff] }
  0x73   : > { %2629 = vrot.lane.b32.xlu1 %v3718_v57, %s3148_s8 }
  0x74   : > { %2435 = vmatpush3.bf16.msra.mxu0 %v1904_v17 }
  0x75   : > { %2644 = vrot.lane.b32.xlu0 %v3727_v26, %s3148_s8  ;;  %2473 = vmatpush3.bf16.msra.mxu1 %v1904_v17 }
  0x77   : > { %2639 = vrot.lane.b32.xlu1 %v3731_v47, %s3148_s8 }
  0x79   : > { %2654 = vrot.lane.b32.xlu0 %v2653_v10, %s3149_s9  ;;  %v4733_v10 = vld [vmem:[#allocation12_spill] sm:$0xff] }
  0x7b   : > { %2649 = vrot.lane.b32.xlu1 %v3741_v45, %s3148_s8  ;;  %s265_s8 = scalar_lea.vmem %s4635_s5, %s4805_s22 }
  0x7d   : > { %2664 = vrot.lane.b32.xlu0 %v2663_v42, %s3149_s9 }
  0x7f   : > { %2659 = vrot.lane.b32.xlu1 %v2658_v52, %s3149_s9 }
  0x81   : > { %2674 = vrot.lane.b32.xlu0 %v2673_v7, %s3149_s9 }
  0x83   : > { %2669 = vrot.lane.b32.xlu1 %v2668_v48, %s3149_s9 }
  0x85   : > { %2684 = vrot.lane.b32.xlu0 %v2683_v41, %s3149_s9 }
  0x87   : > { %2679 = vrot.lane.b32.xlu1 %v2678_v33, %s3149_s9 }
  0x88   : > { %v3793_v9 = vpop.permute.xlu0 %2494 }
  0x89   : > { %2694 = vrot.lane.b32.xlu0 %v3295_v11, %s3150_s12 }
  0x8b   : > { %2689 = vrot.lane.b32.xlu1 %v3317_v27, %s3150_s12  ;;  %v4730_v27 = vld [vmem:[#allocation5_spill] sm:$0xff] }
  0x8d   : > { %2704 = vrot.lane.b32.xlu0 %v3621_v53, %s3151_s15 }
  0x8f   : > { %2699 = vrot.lane.b32.xlu1 %v3624_v58, %s3151_s15  ;;  %v4731_v58 = vld [vmem:[#allocation6_spill] sm:$0xff] }
  0x91   : > { %2714 = vrot.lane.b32.xlu0 %v2663_v42, %s3152_s18 }
  0x93   : > { %2709 = vrot.lane.b32.xlu1 %v2658_v52, %s3152_s18 }
  0x95   : > { %2724 = vrot.lane.b32.xlu0 %v4730_v27, %s3153_s19 }
  0x96   : > { %v3803_v28 = vpop.permute.xlu0 %2499 }
  0x97   : > { %2719 = vrot.lane.b32.xlu1 %v3295_v11, %s3153_s19  ;;  %v3801_v11 = vpop.permute.xlu1 %2504 }
  0x99   : > { %2734 = vrot.lane.b32.xlu0 %v3648_v32, %s3154_s20 }
  0x9b   : > { %2729 = vrot.lane.b32.xlu1 %v3621_v53, %s3154_s20  ;;  %v4732_v53 = vld [vmem:[#allocation9_spill] sm:$0xff]  ;;  %v3809_v30 = vpop.permute.xlu1 %2509 }
  0x9c   : > { %v3811_v51 = vpop.permute.xlu0 %2514 }
  0x9d   : > { %2744 = vrot.lane.b32.xlu0 %v4731_v58, %s3150_s12 }
  0x9f   : > { %2739 = vrot.lane.b32.xlu1 %v4730_v27, %s3150_s12 }
  0xa1   : > { %2754 = vrot.lane.b32.xlu0 %v3640_v56, %s3151_s15 }
  0xa3   : > { %2749 = vrot.lane.b32.xlu1 %v3648_v32, %s3151_s15 }
  0xa4   : > { %v3819_v32 = vpop.permute.xlu1 %2519 }
  0xa5   : > { %2764 = vrot.lane.b32.xlu0 %v2673_v7, %s3152_s18 }
  0xa6   : > { %v3821_v14 = vpop.permute.xlu0 %2524 }
  0xa7   : > { %2759 = vrot.lane.b32.xlu1 %v2668_v48, %s3152_s18  ;;  %v4737_v48 = vld [vmem:[#allocation13_spill] sm:$0xff] }
  0xa8   : > { %v3829_v42 = vpop.permute.xlu1 %2529 }
  0xa9   : > { %2774 = vrot.lane.b32.xlu0 %v4732_v53, %s3153_s19 }
  0xab   : > { %2769 = vrot.lane.b32.xlu1 %v4731_v58, %s3153_s19  ;;  %v2868_v58 = vpack.i.bf16 %v3449_v23, %v3452_v25 }
  0xad   : > { %2784 = vrot.lane.b32.xlu0 %v3667_v36, %s3154_s20 }
  0xaf   : > { %2779 = vrot.lane.b32.xlu1 %v3640_v56, %s3154_s20 }
  0xb0   : > { %v3831_v52 = vpop.permute.xlu0 %2534 }
  0xb1   : > { %2794 = vrot.lane.b32.xlu0 %v4733_v10, %s3150_s12  ;;  %4734 = vst [vmem:[#allocation5_spill] sm:$0xff] %v3831_v52  ;;  %v2502_v52 = vunpack.i.h.bf16 %v3803_v28 }
  0xb3   : > { %2789 = vrot.lane.b32.xlu1 %v4732_v53, %s3150_s12 }
  0xb4   : > { %v3837_v56 = vpop.permute.xlu1 %2539 }
  0xb5   : > { %2804 = vrot.lane.b32.xlu0 %v3658_v59, %s3151_s15  ;;  %4735 = vst [vmem:[#allocation6_spill] sm:$0xff] %v3837_v56  ;;  %v3839_v7 = vpop.permute.xlu0 %2544 }
  0xb6   : > { %4736 = vst [vmem:[#allocation9_spill] sm:$0xff] %v3839_v7 }
  0xb7   : > { %2799 = vrot.lane.b32.xlu1 %v3667_v36, %s3151_s15 }
  0xb9   : > { %2814 = vrot.lane.b32.xlu0 %v2683_v41, %s3152_s18  ;;  %v2838_v41 = vpack.i.bf16 %v3436_v50, %v3428_v38 }
  0xbb   : > { %2809 = vrot.lane.b32.xlu1 %v2678_v33, %s3152_s18  ;;  %v3847_v6 = vpop.permute.xlu1 %2549 }
  0xbc   : > { %4738 = vst [vmem:[#allocation12_spill] sm:$0xff] %v3847_v6 }
  0xbd   : > { %2824 = vrot.lane.b32.xlu0 %v4737_v48, %s3153_s19 }
  0xbf   : > { %2819 = vrot.lane.b32.xlu1 %v4733_v10, %s3153_s19 }
  0xc0   : > { %v3849_v36 = vpop.permute.xlu0 %2554 }
  0xc1   : > { %2834 = vrot.lane.b32.xlu0 %v3685_v2, %s3154_s20  ;;  %4739 = vst [vmem:[#allocation13_spill] sm:$0xff] %v3849_v36  ;;  %v2898_v36 = vpack.i.bf16 %v3464_v39, %v3467_v40 }
  0xc3   : > { %2829 = vrot.lane.b32.xlu1 %v3658_v59, %s3154_s20  ;;  %v3858_v33 = vpop.permute.xlu1 %2559 }
  0xc4   : > { %4740 = vst [vmem:[#allocation34_spill] sm:$0xff] %v3858_v33 }
  0xc5   : > { %2844 = vrot.lane.b32.xlu0 %v4737_v48, %s3150_s12  ;;  %v4742_v48 = vld [vmem:[#allocation21_spill] sm:$0xff] }
  0xc7   : > { %2839 = vrot.lane.b32.xlu1 %v2838_v41, %s3149_s9  ;;  %v2565_v8 = vpop.permute.xlu0 %2564 }
  0xc8   : > { %v2567_v40 = vunpack.i.h.bf16 %v2565_v8  ;;  %v2566_v39 = vunpack.i.l.bf16 %v2565_v8 }
  0xc9   : > { %2854 = vrot.lane.b32.xlu0 %v3685_v2, %s3151_s15 }
  0xca   : > { %v1582_v8 = vsel %vm1553_vm4, %v3570_v5, %v2566_v39 }
  0xcb   : > { %2849 = vrot.lane.b32.xlu1 %v4741_v20, %s3150_s12  ;;  %v3864_v17 = vpop.permute.xlu0 %2574 }
  0xcc   : > { %v2576_v44 = vunpack.i.l.bf16 %v3864_v17 }
  0xcd   : > { %v2570_v59 = vpop.permute.xlu1 %2569  ;;  %2864 = vrot.lane.b32.xlu0 %v2838_v41, %s3152_s18 }
  0xcf   : > { %2859 = vrot.lane.b32.xlu1 %v3676_v16, %s3151_s15  ;;  %v3869_v27 = vpop.permute.xlu0 %2584 }
  0xd1   : > { %v3873_v53 = vpop.permute.xlu1 %2579  ;;  %2874 = vrot.lane.b32.xlu0 %v4741_v20, %s3153_s19 }
  0xd3   : > { %2869 = vrot.lane.b32.xlu1 %v2868_v58, %s3152_s18  ;;  %v3878_v2 = vpop.permute.xlu0 %2594 }
  0xd5   : > { %v3880_v10 = vpop.permute.xlu1 %2589  ;;  %2884 = vrot.lane.b32.xlu0 %v3676_v16, %s3154_s20 }
  0xd7   : > { %2879 = vrot.lane.b32.xlu1 %v4742_v48, %s3153_s19  ;;  %v3886_v41 = vpop.permute.xlu0 %2604 }
  0xd8   : > { %4743 = vst [vmem:[#allocation18_spill] sm:$0xff] %v3886_v41 }
  0xd9   : > { %v3888_v33 = vpop.permute.xlu1 %2599  ;;  %2894 = vrot.lane.b32.xlu0 %v2868_v58, %s3149_s9  ;;  %v4748_v58 = vld [vmem:[#allocation22_spill] sm:$0xff] }
  0xdb   : > { %2889 = vrot.lane.b32.xlu1 %v3703_v60, %s3154_s20  ;;  %v3893_v20 = vpop.permute.xlu0 %2614 }
  0xdc   : > { %4744 = vst [vmem:[#allocation21_spill] sm:$0xff] %v3893_v20  ;;  %v4760_v20 = vld [vmem:[#allocation3_spill] sm:$0xff] }
  0xdd   : > { %v3897_v6 = vpop.permute.xlu1 %2609  ;;  %2904 = vrot.lane.b32.xlu0 %v4742_v48, %s3150_s12 }
  0xde   : > { %4745 = vst [vmem:[#allocation35_spill] sm:$0xff] %v3897_v6 }
  0xdf   : > { %2899 = vrot.lane.b32.xlu1 %v2898_v36, %s3149_s9  ;;  %v3902_v16 = vpop.permute.xlu0 %2624 }
  0xe0   : > { %4746 = vst [vmem:[#allocation36_spill] sm:$0xff] %v3902_v16  ;;  %v2928_v16 = vpack.i.bf16 %v3502_v18, %v3505_v46  ;;  %v2572_v18 = vunpack.i.h.bf16 %v2570_v59 }
  0xe1   : > { %v3904_v7 = vpop.permute.xlu1 %2619  ;;  %2914 = vrot.lane.b32.xlu0 %v3703_v60, %s3151_s15 }
  0xe2   : > { %4747 = vst [vmem:[#allocation37_spill] sm:$0xff] %v3904_v7  ;;  %v1583_v7 = vsel %vm1553_vm4, %v3567_v61, %v2567_v40 }
  0xe3   : > { %2909 = vrot.lane.b32.xlu1 %v4748_v58, %s3150_s12  ;;  %v3910_v25 = vpop.permute.xlu0 %2634 }
  0xe4   : > { %4749 = vst [vmem:[#allocation22_spill] sm:$0xff] %v3910_v25 }
  0xe5   : > { %v3912_v23 = vpop.permute.xlu1 %2629  ;;  %2924 = vrot.lane.b32.xlu0 %v2898_v36, %s3152_s18 }
  0xe6   : > { %4750 = vst [vmem:[#allocation38_spill] sm:$0xff] %v3912_v23 }
  0xe7   : > { %2919 = vrot.lane.b32.xlu1 %v3694_v49, %s3151_s15  ;;  %v2645_v48 = vpop.permute.xlu0 %2644 }
  0xe8   : > { %v2647_v60 = vunpack.i.h.bf16 %v2645_v48  ;;  %v2646_v38 = vunpack.i.l.bf16 %v2645_v48  ;;  %v2571_v48 = vunpack.i.l.bf16 %v2570_v59  ;;  %v4754_v59 = vld [vmem:[#allocation25_spill] sm:$0xff] }
  0xe9   : > { %v3923_v25 = vpop.permute.xlu1 %2639  ;;  %2934 = vrot.lane.b32.xlu0 %v4748_v58, %s3153_s19 }
  0xea   : > { %4751 = vst [vmem:[#allocation39_spill] sm:$0xff] %v3923_v25  ;;  %v3928_v36 = vsel %vm1586_vm5, %v1582_v8, %v2646_v38  ;;  %v3931_v46 = vsel %vm1586_vm5, %v1583_v7, %v2647_v60  ;;  %v1585_v38 = vsel %vm1553_vm4, %v3596_v4, %v2572_v18  ;;  %v1584_v7 = vsel %vm1553_vm4, %v3599_v0, %v2571_v48 }
  0xeb   : > { %4752 = vst [vmem:[#allocation40_spill] sm:$0xff] %v3928_v36  ;;  %4753 = vst [vmem:[#allocation41_spill] sm:$0xff] %v3931_v46  ;;  %2929 = vrot.lane.b32.xlu1 %v2928_v16, %s3152_s18  ;;  %v3934_v40 = vpop.permute.xlu0 %2654  ;;  %v2958_v48 = vpack.i.bf16 %v3527_v37, %v3522_v19  ;;  %v301_v36 = vld [vmem:[%s3223_s28 + $0xf8] sm:$0xff]  ;;  %v3137_v37 = vld [vmem:[%s4633_s3] ss:$0 sm:$0xff] }
  0xec   : > { %v2657_v43 = vunpack.i.h.bf16 %v3934_v40  ;;  %v2656_v29 = vunpack.i.l.bf16 %v3934_v40 }
  0xed   : > { %v2650_v39 = vpop.permute.xlu1 %2649  ;;  %2944 = vrot.lane.b32.xlu0 %v3694_v49, %s3154_s20 }
  0xee   : > { %v2652_v25 = vunpack.i.h.bf16 %v2650_v39  ;;  %v2651_v58 = vunpack.i.l.bf16 %v2650_v39  ;;  %v300_v39 = vld [vmem:[%s3223_s28 + $0xf0] sm:$0xff] }
  0xef   : > { %2939 = vrot.lane.b32.xlu1 %v4754_v59, %s3153_s19  ;;  %v3944_v60 = vpop.permute.xlu0 %2664 }
  0xf0   : > { %v3947_v8 = vsel %vm1586_vm5, %v1585_v38, %v2652_v25  ;;  %v3950_v46 = vsel %vm1586_vm5, %v1584_v7, %v2651_v58 }
  0xf1   : > { %4755 = vst [vmem:[#allocation25_spill] sm:$0xff] %v3947_v8  ;;  %4756 = vst [vmem:[#allocation42_spill] sm:$0xff] %v3950_v46  ;;  %v3952_v49 = vpop.permute.xlu1 %2659  ;;  %2954 = vrot.lane.b32.xlu0 %v2928_v16, %s3149_s9  ;;  %v3136_v16 = vld [vmem:[%s4632_s2] ss:$0 sm:$0xff]  ;;  %v2497_v46 = vunpack.i.h.bf16 %v3793_v9  ;;  %v2496_v8 = vunpack.i.l.bf16 %v3793_v9 }
  0xf2   : > { %v339_v58 = vmul.f32 %v3136_v16, %v300_v39  ;;  %v340_v38 = vmul.f32 %v3136_v16, %v301_v36  ;;  %v4759_v9 = vld [vmem:[#allocation2_spill] sm:$0xff]  ;;  %v2661_v40 = vunpack.i.l.bf16 %v3952_v49 }
  0xf3   : > { %2949 = vrot.lane.b32.xlu1 %v3718_v57, %s3154_s20  ;;  %v3957_v18 = vpop.permute.xlu0 %2674  ;;  %v1555_v50 = vsel %vm1553_vm4, %v4759_v9, %v2497_v46  ;;  %v1554_v56 = vsel %vm1553_vm4, %v4760_v20, %v2496_v8  ;;  %v2577_v8 = vunpack.i.h.bf16 %v3864_v17 }
  0xf4   : > { %v378_v39 = vadd.f32 %v3137_v37, %v339_v58  ;;  %v379_v36 = vadd.f32 %v3137_v37, %v340_v38  ;;  %v2501_v58 = vunpack.i.l.bf16 %v3803_v28  ;;  %v2582_v28 = vunpack.i.h.bf16 %v3873_v53 }
  0xf5   : > { %v3963_v23 = vpop.permute.xlu1 %2669  ;;  %2964 = vrot.lane.b32.xlu0 %v4754_v59, %s3150_s12  ;;  %v4758_v59 = vld [vmem:[#allocation30_spill] sm:$0xff] }
  0xf6   : > { %v410_v38 = vmax.f32 %v378_v39, 0.0  ;;  %v1556_v39 = vsel %vm1553_vm4, %v3282_v63, %v2501_v58  ;;  %v1587_v63 = vsel %vm1586_vm5, %v1554_v56, %v2576_v44 }
  0xf7   : > { %2959 = vrot.lane.b32.xlu1 %v2958_v48, %s3149_s9  ;;  %v3968_v25 = vpop.permute.xlu0 %2684 }
  0xf8   : > { %4757 = vst [vmem:[#allocation43_spill] sm:$0xff] %v3968_v25  ;;  %v2581_v25 = vunpack.i.l.bf16 %v3873_v53  ;;  %v2662_v53 = vunpack.i.h.bf16 %v3952_v49  ;;  %v1620_v49 = vsel %vm1619_vm6, %v1587_v63, %v2656_v29  ;;  %v4761_v29 = vld [vmem:[#allocation32_spill] sm:$0xff] }
  0xf9   : > { %v3973_v7 = vpop.permute.xlu1 %2679  ;;  %2974 = vrot.lane.b32.xlu0 %v3718_v57, %s3151_s15  ;;  %v2988_v57 = vpack.i.bf16 %v3543_v12, %v3546_v1  ;;  %v411_v1 = vmax.f32 %v379_v36, 0.0 }
  0xfa   : > { %v1589_v36 = vsel %vm1586_vm5, %v1556_v39, %v2581_v25 }
  0xfb   : > { %2969 = vrot.lane.b32.xlu1 %v4758_v59, %s3150_s12  ;;  %v3981_v19 = vpop.permute.xlu0 %2694  ;;  %v4022_v46 = vrot.slane %v411_v1, 7 }
  0xfc   : > { %v2696_v58 = vunpack.i.l.bf16 %v3981_v19 }
  0xfd   : > { %v3986_v16 = vpop.permute.xlu1 %2689  ;;  %2984 = vrot.lane.b32.xlu0 %v2958_v48, %s3152_s18  ;;  %v4001_v48 = vpack.i.bf16 %v3567_v61, %v3570_v5  ;;  %v1557_v5 = vsel %vm1553_vm4, %v3279_v62, %v2502_v52  ;;  %v1588_v62 = vsel %vm1586_vm5, %v1555_v50, %v2577_v8  ;;  %v2697_v52 = vunpack.i.h.bf16 %v3981_v19 }
  0xfe   : > { %v1590_v17 = vsel %vm1586_vm5, %v1557_v5, %v2582_v28  ;;  %v1621_v6 = vsel %vm1619_vm6, %v1588_v62, %v2657_v43  ;;  %v2692_v1 = vunpack.i.h.bf16 %v3986_v16  ;;  %v2691_v44 = vunpack.i.l.bf16 %v3986_v16 }
  0xff   : > { %2979 = vrot.lane.b32.xlu1 %v3712_v22, %s3151_s15  ;;  %v2705_v37 = vpop.permute.xlu0 %2704  ;;  %v1622_v19 = vsel %vm1619_vm6, %v1589_v36, %v2661_v40  ;;  %v1623_v25 = vsel %vm1619_vm6, %v1590_v17, %v2662_v53 }
 0x100   : > { %v2707_v50 = vunpack.i.h.bf16 %v2705_v37  ;;  %v2706_v56 = vunpack.i.l.bf16 %v2705_v37  ;;  %v1655_v28 = vsel %vm1652_vm7, %v1622_v19, %v2696_v58  ;;  %v1653_v17 = vsel %vm1652_vm7, %v1620_v49, %v2691_v44 }
 0x101   : > { %v2700_v61 = vpop.permute.xlu1 %2699  ;;  %2994 = vrot.lane.b32.xlu0 %v4758_v59, %s3153_s19  ;;  %v493_v59 = vrot.slane %v410_v38, 7 }
 0x102   : > { %v2702_v38 = vunpack.i.h.bf16 %v2700_v61  ;;  %v2701_v8 = vunpack.i.l.bf16 %v2700_v61  ;;  %v1654_v61 = vsel %vm1652_vm7, %v1621_v6, %v2692_v1  ;;  %v1688_v36 = vsel %vm1685_vm8, %v1655_v28, %v2706_v56 }
 0x103   : > { %2989 = vrot.lane.b32.xlu1 %v2988_v57, %s3152_s18  ;;  %v2715_v12 = vpop.permute.xlu0 %2714 }
 0x104   : > { %v2717_v5 = vunpack.i.h.bf16 %v2715_v12  ;;  %v2716_v39 = vunpack.i.l.bf16 %v2715_v12  ;;  %v1686_v40 = vsel %vm1685_vm8, %v1653_v17, %v2701_v8 }
 0x105   : > { %v2710_v31 = vpop.permute.xlu1 %2709  ;;  %3004 = vrot.lane.b32.xlu0 %v3712_v22, %s3154_s20  ;;  %v1656_v22 = vsel %vm1652_vm7, %v1623_v25, %v2697_v52  ;;  %v1687_v52 = vsel %vm1685_vm8, %v1654_v61, %v2702_v38  ;;  %v4763_v61 = vunpack.i.l.bf16 %v3801_v11 }
 0x106   : > { %v2712_v62 = vunpack.i.h.bf16 %v2710_v31  ;;  %v2711_v16 = vunpack.i.l.bf16 %v2710_v31  ;;  %v1689_v53 = vsel %vm1685_vm8, %v1656_v22, %v2707_v50 }
 0x107   : > { %2999 = vrot.lane.b32.xlu1 %v4761_v29, %s3153_s19  ;;  %v2725_v43 = vpop.permute.xlu0 %2724  ;;  %v1722_v49 = vsel %vm1718_vm9, %v1689_v53, %v2717_v5 }
 0x108   : > { %v2727_v37 = vunpack.i.h.bf16 %v2725_v43  ;;  %v2726_v41 = vunpack.i.l.bf16 %v2725_v43  ;;  %v1719_v1 = vsel %vm1718_vm9, %v1686_v40, %v2711_v16  ;;  %v1720_v50 = vsel %vm1718_vm9, %v1687_v52, %v2712_v62 }
 0x109   : > { %v2720_v63 = vpop.permute.xlu1 %2719  ;;  %3014 = vrot.lane.b32.xlu0 %v2988_v57, %s3149_s9  ;;  %v1721_v57 = vsel %vm1718_vm9, %v1688_v36, %v2716_v39  ;;  %v4069_v39 = vsel %vm445_vm0, %v493_v59, %v4022_v46  ;;  %v1558_v36 = vsel %vm1553_vm4, %v3270_v55, %v4763_v61  ;;  %v4090_v40 = vpack.i.bf16 %v3596_v4, %v3599_v0  ;;  %v4766_v4 = vld [vmem:[#allocation33_spill] sm:$0xff] }
 0x10a   : > { %v2722_v12 = vunpack.i.h.bf16 %v2720_v63  ;;  %v2721_v58 = vunpack.i.l.bf16 %v2720_v63  ;;  %v1754_v56 = vsel %vm1751_vm10, %v1721_v57, %v2726_v41  ;;  %v1755_v19 = vsel %vm1751_vm10, %v1722_v49, %v2727_v37 }
 0x10b   : > { %3009 = vrot.lane.b32.xlu1 %v3731_v47, %s3154_s20  ;;  %v2735_v31 = vpop.permute.xlu0 %2734  ;;  %v4762_v37 = vunpack.i.h.bf16 %v3801_v11  ;;  %v4765_v55 = vunpack.i.l.bf16 %v3809_v30  ;;  %v2587_v57 = vunpack.i.h.bf16 %v3869_v27  ;;  %v2586_v49 = vunpack.i.l.bf16 %v3869_v27 }
 0x10c   : > { %v2737_v44 = vunpack.i.h.bf16 %v2735_v31  ;;  %v2736_v6 = vunpack.i.l.bf16 %v2735_v31  ;;  %v1752_v5 = vsel %vm1751_vm10, %v1719_v1, %v2721_v58  ;;  %v1753_v41 = vsel %vm1751_vm10, %v1720_v50, %v2722_v12 }
 0x10d   : > { %v2730_v25 = vpop.permute.xlu1 %2729  ;;  %3024 = vrot.lane.b32.xlu0 %v4761_v29, %s3150_s12  ;;  %v4072_v29 = vsel %vm445_vm0, 0.0, %v493_v59  ;;  %v1559_v17 = vsel %vm1553_vm4, %v3267_v54, %v4762_v37  ;;  %v1064_v12 = vrot.slane %v4069_v39, 1  ;;  %v4764_v54 = vunpack.i.h.bf16 %v3809_v30 }
 0x10e   : > { %v2732_v38 = vunpack.i.h.bf16 %v2730_v25  ;;  %v2731_v8 = vunpack.i.l.bf16 %v2730_v25  ;;  %v1787_v43 = vsel %vm1784_vm11, %v1754_v56, %v2736_v6  ;;  %v1788_v28 = vsel %vm1784_vm11, %v1755_v19, %v2737_v44 }
 0x10f   : > { %3019 = vrot.lane.b32.xlu1 %v4001_v48, %s3149_s9  ;;  %v4063_v22 = vpop.permute.xlu0 %2744  ;;  %v1818_v62 = vpack.c.bf16 %v1788_v28, %v1787_v43  ;;  %v1063_v52 = vrot.slane %v4072_v29, 1  ;;  %v1561_v11 = vsel %vm1553_vm4, %v3288_v3, %v4764_v54  ;;  %v1560_v58 = vsel %vm1553_vm4, %v3299_v13, %v4765_v55 }
 0x110   : > { %v1785_v16 = vsel %vm1784_vm11, %v1752_v5, %v2731_v8  ;;  %v1786_v63 = vsel %vm1784_vm11, %v1753_v41, %v2732_v38  ;;  %v2516_v31 = vunpack.i.l.bf16 %v3811_v51  ;;  %v4112_v3 = vsel %vm445_vm0, %v4022_v46, 0.0 }
 0x111   : > { %v4084_v53 = vpop.permute.xlu1 %2739  ;;  %3034 = vrot.lane.b32.xlu0 %v3731_v47, %s3151_s15  ;;  %v1817_v59 = vpack.c.bf16 %v1786_v63, %v1785_v16  ;;  %v2517_v47 = vunpack.i.h.bf16 %v3811_v51  ;;  %v2592_v13 = vunpack.i.h.bf16 %v3880_v10  ;;  %v2591_v30 = vunpack.i.l.bf16 %v3880_v10 }
 0x112   : > { %v2667_v44 = vunpack.i.h.bf16 %v3944_v60  ;;  %v2666_v6 = vunpack.i.l.bf16 %v3944_v60  ;;  %v4122_v27 = vpack.i.bf16 %v4069_v39, %v4072_v29  ;;  %v4127_v46 = vsel %vm611_vm1, %v1063_v52, %v1064_v12 }
 0x113   : > { %3029 = vrot.lane.b32.xlu1 %v4766_v4, %s3150_s12  ;;  %2436 = vmatprep.mubr.msk.bf16.mxu0 %vm1853_vm12, %v1817_v59  ;;  %v2755_v0 = vpop.permute.xlu0 %2754  ;;  %v2672_v50 = vunpack.i.h.bf16 %v3963_v23  ;;  %v2671_v10 = vunpack.i.l.bf16 %v3963_v23  ;;  %v1066_v56 = vrot.slane %v4112_v3, 1  ;;  %v1592_v19 = vsel %vm1586_vm5, %v1559_v17, %v2587_v57 }
 0x114   : > { %2437 = vmatmul.mubr.msk.bf16.vlgmr.msra.gmra.mrb[0].mxu0 %vm1853_vm12, %v1818_v62  ;;  %v1591_v25 = vsel %vm1586_vm5, %v1558_v36, %v2586_v49  ;;  %v2747_v38 = vunpack.i.h.bf16 %v4063_v22  ;;  %v2746_v8 = vunpack.i.l.bf16 %v4063_v22  ;;  %v1594_v43 = vsel %vm1586_vm5, %v1561_v11, %v2592_v13 }
 0x115   : > { %v2750_v1 = vpop.permute.xlu1 %2749  ;;  %3044 = vrot.lane.b32.xlu0 %v4001_v48, %s3152_s18  ;;  %v1164_v48 = vrot.slane %v4072_v29, 2  ;;  %v1593_v23 = vsel %vm1586_vm5, %v1560_v58, %v2591_v30  ;;  %v1624_v28 = vsel %vm1619_vm6, %v1591_v25, %v2666_v6  ;;  %v1625_v5 = vsel %vm1619_vm6, %v1592_v19, %v2667_v44 }
 0x116   : > { %v2742_v62 = vunpack.i.h.bf16 %v4084_v53  ;;  %v2741_v16 = vunpack.i.l.bf16 %v4084_v53  ;;  %v2757_v63 = vunpack.i.h.bf16 %v2755_v0  ;;  %v2756_v37 = vunpack.i.l.bf16 %v2755_v0 }
 0x117   : > { %3039 = vrot.lane.b32.xlu1 %v3727_v26, %s3151_s15  ;;  %v2765_v60 = vpop.permute.xlu0 %2764  ;;  %v1626_v22 = vsel %vm1619_vm6, %v1593_v23, %v2671_v10  ;;  %v1627_v17 = vsel %vm1619_vm6, %v1594_v43, %v2672_v50  ;;  %v2752_v61 = vunpack.i.h.bf16 %v2750_v1  ;;  %v2751_v36 = vunpack.i.l.bf16 %v2750_v1 }
 0x118   : > { %v1660_v52 = vsel %vm1652_vm7, %v1627_v17, %v2747_v38  ;;  %v1659_v54 = vsel %vm1652_vm7, %v1626_v22, %v2746_v8  ;;  %v2767_v11 = vunpack.i.h.bf16 %v2765_v60  ;;  %v2766_v55 = vunpack.i.l.bf16 %v2765_v60 }
 0x119   : > { %v2760_v41 = vpop.permute.xlu1 %2759  ;;  %3054 = vrot.lane.b32.xlu0 %v4766_v4, %s3153_s19  ;;  %v1657_v49 = vsel %vm1652_vm7, %v1624_v28, %v2741_v16  ;;  %v1658_v13 = vsel %vm1652_vm7, %v1625_v5, %v2742_v62  ;;  %v1692_v30 = vsel %vm1685_vm8, %v1659_v54, %v2756_v37  ;;  %v1693_v44 = vsel %vm1685_vm8, %v1660_v52, %v2757_v63 }
 0x11a   : > { %v2762_v58 = vunpack.i.h.bf16 %v2760_v41  ;;  %v2761_v53 = vunpack.i.l.bf16 %v2760_v41  ;;  %v1690_v6 = vsel %vm1685_vm8, %v1657_v49, %v2751_v36  ;;  %v1691_v1 = vsel %vm1685_vm8, %v1658_v13, %v2752_v61 }
 0x11b   : > { %3049 = vrot.lane.b32.xlu1 %v4090_v40, %s3152_s18  ;;  %v2775_v59 = vpop.permute.xlu0 %2774  ;;  %v1726_v19 = vsel %vm1718_vm9, %v1693_v44, %v2767_v11  ;;  %v1165_v61 = vrot.slane %v4069_v39, 2  ;;  %v1167_v36 = vrot.slane %v4112_v3, 2  ;;  %v1067_v54 = vsel %vm611_vm1, %v1064_v12, %v1066_v56 }
 0x11c   : > { %v2777_v0 = vunpack.i.h.bf16 %v2775_v59  ;;  %v2776_v57 = vunpack.i.l.bf16 %v2775_v59  ;;  %v1723_v8 = vsel %vm1718_vm9, %v1690_v6, %v2761_v53  ;;  %v1724_v43 = vsel %vm1718_vm9, %v1691_v1, %v2762_v58 }
 0x11d   : > { %v2770_v4 = vpop.permute.xlu1 %2769  ;;  %3064 = vrot.lane.b32.xlu0 %v3727_v26, %s3154_s20  ;;  %v1725_v26 = vsel %vm1718_vm9, %v1692_v30, %v2766_v55  ;;  %v1563_v58 = vsel %vm1553_vm4, %v3328_v35, %v2517_v47  ;;  %v2522_v53 = vunpack.i.h.bf16 %v3819_v32  ;;  %v3088_v12 = vpack.i.bf16 %v1067_v54, %v4127_v46 }
 0x11e   : > { %v2772_v50 = vunpack.i.h.bf16 %v2770_v4  ;;  %v2771_v10 = vunpack.i.l.bf16 %v2770_v4  ;;  %v1758_v23 = vsel %vm1751_vm10, %v1725_v26, %v2776_v57  ;;  %v1759_v28 = vsel %vm1751_vm10, %v1726_v19, %v2777_v0 }
 0x11f   : > { %3059 = vrot.lane.b32.xlu1 %v3617_v34, %s3153_s19  ;;  %v2785_v60 = vpop.permute.xlu0 %2784  ;;  %v2521_v4 = vunpack.i.l.bf16 %v3819_v32  ;;  %v1168_v3 = vsel %vm788_vm2, %v1165_v61, %v1167_v36  ;;  %v1562_v35 = vsel %vm1553_vm4, %v3313_v24, %v2516_v31  ;;  %v2597_v32 = vunpack.i.h.bf16 %v3878_v2 }
 0x120   : > { %v2787_v25 = vunpack.i.h.bf16 %v2785_v60  ;;  %v2786_v38 = vunpack.i.l.bf16 %v2785_v60  ;;  %v1756_v37 = vsel %vm1751_vm10, %v1723_v8, %v2771_v10  ;;  %v1757_v22 = vsel %vm1751_vm10, %v1724_v43, %v2772_v50 }
 0x121   : > { %v2780_v5 = vpop.permute.xlu1 %2779  ;;  %3074 = vrot.lane.b32.xlu0 %v4090_v40, %s3149_s9  ;;  %v2596_v47 = vunpack.i.l.bf16 %v3878_v2  ;;  %v2602_v56 = vunpack.i.h.bf16 %v3888_v33  ;;  %v2601_v46 = vunpack.i.l.bf16 %v3888_v33  ;;  %v2677_v29 = vunpack.i.h.bf16 %v3957_v18 }
 0x122   : > { %v2782_v41 = vunpack.i.h.bf16 %v2780_v5  ;;  %v2781_v62 = vunpack.i.l.bf16 %v2780_v5  ;;  %v1791_v16 = vsel %vm1784_vm11, %v1758_v23, %v2786_v38  ;;  %v1792_v63 = vsel %vm1784_vm11, %v1759_v28, %v2787_v25 }
 0x123   : > { %3069 = vrot.lane.b32.xlu1 %v3741_v45, %s3154_s20  ;;  %v2795_v17 = vpop.permute.xlu0 %2794  ;;  %v1820_v52 = vpack.c.bf16 %v1792_v63, %v1791_v16  ;;  %v1565_v24 = vsel %vm1553_vm4, %v3365_v21, %v2522_v53  ;;  %v1564_v51 = vsel %vm1553_vm4, %v3361_v15, %v2521_v4  ;;  %v3108_v31 = vpack.i.bf16 %v4759_v9, %v4760_v20 }
 0x124   : > { %v1789_v40 = vsel %vm1784_vm11, %v1756_v37, %v2781_v62  ;;  %v1790_v59 = vsel %vm1784_vm11, %v1757_v22, %v2782_v41  ;;  %v2682_v33 = vunpack.i.h.bf16 %v3973_v7  ;;  %v2681_v57 = vunpack.i.l.bf16 %v3973_v7 }
 0x125   : > { %v1819_v11 = vpack.c.bf16 %v1790_v59, %v1789_v40  ;;  %v2790_v55 = vpop.permute.xlu1 %2789  ;;  %3084 = vrot.lane.b32.xlu0 %v3617_v34, %s3150_s12  ;;  %v1166_v34 = vsel %vm788_vm2, %v1164_v48, %v1165_v61  ;;  %v2676_v48 = vunpack.i.l.bf16 %v3957_v18  ;;  %v1595_v49 = vsel %vm1586_vm5, %v1562_v35, %v2596_v47 }
 0x126   : > { %v3098_v2 = vpack.i.bf16 %v1168_v3, %v1166_v34  ;;  %v2797_v13 = vunpack.i.h.bf16 %v2795_v17  ;;  %v2796_v21 = vunpack.i.l.bf16 %v2795_v17  ;;  %v1598_v30 = vsel %vm1586_vm5, %v1565_v24, %v2602_v56 }
 0x127   : > { %3079 = vrot.lane.b32.xlu1 %v4122_v27, %s3149_s9  ;;  %2440 = vmatprep.mubr.msk.bf16.mxu0 %vm1853_vm12, %v1819_v11  ;;  %v2805_v39 = vpop.permute.xlu0 %2804  ;;  %v1597_v15 = vsel %vm1586_vm5, %v1564_v51, %v2601_v46  ;;  %v1628_v44 = vsel %vm1619_vm6, %v1595_v49, %v2676_v48  ;;  %v2792_v7 = vunpack.i.h.bf16 %v2790_v55  ;;  %v2791_v6 = vunpack.i.l.bf16 %v2790_v55  ;;  %v4767_v46 = vld [vmem:[#allocation4_spill] sm:$0xff] }
 0x128   : > { %2441 = vmatmul.mubr.msk.bf16.gmra.mrb[4].mxu0 %vm1853_vm12, %v1820_v52  ;;  %v2807_v1 = vunpack.i.h.bf16 %v2805_v39  ;;  %v2806_v50 = vunpack.i.l.bf16 %v2805_v39  ;;  %v1630_v10 = vsel %vm1619_vm6, %v1597_v15, %v2681_v57  ;;  %v1631_v60 = vsel %vm1619_vm6, %v1598_v30, %v2682_v33 }
 0x129   : > { %v2800_v0 = vpop.permute.xlu1 %2799  ;;  %3094 = vrot.lane.b32.xlu0 %v3741_v45, %s3151_s15  ;;  %v1596_v45 = vsel %vm1586_vm5, %v1563_v58, %v2597_v32  ;;  %v1664_v38 = vsel %vm1652_vm7, %v1631_v60, %v2797_v13  ;;  %v1663_v8 = vsel %vm1652_vm7, %v1630_v10, %v2796_v21  ;;  %v1661_v16 = vsel %vm1652_vm7, %v1628_v44, %v2791_v6  ;;  %v4769_v21 = vld [vmem:[#allocation18_spill] sm:$0xff] }
 0x12a   : > { %v1629_v20 = vsel %vm1619_vm6, %v1596_v45, %v2677_v29  ;;  %v2802_v26 = vunpack.i.h.bf16 %v2800_v0  ;;  %v2801_v19 = vunpack.i.l.bf16 %v2800_v0  ;;  %v1696_v37 = vsel %vm1685_vm8, %v1663_v8, %v2806_v50  ;;  %v4772_v50 = vld [vmem:[#allocation7_spill] sm:$0xff]  ;;  %v4773_v10 = vld [vmem:[#allocation10_spill] sm:$0xff] }
 0x12b   : > { %3089 = vrot.lane.b32.xlu1 %v3088_v12, %s3150_s12  ;;  %v2815_v18 = vpop.permute.xlu0 %2814  ;;  %v1662_v63 = vsel %vm1652_vm7, %v1629_v20, %v2792_v7  ;;  %v1697_v22 = vsel %vm1685_vm8, %v1664_v38, %v2807_v1  ;;  %v2527_v57 = vunpack.i.h.bf16 %v3821_v14  ;;  %v2532_v49 = vunpack.i.h.bf16 %v3829_v42  ;;  %v4770_v20 = vld [vmem:[#allocation8_spill] sm:$0xff]  ;;  %v4771_v7 = vld [vmem:[#allocation35_spill] sm:$0xff] }
 0x12c   : > { %v2817_v43 = vunpack.i.h.bf16 %v2815_v18  ;;  %v2816_v23 = vunpack.i.l.bf16 %v2815_v18  ;;  %v1694_v17 = vsel %vm1685_vm8, %v1661_v16, %v2801_v19  ;;  %v1695_v61 = vsel %vm1685_vm8, %v1662_v63, %v2802_v26  ;;  %v4774_v26 = vld [vmem:[#allocation43_spill] sm:$0xff] }
 0x12d   : > { %v2810_v9 = vpop.permute.xlu1 %2809  ;;  %3104 = vrot.lane.b32.xlu0 %v4122_v27, %s3152_s18  ;;  %v2526_v18 = vunpack.i.l.bf16 %v3821_v14  ;;  %v2531_v13 = vunpack.i.l.bf16 %v3829_v42  ;;  %v2607_v30 = vunpack.i.h.bf16 %v4769_v21  ;;  %v2606_v15 = vunpack.i.l.bf16 %v4769_v21  ;;  %v4775_v38 = vld [vmem:[#allocation11_spill] sm:$0xff] }
 0x12e   : > { %v2812_v27 = vunpack.i.h.bf16 %v2810_v9  ;;  %v2811_v28 = vunpack.i.l.bf16 %v2810_v9  ;;  %v1729_v52 = vsel %vm1718_vm9, %v1696_v37, %v2816_v23  ;;  %v1730_v54 = vsel %vm1718_vm9, %v1697_v22, %v2817_v43 }
 0x12f   : > { %3099 = vrot.lane.b32.xlu1 %v3098_v2, %s3151_s15  ;;  %v2825_v25 = vpop.permute.xlu0 %2824  ;;  %v1567_v9 = vsel %vm1553_vm4, %v4770_v20, %v2527_v57  ;;  %v2612_v6 = vunpack.i.h.bf16 %v4771_v7  ;;  %v2611_v1 = vunpack.i.l.bf16 %v4771_v7  ;;  %v1566_v14 = vsel %vm1553_vm4, %v4772_v50, %v2526_v18 }
 0x130   : > { %v2827_v41 = vunpack.i.h.bf16 %v2825_v25  ;;  %v2826_v62 = vunpack.i.l.bf16 %v2825_v25  ;;  %v1727_v58 = vsel %vm1718_vm9, %v1694_v17, %v2811_v28  ;;  %v1728_v53 = vsel %vm1718_vm9, %v1695_v61, %v2812_v27 }
 0x131   : > { %v2820_v5 = vpop.permute.xlu1 %2819  ;;  %3114 = vrot.lane.b32.xlu0 %v3088_v12, %s3153_s19  ;;  %v1569_v60 = vsel %vm1553_vm4, %v4773_v10, %v2532_v49  ;;  %v2687_v42 = vunpack.i.h.bf16 %v4774_v26  ;;  %v2686_v19 = vunpack.i.l.bf16 %v4774_v26  ;;  %v1568_v8 = vsel %vm1553_vm4, %v4775_v38, %v2531_v13 }
 0x132   : > { %v2822_v36 = vunpack.i.h.bf16 %v2820_v5  ;;  %v2821_v40 = vunpack.i.l.bf16 %v2820_v5  ;;  %v1762_v4 = vsel %vm1751_vm10, %v1729_v52, %v2826_v62  ;;  %v1763_v39 = vsel %vm1751_vm10, %v1730_v54, %v2827_v41 }
 0x133   : > { %3109 = vrot.lane.b32.xlu1 %v3108_v31, %s3152_s18  ;;  %v2835_v59 = vpop.permute.xlu0 %2834  ;;  %v4768_v31 = vld [vmem:[#allocation31_spill] sm:$0xff]  ;;  %v1599_v28 = vsel %vm1586_vm5, %v1566_v14, %v2606_v15  ;;  %v1600_v5 = vsel %vm1586_vm5, %v1567_v9, %v2607_v30  ;;  %v1602_v63 = vsel %vm1586_vm5, %v1569_v60, %v2612_v6  ;;  %v1601_v37 = vsel %vm1586_vm5, %v1568_v8, %v2611_v1 }
 0x134   : > { %v2837_v11 = vunpack.i.h.bf16 %v2835_v59  ;;  %v2836_v55 = vunpack.i.l.bf16 %v2835_v59  ;;  %v1760_v47 = vsel %vm1751_vm10, %v1727_v58, %v2821_v40  ;;  %v1761_v56 = vsel %vm1751_vm10, %v1728_v53, %v2822_v36 }
 0x135   : > { %v2830_v12 = vpop.permute.xlu1 %2829  ;;  %3124 = vrot.lane.b32.xlu0 %v3098_v2, %s3154_s20  ;;  %v1632_v61 = vsel %vm1619_vm6, %v1599_v28, %v2686_v19  ;;  %v1633_v36 = vsel %vm1619_vm6, %v1600_v5, %v2687_v42  ;;  %v4778_v5 = vld [vmem:[#allocation21_spill] sm:$0xff] }
 0x136   : > { %v2832_v34 = vunpack.i.h.bf16 %v2830_v12  ;;  %v2831_v3 = vunpack.i.l.bf16 %v2830_v12  ;;  %v1795_v35 = vsel %vm1784_vm11, %v1762_v4, %v2836_v55  ;;  %v1796_v32 = vsel %vm1784_vm11, %v1763_v39, %v2837_v11 }
 0x137   : > { %3119 = vrot.lane.b32.xlu1 %v4767_v46, %s3153_s19  ;;  %v2845_v29 = vpop.permute.xlu0 %2844  ;;  %v1822_v24 = vpack.c.bf16 %v1796_v32, %v1795_v35 }
 0x138   : > { %v1793_v48 = vsel %vm1784_vm11, %v1760_v47, %v2831_v3  ;;  %v1794_v0 = vsel %vm1784_vm11, %v1761_v56, %v2832_v34  ;;  %v2847_v23 = vunpack.i.h.bf16 %v2845_v29  ;;  %v2846_v27 = vunpack.i.l.bf16 %v2845_v29 }
 0x139   : > { %v1821_v51 = vpack.c.bf16 %v1794_v0, %v1793_v48  ;;  %v4260_v2 = vpop.permute.xlu1 %2839 }
 0x13a   : > { %v2842_v43 = vunpack.i.h.bf16 %v4260_v2  ;;  %v2841_v11 = vunpack.i.l.bf16 %v4260_v2  ;;  %v1665_v55 = vsel %vm1652_vm7, %v1632_v61, %v2846_v27  ;;  %v1666_v58 = vsel %vm1652_vm7, %v1633_v36, %v2847_v23  ;;  %v4781_v36 = vld [vmem:[#allocation14_spill] sm:$0xff] }
 0x13b   : > { %3129 = vrot.lane.b32.xlu1 %v4768_v31, %s3154_s20  ;;  %2444 = vmatprep.mubr.msk.bf16.mxu0 %vm1853_vm12, %v1821_v51  ;;  %v2855_v33 = vpop.permute.xlu0 %2854 }
 0x13c   : > { %2445 = vmatmul.mubr.msk.bf16.gmra.mrb[8].mxu0 %vm1853_vm12, %v1822_v24  ;;  %v2857_v41 = vunpack.i.h.bf16 %v2855_v33  ;;  %v2856_v62 = vunpack.i.l.bf16 %v2855_v33  ;;  %v1635_v54 = vsel %vm1619_vm6, %v1602_v63, %v2842_v43  ;;  %v1634_v33 = vsel %vm1619_vm6, %v1601_v37, %v2841_v11  ;;  %v4777_v43 = vld [vmem:[#allocation6_spill] sm:$0xff]  ;;  %v4779_v63 = vld [vmem:[#allocation15_spill] sm:$0xff] }
 0x13d   : > { %v2850_v45 = vpop.permute.xlu1 %2849  ;;  %v2542_v23 = vunpack.i.h.bf16 %v4777_v43  ;;  %v2541_v28 = vunpack.i.l.bf16 %v4777_v43 }
 0x13e   : > { %v2852_v53 = vunpack.i.h.bf16 %v2850_v45  ;;  %v2851_v4 = vunpack.i.l.bf16 %v2850_v45  ;;  %v1698_v39 = vsel %vm1685_vm8, %v1665_v55, %v2856_v62  ;;  %v1699_v12 = vsel %vm1685_vm8, %v1666_v58, %v2857_v41  ;;  %v4783_v58 = vld [vmem:[#allocation17_spill] sm:$0xff] }
 0x13f   : > { %v2865_v44 = vpop.permute.xlu0 %2864  ;;  %v2617_v41 = vunpack.i.h.bf16 %v4778_v5  ;;  %v2616_v62 = vunpack.i.l.bf16 %v4778_v5 }
 0x140   : > { %v2867_v22 = vunpack.i.h.bf16 %v2865_v44  ;;  %v2866_v17 = vunpack.i.l.bf16 %v2865_v44  ;;  %v1667_v13 = vsel %vm1652_vm7, %v1634_v33, %v2851_v4  ;;  %v1668_v21 = vsel %vm1652_vm7, %v1635_v54, %v2852_v53 }
 0x141   : > { %v2860_v25 = vpop.permute.xlu1 %2859  ;;  %v1572_v53 = vsel %vm1553_vm4, %v4783_v58, %v2541_v28 }
 0x142   : > { %v1731_v3 = vsel %vm1718_vm9, %v1698_v39, %v2866_v17  ;;  %v1732_v35 = vsel %vm1718_vm9, %v1699_v12, %v2867_v22  ;;  %v2862_v56 = vunpack.i.h.bf16 %v2860_v25  ;;  %v2861_v46 = vunpack.i.l.bf16 %v2860_v25  ;;  %v4776_v25 = vld [vmem:[#allocation5_spill] sm:$0xff] }
 0x143   : > { %v2875_v16 = vpop.permute.xlu0 %2874  ;;  %v2537_v38 = vunpack.i.h.bf16 %v4776_v25  ;;  %v2536_v8 = vunpack.i.l.bf16 %v4776_v25  ;;  %v4780_v22 = vld [vmem:[#allocation37_spill] sm:$0xff] }
 0x144   : > { %v2877_v59 = vunpack.i.h.bf16 %v2875_v16  ;;  %v2876_v52 = vunpack.i.l.bf16 %v2875_v16  ;;  %v1700_v30 = vsel %vm1685_vm8, %v1667_v13, %v2861_v46  ;;  %v1701_v15 = vsel %vm1685_vm8, %v1668_v21, %v2862_v56 }
 0x145   : > { %v2870_v40 = vpop.permute.xlu1 %2869  ;;  %v1571_v37 = vsel %vm1553_vm4, %v4779_v63, %v2537_v38  ;;  %v2622_v17 = vunpack.i.h.bf16 %v4780_v22  ;;  %v2621_v61 = vunpack.i.l.bf16 %v4780_v22 }
 0x146   : > { %v1764_v29 = vsel %vm1751_vm10, %v1731_v3, %v2876_v52  ;;  %v1765_v48 = vsel %vm1751_vm10, %v1732_v35, %v2877_v59  ;;  %v2872_v24 = vunpack.i.h.bf16 %v2870_v40  ;;  %v2871_v51 = vunpack.i.l.bf16 %v2870_v40  ;;  %v4782_v59 = vld [vmem:[#allocation16_spill] sm:$0xff] }
 0x147   : > { %v2885_v34 = vpop.permute.xlu0 %2884  ;;  %v1570_v40 = vsel %vm1553_vm4, %v4781_v36, %v2536_v8  ;;  %v1573_v52 = vsel %vm1553_vm4, %v4782_v59, %v2542_v23  ;;  %v1604_v3 = vsel %vm1586_vm5, %v1571_v37, %v2617_v41  ;;  %v1605_v46 = vsel %vm1586_vm5, %v1572_v53, %v2621_v61 }
 0x148   : > { %v2887_v32 = vunpack.i.h.bf16 %v2885_v34  ;;  %v2886_v47 = vunpack.i.l.bf16 %v2885_v34  ;;  %v1733_v20 = vsel %vm1718_vm9, %v1700_v30, %v2871_v51  ;;  %v1734_v9 = vsel %vm1718_vm9, %v1701_v15, %v2872_v24 }
 0x149   : > { %v2880_v0 = vpop.permute.xlu1 %2879  ;;  %v1603_v34 = vsel %vm1586_vm5, %v1570_v40, %v2616_v62  ;;  %v1606_v56 = vsel %vm1586_vm5, %v1573_v52, %v2622_v17 }
 0x14a   : > { %v1797_v2 = vsel %vm1784_vm11, %v1764_v29, %v2886_v47  ;;  %v1798_v31 = vsel %vm1784_vm11, %v1765_v48, %v2887_v32  ;;  %v2882_v57 = vunpack.i.h.bf16 %v2880_v0  ;;  %v2881_v18 = vunpack.i.l.bf16 %v2880_v0 }
 0x14b   : > { %v1823_v49 = vpack.c.bf16 %v1798_v31, %v1797_v2  ;;  %v2895_v45 = vpop.permute.xlu0 %2894 }
 0x14c   : > { %v1766_v1 = vsel %vm1751_vm10, %v1733_v20, %v2881_v18  ;;  %v1767_v50 = vsel %vm1751_vm10, %v1734_v9, %v2882_v57  ;;  %v2897_v54 = vunpack.i.h.bf16 %v2895_v45  ;;  %v2896_v11 = vunpack.i.l.bf16 %v2895_v45 }
 0x14d   : > { %v2890_v44 = vpop.permute.xlu1 %2889  ;;  %2448 = vmatprep.mubr.msk.bf16.mxu0 %vm1853_vm12, %v1823_v49 }
 0x14e   : > { %v2892_v7 = vunpack.i.h.bf16 %v2890_v44  ;;  %v2891_v6 = vunpack.i.l.bf16 %v2890_v44  ;;  %v1636_v0 = vsel %vm1619_vm6, %v1603_v34, %v2896_v11  ;;  %v1637_v24 = vsel %vm1619_vm6, %v1604_v3, %v2897_v54  ;;  %v4786_v3 = vld [vmem:[#allocation36_spill] sm:$0xff] }
 0x14f   : > { %v2905_v14 = vpop.permute.xlu0 %2904 }
 0x150   : > { %v1799_v10 = vsel %vm1784_vm11, %v1766_v1, %v2891_v6  ;;  %v1800_v60 = vsel %vm1784_vm11, %v1767_v50, %v2892_v7  ;;  %v2907_v39 = vunpack.i.h.bf16 %v2905_v14  ;;  %v2906_v12 = vunpack.i.l.bf16 %v2905_v14 }
 0x151   : > { %v1824_v26 = vpack.c.bf16 %v1800_v60, %v1799_v10  ;;  %v2900_v42 = vpop.permute.xlu1 %2899 }
 0x152   : > { %v2902_v4 = vunpack.i.h.bf16 %v2900_v42  ;;  %v2901_v57 = vunpack.i.l.bf16 %v2900_v42  ;;  %v1669_v18 = vsel %vm1652_vm7, %v1636_v0, %v2906_v12  ;;  %v1670_v49 = vsel %vm1652_vm7, %v1637_v24, %v2907_v39  ;;  %v4789_v24 = vld [vmem:[#allocation20_spill] sm:$0xff] }
 0x153   : > { %2449 = vmatmul.mubr.msk.bf16.gmra.mrb[12].mxu0 %vm1853_vm12, %v1824_v26  ;;  %v2915_v19 = vpop.permute.xlu0 %2914 }
 0x154   : > { %v2917_v35 = vunpack.i.h.bf16 %v2915_v19  ;;  %v2916_v32 = vunpack.i.l.bf16 %v2915_v19  ;;  %v1639_v33 = vsel %vm1619_vm6, %v1606_v56, %v2902_v4  ;;  %v1638_v25 = vsel %vm1619_vm6, %v1605_v46, %v2901_v57  ;;  %v4785_v4 = vld [vmem:[#allocation12_spill] sm:$0xff]  ;;  %v4787_v56 = vld [vmem:[#allocation19_spill] sm:$0xff] }
 0x155   : > { %v2910_v27 = vpop.permute.xlu1 %2909  ;;  %v2552_v39 = vunpack.i.h.bf16 %v4785_v4  ;;  %v2551_v34 = vunpack.i.l.bf16 %v4785_v4 }
 0x156   : > { %v2912_v45 = vunpack.i.h.bf16 %v2910_v27  ;;  %v2911_v13 = vunpack.i.l.bf16 %v2910_v27  ;;  %v1702_v21 = vsel %vm1685_vm8, %v1669_v18, %v2916_v32  ;;  %v1703_v30 = vsel %vm1685_vm8, %v1670_v49, %v2917_v35  ;;  %v4791_v49 = vld [vmem:[#allocation24_spill] sm:$0xff] }
 0x157   : > { %v2925_v16 = vpop.permute.xlu0 %2924  ;;  %v2627_v35 = vunpack.i.h.bf16 %v4786_v3  ;;  %v2626_v32 = vunpack.i.l.bf16 %v4786_v3 }
 0x158   : > { %v2927_v29 = vunpack.i.h.bf16 %v2925_v16  ;;  %v2926_v48 = vunpack.i.l.bf16 %v2925_v16  ;;  %v1671_v27 = vsel %vm1652_vm7, %v1638_v25, %v2911_v13  ;;  %v1672_v28 = vsel %vm1652_vm7, %v1639_v33, %v2912_v45 }
 0x159   : > { %v2920_v55 = vpop.permute.xlu1 %2919  ;;  %v1576_v45 = vsel %vm1553_vm4, %v4791_v49, %v2551_v34 }
 0x15a   : > { %v1735_v44 = vsel %vm1718_vm9, %v1702_v21, %v2926_v48  ;;  %v1736_v20 = vsel %vm1718_vm9, %v1703_v30, %v2927_v29  ;;  %v2922_v6 = vunpack.i.h.bf16 %v2920_v55  ;;  %v2921_v1 = vunpack.i.l.bf16 %v2920_v55  ;;  %v4784_v55 = vld [vmem:[#allocation9_spill] sm:$0xff]  ;;  %v4788_v29 = vld [vmem:[#allocation38_spill] sm:$0xff] }
 0x15b   : > { %v2935_v47 = vpop.permute.xlu0 %2934  ;;  %v2547_v58 = vunpack.i.h.bf16 %v4784_v55  ;;  %v2546_v53 = vunpack.i.l.bf16 %v4784_v55  ;;  %v2632_v48 = vunpack.i.h.bf16 %v4788_v29  ;;  %v2631_v0 = vunpack.i.l.bf16 %v4788_v29 }
 0x15c   : > { %v2937_v2 = vunpack.i.h.bf16 %v2935_v47  ;;  %v2936_v31 = vunpack.i.l.bf16 %v2935_v47  ;;  %v1704_v5 = vsel %vm1685_vm8, %v1671_v27, %v2921_v1  ;;  %v1705_v41 = vsel %vm1685_vm8, %v1672_v28, %v2922_v6 }
 0x15d   : > { %v2930_v51 = vpop.permute.xlu1 %2929  ;;  %v1575_v46 = vsel %vm1553_vm4, %v4787_v56, %v2547_v58  ;;  %v1609_v1 = vsel %vm1586_vm5, %v1576_v45, %v2631_v0 }
 0x15e   : > { %v1768_v14 = vsel %vm1751_vm10, %v1735_v44, %v2936_v31  ;;  %v1769_v10 = vsel %vm1751_vm10, %v1736_v20, %v2937_v2  ;;  %v2932_v60 = vunpack.i.h.bf16 %v2930_v51  ;;  %v2931_v26 = vunpack.i.l.bf16 %v2930_v51  ;;  %v4790_v2 = vld [vmem:[#allocation23_spill] sm:$0xff] }
 0x15f   : > { %v2945_v15 = vpop.permute.xlu0 %2944  ;;  %v1574_v51 = vsel %vm1553_vm4, %v4789_v24, %v2546_v53  ;;  %v1577_v31 = vsel %vm1553_vm4, %v4790_v2, %v2552_v39  ;;  %v1608_v44 = vsel %vm1586_vm5, %v1575_v46, %v2627_v35 }
 0x160   : > { %v2947_v9 = vunpack.i.h.bf16 %v2945_v15  ;;  %v2946_v7 = vunpack.i.l.bf16 %v2945_v15  ;;  %v1737_v16 = vsel %vm1718_vm9, %v1704_v5, %v2931_v26  ;;  %v1738_v63 = vsel %vm1718_vm9, %v1705_v41, %v2932_v60 }
 0x161   : > { %v2940_v50 = vpop.permute.xlu1 %2939  ;;  %v1607_v15 = vsel %vm1586_vm5, %v1574_v51, %v2626_v32  ;;  %v1610_v6 = vsel %vm1586_vm5, %v1577_v31, %v2632_v48 }
 0x162   : > { %v1801_v42 = vsel %vm1784_vm11, %v1768_v14, %v2946_v7  ;;  %v1802_v19 = vsel %vm1784_vm11, %v1769_v10, %v2947_v9  ;;  %v2942_v38 = vunpack.i.h.bf16 %v2940_v50  ;;  %v2941_v8 = vunpack.i.l.bf16 %v2940_v50 }
 0x163   : > { %v2955_v43 = vpop.permute.xlu0 %2954  ;;  %v1825_v23 = vpack.c.bf16 %v1802_v19, %v1801_v42 }
 0x164   : > { %v1770_v17 = vsel %vm1751_vm10, %v1737_v16, %v2941_v8  ;;  %v1771_v61 = vsel %vm1751_vm10, %v1738_v63, %v2942_v38  ;;  %v2957_v33 = vunpack.i.h.bf16 %v2955_v43  ;;  %v2956_v57 = vunpack.i.l.bf16 %v2955_v43 }
 0x165   : > { %v2950_v62 = vpop.permute.xlu1 %2949  ;;  %2452 = vmatprep.mubr.msk.bf16.mxu1 %vm1853_vm12, %v1825_v23 }
 0x166   : > { %v2952_v37 = vunpack.i.h.bf16 %v2950_v62  ;;  %v2951_v22 = vunpack.i.l.bf16 %v2950_v62  ;;  %v1640_v10 = vsel %vm1619_vm6, %v1607_v15, %v2956_v57  ;;  %v1641_v60 = vsel %vm1619_vm6, %v1608_v44, %v2957_v33  ;;  %v4794_v44 = vld [vmem:[#allocation22_spill] sm:$0xff] }
 0x167   : > { %v2965_v36 = vpop.permute.xlu0 %2964 }
 0x168   : > { %v1803_v40 = vsel %vm1784_vm11, %v1770_v17, %v2951_v22  ;;  %v1804_v59 = vsel %vm1784_vm11, %v1771_v61, %v2952_v37  ;;  %v2967_v21 = vunpack.i.h.bf16 %v2965_v36  ;;  %v2966_v30 = vunpack.i.l.bf16 %v2965_v36 }
 0x169   : > { %v1826_v52 = vpack.c.bf16 %v1804_v59, %v1803_v40  ;;  %v2960_v54 = vpop.permute.xlu1 %2959 }
 0x16a   : > { %v2962_v13 = vunpack.i.h.bf16 %v2960_v54  ;;  %v2961_v38 = vunpack.i.l.bf16 %v2960_v54  ;;  %v1673_v8 = vsel %vm1652_vm7, %v1640_v10, %v2966_v30  ;;  %v1674_v43 = vsel %vm1652_vm7, %v1641_v60, %v2967_v21  ;;  %v4797_v60 = vld [vmem:[#allocation26_spill] sm:$0xff] }
 0x16b   : > { %2453 = vmatmul.mubr.msk.bf16.vlgmr.msra.gmra.mrb[0].mxu1 %vm1853_vm12, %v1826_v52  ;;  %v2975_v11 = vpop.permute.xlu0 %2974 }
 0x16c   : > { %v2977_v20 = vunpack.i.h.bf16 %v2975_v11  ;;  %v2976_v9 = vunpack.i.l.bf16 %v2975_v11  ;;  %v1643_v25 = vsel %vm1619_vm6, %v1610_v6, %v2962_v13  ;;  %v1642_v55 = vsel %vm1619_vm6, %v1609_v1, %v2961_v38  ;;  %v4793_v13 = vld [vmem:[#allocation34_spill] sm:$0xff]  ;;  %v4795_v6 = vld [vmem:[#allocation27_spill] sm:$0xff] }
 0x16d   : > { %v2970_v12 = vpop.permute.xlu1 %2969  ;;  %v2562_v21 = vunpack.i.h.bf16 %v4793_v13  ;;  %v2561_v15 = vunpack.i.l.bf16 %v4793_v13 }
 0x16e   : > { %v2972_v23 = vunpack.i.h.bf16 %v2970_v12  ;;  %v2971_v27 = vunpack.i.l.bf16 %v2970_v12  ;;  %v1706_v28 = vsel %vm1685_vm8, %v1673_v8, %v2976_v9  ;;  %v1707_v5 = vsel %vm1685_vm8, %v1674_v43, %v2977_v20  ;;  %v4799_v43 = vld [vmem:[#allocation29_spill] sm:$0xff] }
 0x16f   : > { %v2985_v47 = vpop.permute.xlu0 %2984  ;;  %v2637_v20 = vunpack.i.h.bf16 %v4794_v44  ;;  %v2636_v9 = vunpack.i.l.bf16 %v4794_v44 }
 0x170   : > { %v2987_v50 = vunpack.i.h.bf16 %v2985_v47  ;;  %v2986_v14 = vunpack.i.l.bf16 %v2985_v47  ;;  %v1675_v12 = vsel %vm1652_vm7, %v1642_v55, %v2971_v27  ;;  %v1676_v34 = vsel %vm1652_vm7, %v1643_v25, %v2972_v23 }
 0x171   : > { %v2980_v18 = vpop.permute.xlu1 %2979  ;;  %v1580_v23 = vsel %vm1553_vm4, %v4799_v43, %v2561_v15 }
 0x172   : > { %v1739_v62 = vsel %vm1718_vm9, %v1706_v28, %v2986_v14  ;;  %v1740_v16 = vsel %vm1718_vm9, %v1707_v5, %v2987_v50  ;;  %v2982_v22 = vunpack.i.h.bf16 %v2980_v18  ;;  %v2981_v17 = vunpack.i.l.bf16 %v2980_v18  ;;  %v4792_v18 = vld [vmem:[#allocation13_spill] sm:$0xff]  ;;  %v4796_v50 = vld [vmem:[#allocation39_spill] sm:$0xff] }
 0x173   : > { %v2995_v7 = vpop.permute.xlu0 %2994  ;;  %v2557_v49 = vunpack.i.h.bf16 %v4792_v18  ;;  %v2556_v45 = vunpack.i.l.bf16 %v4792_v18  ;;  %v2642_v14 = vunpack.i.h.bf16 %v4796_v50  ;;  %v2641_v10 = vunpack.i.l.bf16 %v4796_v50 }
 0x174   : > { %v2997_v42 = vunpack.i.h.bf16 %v2995_v7  ;;  %v2996_v19 = vunpack.i.l.bf16 %v2995_v7  ;;  %v1708_v3 = vsel %vm1685_vm8, %v1675_v12, %v2981_v17  ;;  %v1709_v35 = vsel %vm1685_vm8, %v1676_v34, %v2982_v22 }
 0x175   : > { %v2990_v26 = vpop.permute.xlu1 %2989  ;;  %v1579_v1 = vsel %vm1553_vm4, %v4795_v6, %v2557_v49  ;;  %v1613_v17 = vsel %vm1586_vm5, %v1580_v23, %v2641_v10 }
 0x176   : > { %v1772_v61 = vsel %vm1751_vm10, %v1739_v62, %v2996_v19  ;;  %v1773_v36 = vsel %vm1751_vm10, %v1740_v16, %v2997_v42  ;;  %v2992_v59 = vunpack.i.h.bf16 %v2990_v26  ;;  %v2991_v52 = vunpack.i.l.bf16 %v2990_v26  ;;  %v4798_v42 = vld [vmem:[#allocation28_spill] sm:$0xff] }
 0x177   : > { %v3005_v41 = vpop.permute.xlu0 %3004  ;;  %v1578_v26 = vsel %vm1553_vm4, %v4797_v60, %v2556_v45  ;;  %v1581_v19 = vsel %vm1553_vm4, %v4798_v42, %v2562_v21  ;;  %v1612_v62 = vsel %vm1586_vm5, %v1579_v1, %v2637_v20 }
 0x178   : > { %v3007_v63 = vunpack.i.h.bf16 %v3005_v41  ;;  %v3006_v37 = vunpack.i.l.bf16 %v3005_v41  ;;  %v1741_v47 = vsel %vm1718_vm9, %v1708_v3, %v2991_v52  ;;  %v1742_v56 = vsel %vm1718_vm9, %v1709_v35, %v2992_v59 }
 0x179   : > { %v3000_v40 = vpop.permute.xlu1 %2999  ;;  %v1611_v41 = vsel %vm1586_vm5, %v1578_v26, %v2636_v9  ;;  %v1614_v22 = vsel %vm1586_vm5, %v1581_v19, %v2642_v14 }
 0x17a   : > { %v1805_v54 = vsel %vm1784_vm11, %v1772_v61, %v3006_v37  ;;  %v1806_v11 = vsel %vm1784_vm11, %v1773_v36, %v3007_v63  ;;  %v3002_v58 = vunpack.i.h.bf16 %v3000_v40  ;;  %v3001_v53 = vunpack.i.l.bf16 %v3000_v40 }
 0x17b   : > { %v1827_v4 = vpack.c.bf16 %v1806_v11, %v1805_v54  ;;  %v3015_v39 = vpop.permute.xlu0 %3014 }
 0x17c   : > { %v1774_v48 = vsel %vm1751_vm10, %v1741_v47, %v3001_v53  ;;  %v1775_v0 = vsel %vm1751_vm10, %v1742_v56, %v3002_v58  ;;  %v3017_v25 = vunpack.i.h.bf16 %v3015_v39  ;;  %v3016_v38 = vunpack.i.l.bf16 %v3015_v39 }
 0x17d   : > { %v3010_v32 = vpop.permute.xlu1 %3009  ;;  %2456 = vmatprep.mubr.msk.bf16.mxu1 %vm1853_vm12, %v1827_v4 }
 0x17e   : > { %v3012_v46 = vunpack.i.h.bf16 %v3010_v32  ;;  %v3011_v29 = vunpack.i.l.bf16 %v3010_v32  ;;  %v1644_v40 = vsel %vm1619_vm6, %v1611_v41, %v3016_v38  ;;  %v1645_v59 = vsel %vm1619_vm6, %v1612_v62, %v3017_v25 }
 0x17f   : > { %v3025_v24 = vpop.permute.xlu0 %3024 }
 0x180   : > { %v1807_v51 = vsel %vm1784_vm11, %v1774_v48, %v3011_v29  ;;  %v1808_v2 = vsel %vm1784_vm11, %v1775_v0, %v3012_v46  ;;  %v3027_v28 = vunpack.i.h.bf16 %v3025_v24  ;;  %v3026_v5 = vunpack.i.l.bf16 %v3025_v24 }
 0x181   : > { %v1828_v31 = vpack.c.bf16 %v1808_v2, %v1807_v51  ;;  %v3020_v33 = vpop.permute.xlu1 %3019 }
 0x182   : > { %v3022_v27 = vunpack.i.h.bf16 %v3020_v33  ;;  %v3021_v58 = vunpack.i.l.bf16 %v3020_v33  ;;  %v1677_v53 = vsel %vm1652_vm7, %v1644_v40, %v3026_v5  ;;  %v1678_v4 = vsel %vm1652_vm7, %v1645_v59, %v3027_v28  ;;  %v4801_v40 = vld [vmem:[#allocation41_spill] sm:$0xff] }
 0x183   : > { %2457 = vmatmul.mubr.msk.bf16.gmra.mrb[4].mxu1 %vm1853_vm12, %v1828_v31  ;;  %v3035_v57 = vpop.permute.xlu0 %3034 }
 0x184   : > { %v3037_v16 = vunpack.i.h.bf16 %v3035_v57  ;;  %v3036_v63 = vunpack.i.l.bf16 %v3035_v57  ;;  %v1647_v55 = vsel %vm1619_vm6, %v1614_v22, %v3022_v27  ;;  %v1646_v18 = vsel %vm1619_vm6, %v1613_v17, %v3021_v58 }
 0x185   : > { %v3030_v30 = vpop.permute.xlu1 %3029 }
 0x186   : > { %v3032_v39 = vunpack.i.h.bf16 %v3030_v30  ;;  %v3031_v12 = vunpack.i.l.bf16 %v3030_v30  ;;  %v1710_v34 = vsel %vm1685_vm8, %v1677_v53, %v3036_v63  ;;  %v1711_v3 = vsel %vm1685_vm8, %v1678_v4, %v3037_v16 }
 0x187   : > { %v3045_v7 = vpop.permute.xlu0 %3044 }
 0x188   : > { %v3047_v61 = vunpack.i.h.bf16 %v3045_v7  ;;  %v3046_v36 = vunpack.i.l.bf16 %v3045_v7  ;;  %v1679_v30 = vsel %vm1652_vm7, %v1646_v18, %v3031_v12  ;;  %v1680_v15 = vsel %vm1652_vm7, %v1647_v55, %v3032_v39  ;;  %v4802_v55 = vld [vmem:[#allocation25_spill] sm:$0xff] }
 0x189   : > { %v3040_v8 = vpop.permute.xlu1 %3039 }
 0x18a   : > { %v1743_v32 = vsel %vm1718_vm9, %v1710_v34, %v3046_v36  ;;  %v1744_v47 = vsel %vm1718_vm9, %v1711_v3, %v3047_v61  ;;  %v3042_v29 = vunpack.i.h.bf16 %v3040_v8  ;;  %v3041_v48 = vunpack.i.l.bf16 %v3040_v8  ;;  %v4800_v61 = vld [vmem:[#allocation40_spill] sm:$0xff] }
 0x18b   : > { %v3055_v37 = vpop.permute.xlu0 %3054 }
 0x18c   : > { %v3057_v54 = vunpack.i.h.bf16 %v3055_v37  ;;  %v3056_v11 = vunpack.i.l.bf16 %v3055_v37  ;;  %v1712_v44 = vsel %vm1685_vm8, %v1679_v30, %v3041_v48  ;;  %v1713_v20 = vsel %vm1685_vm8, %v1680_v15, %v3042_v29 }
 0x18d   : > { %v3050_v52 = vpop.permute.xlu1 %3049 }
 0x18e   : > { %v1776_v0 = vsel %vm1751_vm10, %v1743_v32, %v3056_v11  ;;  %v1777_v24 = vsel %vm1751_vm10, %v1744_v47, %v3057_v54  ;;  %v3052_v2 = vunpack.i.h.bf16 %v3050_v52  ;;  %v3051_v31 = vunpack.i.l.bf16 %v3050_v52 }
 0x18f   : > { %v3065_v35 = vpop.permute.xlu0 %3064 }
 0x190   : > { %v3067_v56 = vunpack.i.h.bf16 %v3065_v35  ;;  %v3066_v46 = vunpack.i.l.bf16 %v3065_v35  ;;  %v1745_v7 = vsel %vm1718_vm9, %v1712_v44, %v3051_v31  ;;  %v1746_v6 = vsel %vm1718_vm9, %v1713_v20, %v3052_v2 }
 0x191   : > { %v3060_v51 = vpop.permute.xlu1 %3059 }
 0x192   : > { %v1809_v33 = vsel %vm1784_vm11, %v1776_v0, %v3066_v46  ;;  %v1810_v57 = vsel %vm1784_vm11, %v1777_v24, %v3067_v56  ;;  %v3062_v49 = vunpack.i.h.bf16 %v3060_v51  ;;  %v3061_v45 = vunpack.i.l.bf16 %v3060_v51 }
 0x193   : > { %v1829_v13 = vpack.c.bf16 %v1810_v57, %v1809_v33  ;;  %v3075_v21 = vpop.permute.xlu0 %3074 }
 0x194   : > { %v1778_v14 = vsel %vm1751_vm10, %v1745_v7, %v3061_v45  ;;  %v1779_v10 = vsel %vm1751_vm10, %v1746_v6, %v3062_v49  ;;  %v3077_v23 = vunpack.i.h.bf16 %v3075_v21  ;;  %v3076_v27 = vunpack.i.l.bf16 %v3075_v21  ;;  %v4803_v49 = vld [vmem:[#allocation42_spill] sm:$0xff] }
 0x195   : > { %v3070_v9 = vpop.permute.xlu1 %3069  ;;  %2460 = vmatprep.mubr.msk.bf16.mxu1 %vm1853_vm12, %v1829_v13 }
 0x196   : > { %v3072_v1 = vunpack.i.h.bf16 %v3070_v9  ;;  %v3071_v50 = vunpack.i.l.bf16 %v3070_v9  ;;  %v1648_v36 = vsel %vm1619_vm6, %v4800_v61, %v3076_v27  ;;  %v1649_v59 = vsel %vm1619_vm6, %v4801_v40, %v3077_v23 }
 0x197   : > { %v3085_v60 = vpop.permute.xlu0 %3084 }
 0x198   : > { %v1811_v26 = vsel %vm1784_vm11, %v1778_v14, %v3071_v50  ;;  %v1812_v42 = vsel %vm1784_vm11, %v1779_v10, %v3072_v1  ;;  %v3087_v41 = vunpack.i.h.bf16 %v3085_v60  ;;  %v3086_v62 = vunpack.i.l.bf16 %v3085_v60 }
 0x199   : > { %v1830_v19 = vpack.c.bf16 %v1812_v42, %v1811_v26  ;;  %v3080_v25 = vpop.permute.xlu1 %3079 }
 0x19a   : > { %v3082_v5 = vunpack.i.h.bf16 %v3080_v25  ;;  %v3081_v53 = vunpack.i.l.bf16 %v3080_v25  ;;  %v1681_v4 = vsel %vm1652_vm7, %v1648_v36, %v3086_v62  ;;  %v1682_v39 = vsel %vm1652_vm7, %v1649_v59, %v3087_v41 }
 0x19b   : > { %2461 = vmatmul.mubr.msk.bf16.gmra.mrb[8].mxu1 %vm1853_vm12, %v1830_v19  ;;  %v3095_v38 = vpop.permute.xlu0 %3094 }
 0x19c   : > { %v3097_v16 = vunpack.i.h.bf16 %v3095_v38  ;;  %v3096_v63 = vunpack.i.l.bf16 %v3095_v38  ;;  %v1651_v58 = vsel %vm1619_vm6, %v4802_v55, %v3082_v5  ;;  %v1650_v45 = vsel %vm1619_vm6, %v4803_v49, %v3081_v53 }
 0x19d   : > { %v3090_v8 = vpop.permute.xlu1 %3089 }
 0x19e   : > { %v3092_v12 = vunpack.i.h.bf16 %v3090_v8  ;;  %v3091_v34 = vunpack.i.l.bf16 %v3090_v8  ;;  %v1714_v3 = vsel %vm1685_vm8, %v1681_v4, %v3096_v63  ;;  %v1715_v35 = vsel %vm1685_vm8, %v1682_v39, %v3097_v16 }
 0x19f   : > { %v3105_v43 = vpop.permute.xlu0 %3104 }
 0x1a0   : > { %v3107_v22 = vunpack.i.h.bf16 %v3105_v43  ;;  %v3106_v17 = vunpack.i.l.bf16 %v3105_v43  ;;  %v1683_v15 = vsel %vm1652_vm7, %v1650_v45, %v3091_v34  ;;  %v1684_v44 = vsel %vm1652_vm7, %v1651_v58, %v3092_v12 }
 0x1a1   : > { %v3100_v28 = vpop.permute.xlu1 %3099 }
 0x1a2   : > { %v1747_v47 = vsel %vm1718_vm9, %v1714_v3, %v3106_v17  ;;  %v1748_v56 = vsel %vm1718_vm9, %v1715_v35, %v3107_v22  ;;  %v3102_v48 = vunpack.i.h.bf16 %v3100_v28  ;;  %v3101_v0 = vunpack.i.l.bf16 %v3100_v28 }
 0x1a3   : > { %v3115_v37 = vpop.permute.xlu0 %3114 }
 0x1a4   : > { %v3117_v54 = vunpack.i.h.bf16 %v3115_v37  ;;  %v3116_v11 = vunpack.i.l.bf16 %v3115_v37  ;;  %v1716_v20 = vsel %vm1685_vm8, %v1683_v15, %v3101_v0  ;;  %v1717_v9 = vsel %vm1685_vm8, %v1684_v44, %v3102_v48 }
 0x1a5   : > { %v3110_v52 = vpop.permute.xlu1 %3109 }
 0x1a6   : > { %v1780_v24 = vsel %vm1751_vm10, %v1747_v47, %v3116_v11  ;;  %v1781_v51 = vsel %vm1751_vm10, %v1748_v56, %v3117_v54  ;;  %v3112_v31 = vunpack.i.h.bf16 %v3110_v52  ;;  %v3111_v33 = vunpack.i.l.bf16 %v3110_v52 }
 0x1a7   : > { %v3125_v32 = vpop.permute.xlu0 %3124 }
 0x1a8   : > { %v3127_v46 = vunpack.i.h.bf16 %v3125_v32  ;;  %v3126_v29 = vunpack.i.l.bf16 %v3125_v32  ;;  %v1749_v6 = vsel %vm1718_vm9, %v1716_v20, %v3111_v33  ;;  %v1750_v1 = vsel %vm1718_vm9, %v1717_v9, %v3112_v31 }
 0x1a9   : > { %v3120_v2 = vpop.permute.xlu1 %3119 }
 0x1aa   : > { %v1813_v57 = vsel %vm1784_vm11, %v1780_v24, %v3126_v29  ;;  %v1814_v18 = vsel %vm1784_vm11, %v1781_v51, %v3127_v46  ;;  %v3122_v13 = vunpack.i.h.bf16 %v3120_v2  ;;  %v3121_v21 = vunpack.i.l.bf16 %v3120_v2 }
 0x1ab   : > { %v1831_v30 = vpack.c.bf16 %v1814_v18, %v1813_v57 }
 0x1ac   : > { %v1782_v10 = vsel %vm1751_vm10, %v1749_v6, %v3121_v21  ;;  %v1783_v60 = vsel %vm1751_vm10, %v1750_v1, %v3122_v13 }
 0x1ad   : > { %v3130_v7 = vpop.permute.xlu1 %3129  ;;  %2464 = vmatprep.mubr.msk.bf16.mxu1 %vm1853_vm12, %v1831_v30 }
 0x1ae   : > { %v3132_v50 = vunpack.i.h.bf16 %v3130_v7  ;;  %v3131_v14 = vunpack.i.l.bf16 %v3130_v7 }
 0x1b0   : > { %v1815_v26 = vsel %vm1784_vm11, %v1782_v10, %v3131_v14  ;;  %v1816_v42 = vsel %vm1784_vm11, %v1783_v60, %v3132_v50 }
 0x1b1   : > { %v1832_v19 = vpack.c.bf16 %v1816_v42, %v1815_v26 }
 0x1b3   : > { %2465 = vmatmul.mubr.msk.bf16.gmra.mrb[12].mxu1 %vm1853_vm12, %v1832_v19 }
 0x1e7   : > { %v2438_v25 = vpop.f32.mrb[0].mxu0 }
 0x1e8   : > { %2069 = vst.msk [vmem:[%s4489_s30 + $0x10] sm:$0xff] %vm1553_vm4, %v2438_v25  ;;  %v1940_v38 = vpop.f32.mrb[1].mxu0  ;;  %v2172_v27 = vmul.f32 %v2438_v25, %v2438_v25  ;;  %v2102_v16 = vsel %vm1553_vm4, %v2438_v25, 0.0 }
 0x1e9   : > { %2067 = vst.msk [vmem:[%s4489_s30] sm:$0xff] %vm1553_vm4, %v1940_v38  ;;  %v2170_v8 = vmul.f32 %v1940_v38, %v1940_v38  ;;  %v2439_v43 = vpop.f32.mrb[2].mxu0  ;;  %v2099_v28 = vsel %vm1553_vm4, %v1940_v38, 0.0 }
 0x1ea   : > { %2070 = vst.msk [vmem:[%s4489_s30 + $0x18] sm:$0xff] %vm1553_vm4, %v2439_v43  ;;  %v1943_v23 = vpop.f32.mrb[3].mxu0  ;;  %v2173_v37 = vmul.f32 %v2439_v43, %v2439_v43  ;;  %v2205_v36 = vsel %vm1553_vm4, %v2172_v27, 0.0  ;;  %v2104_v40 = vsel %vm1553_vm4, %v2439_v43, 0.0 }
 0x1eb   : > { %2068 = vst.msk [vmem:[%s4489_s30 + $0x8] sm:$0xff] %vm1553_vm4, %v1943_v23  ;;  %v2100_v5 = vsel %vm1553_vm4, %v1943_v23, 0.0  ;;  %v2171_v41 = vmul.f32 %v1943_v23, %v1943_v23  ;;  %v2202_v63 = vsel %vm1553_vm4, %v2170_v8, 0.0 }
 0x1ec   : > { %v2101_v62 = vadd.f32 %v2100_v5, %v2099_v28  ;;  %v2207_v54 = vsel %vm1553_vm4, %v2173_v37, 0.0 }
 0x1ed   : > { %v2203_v22 = vsel %vm1553_vm4, %v2171_v41, 0.0 }
 0x1ee   : > { %v2103_v17 = vadd.f32 %v2102_v16, %v2101_v62  ;;  %v2204_v61 = vadd.f32 %v2203_v22, %v2202_v63 }
 0x1f0   : > { %v2206_v59 = vadd.f32 %v2205_v36, %v2204_v61  ;;  %v2105_v52 = vadd.f32 %v2104_v40, %v2103_v17 }
 0x1f2   : > { %v2208_v11 = vadd.f32 %v2207_v54, %v2206_v59 }
 0x1fb   : > { %v2442_v55 = vpop.f32.mrb[4].mxu0 }
 0x1fc   : > { %2073 = vst.msk [vmem:[%s4489_s30 + $0x30] sm:$0xff] %vm1553_vm4, %v2442_v55  ;;  %v1956_v58 = vpop.f32.mrb[5].mxu0  ;;  %v2176_v3 = vmul.f32 %v2442_v55, %v2442_v55  ;;  %v2110_v29 = vsel %vm1553_vm4, %v2442_v55, 0.0 }
 0x1fd   : > { %2071 = vst.msk [vmem:[%s4489_s30 + $0x20] sm:$0xff] %vm1553_vm4, %v1956_v58  ;;  %v2106_v53 = vsel %vm1553_vm4, %v1956_v58, 0.0  ;;  %v2174_v4 = vmul.f32 %v1956_v58, %v1956_v58  ;;  %v2443_v39 = vpop.f32.mrb[6].mxu0 }
 0x1fe   : > { %v2107_v12 = vadd.f32 %v2106_v53, %v2105_v52  ;;  %2074 = vst.msk [vmem:[%s4489_s30 + $0x38] sm:$0xff] %vm1553_vm4, %v2443_v39  ;;  %v1959_v34 = vpop.f32.mrb[7].mxu0  ;;  %v2177_v48 = vmul.f32 %v2443_v39, %v2443_v39  ;;  %v2213_v2 = vsel %vm1553_vm4, %v2176_v3, 0.0  ;;  %v2112_v31 = vsel %vm1553_vm4, %v2443_v39, 0.0 }
 0x1ff   : > { %v2209_v35 = vsel %vm1553_vm4, %v2174_v4, 0.0  ;;  %2072 = vst.msk [vmem:[%s4489_s30 + $0x28] sm:$0xff] %vm1553_vm4, %v1959_v34  ;;  %v2108_v32 = vsel %vm1553_vm4, %v1959_v34, 0.0  ;;  %v2175_v47 = vmul.f32 %v1959_v34, %v1959_v34 }
 0x200   : > { %v2210_v56 = vadd.f32 %v2209_v35, %v2208_v11  ;;  %v2109_v46 = vadd.f32 %v2108_v32, %v2107_v12  ;;  %v2215_v18 = vsel %vm1553_vm4, %v2177_v48, 0.0 }
 0x201   : > { %v2211_v0 = vsel %vm1553_vm4, %v2175_v47, 0.0 }
 0x202   : > { %v2111_v24 = vadd.f32 %v2110_v29, %v2109_v46  ;;  %v2212_v51 = vadd.f32 %v2211_v0, %v2210_v56 }
 0x204   : > { %v2214_v33 = vadd.f32 %v2213_v2, %v2212_v51  ;;  %v2113_v57 = vadd.f32 %v2112_v31, %v2111_v24 }
 0x206   : > { %v2216_v49 = vadd.f32 %v2215_v18, %v2214_v33 }
 0x20f   : > { %v2446_v45 = vpop.f32.mrb[8].mxu0 }
 0x210   : > { %2077 = vst.msk [vmem:[%s4489_s30 + $0x50] sm:$0xff] %vm1553_vm4, %v2446_v45  ;;  %v1972_v13 = vpop.f32.mrb[9].mxu0  ;;  %v2180_v9 = vmul.f32 %v2446_v45, %v2446_v45  ;;  %v2118_v10 = vsel %vm1553_vm4, %v2446_v45, 0.0 }
 0x211   : > { %2075 = vst.msk [vmem:[%s4489_s30 + $0x40] sm:$0xff] %vm1553_vm4, %v1972_v13  ;;  %v2114_v21 = vsel %vm1553_vm4, %v1972_v13, 0.0  ;;  %v2178_v30 = vmul.f32 %v1972_v13, %v1972_v13  ;;  %v2447_v15 = vpop.f32.mrb[10].mxu0 }
 0x212   : > { %v2115_v44 = vadd.f32 %v2114_v21, %v2113_v57  ;;  %2078 = vst.msk [vmem:[%s4489_s30 + $0x58] sm:$0xff] %vm1553_vm4, %v2447_v15  ;;  %v1975_v20 = vpop.f32.mrb[11].mxu0  ;;  %v2181_v60 = vmul.f32 %v2447_v15, %v2447_v15  ;;  %v2221_v25 = vsel %vm1553_vm4, %v2180_v9, 0.0  ;;  %v2120_v38 = vsel %vm1553_vm4, %v2447_v15, 0.0 }
 0x213   : > { %v2217_v7 = vsel %vm1553_vm4, %v2178_v30, 0.0  ;;  %2076 = vst.msk [vmem:[%s4489_s30 + $0x48] sm:$0xff] %vm1553_vm4, %v1975_v20  ;;  %v2116_v6 = vsel %vm1553_vm4, %v1975_v20, 0.0  ;;  %v2179_v1 = vmul.f32 %v1975_v20, %v1975_v20 }
 0x214   : > { %v2218_v50 = vadd.f32 %v2217_v7, %v2216_v49  ;;  %v2117_v14 = vadd.f32 %v2116_v6, %v2115_v44  ;;  %v2223_v23 = vsel %vm1553_vm4, %v2181_v60, 0.0 }
 0x215   : > { %v2219_v26 = vsel %vm1553_vm4, %v2179_v1, 0.0 }
 0x216   : > { %v2119_v42 = vadd.f32 %v2118_v10, %v2117_v14  ;;  %v2220_v19 = vadd.f32 %v2219_v26, %v2218_v50 }
 0x218   : > { %v2222_v8 = vadd.f32 %v2221_v25, %v2220_v19  ;;  %v2121_v43 = vadd.f32 %v2120_v38, %v2119_v42 }
 0x21a   : > { %v2224_v27 = vadd.f32 %v2223_v23, %v2222_v8 }
 0x226   : > { %v2450_v28 = vpop.f32.mrb[12].mxu0 }
 0x227   : > { %2081 = vst.msk [vmem:[%s4489_s30 + $0x70] sm:$0xff] %vm1553_vm4, %v2450_v28  ;;  %v1988_v5 = vpop.f32.mrb[13].mxu0  ;;  %v2184_v22 = vmul.f32 %v2450_v28, %v2450_v28  ;;  %v2126_v52 = vsel %vm1553_vm4, %v2450_v28, 0.0 }
 0x228   : > { %2079 = vst.msk [vmem:[%s4489_s30 + $0x60] sm:$0xff] %vm1553_vm4, %v1988_v5  ;;  %v2122_v41 = vsel %vm1553_vm4, %v1988_v5, 0.0  ;;  %v2182_v62 = vmul.f32 %v1988_v5, %v1988_v5  ;;  %v2451_v16 = vpop.f32.mrb[14].mxu0 }
 0x229   : > { %v2123_v63 = vadd.f32 %v2122_v41, %v2121_v43  ;;  %2082 = vst.msk [vmem:[%s4489_s30 + $0x78] sm:$0xff] %vm1553_vm4, %v2451_v16  ;;  %v1991_v37 = vpop.f32.mrb[15].mxu0  ;;  %v2185_v54 = vmul.f32 %v2451_v16, %v2451_v16  ;;  %v2229_v53 = vsel %vm1553_vm4, %v2184_v22, 0.0  ;;  %v2128_v4 = vsel %vm1553_vm4, %v2451_v16, 0.0 }
 0x22a   : > { %v2225_v17 = vsel %vm1553_vm4, %v2182_v62, 0.0  ;;  %2080 = vst.msk [vmem:[%s4489_s30 + $0x68] sm:$0xff] %vm1553_vm4, %v1991_v37  ;;  %v2124_v61 = vsel %vm1553_vm4, %v1991_v37, 0.0  ;;  %v2183_v36 = vmul.f32 %v1991_v37, %v1991_v37 }
 0x22b   : > { %v2226_v40 = vadd.f32 %v2225_v17, %v2224_v27  ;;  %v2125_v59 = vadd.f32 %v2124_v61, %v2123_v63  ;;  %v2231_v34 = vsel %vm1553_vm4, %v2185_v54, 0.0 }
 0x22c   : > { %v2227_v11 = vsel %vm1553_vm4, %v2183_v36, 0.0 }
 0x22d   : > { %v2127_v55 = vadd.f32 %v2126_v52, %v2125_v59  ;;  %v2228_v58 = vadd.f32 %v2227_v11, %v2226_v40 }
 0x22f   : > { %v2230_v39 = vadd.f32 %v2229_v53, %v2228_v58  ;;  %v2129_v12 = vadd.f32 %v2128_v4, %v2127_v55 }
 0x231   : > { %v2232_v3 = vadd.f32 %v2231_v34, %v2230_v39 }
 0x23e   : > { %v2454_v35 = vpop.f32.mrb[0].mxu1 }
 0x23f   : > { %2085 = vst.msk [vmem:[%s4489_s30 + $0x90] sm:$0xff] %vm1553_vm4, %v2454_v35  ;;  %v2004_v32 = vpop.f32.mrb[1].mxu1  ;;  %v2188_v0 = vmul.f32 %v2454_v35, %v2454_v35  ;;  %v2134_v57 = vsel %vm1553_vm4, %v2454_v35, 0.0 }
 0x240   : > { %2083 = vst.msk [vmem:[%s4489_s30 + $0x80] sm:$0xff] %vm1553_vm4, %v2004_v32  ;;  %v2130_v47 = vsel %vm1553_vm4, %v2004_v32, 0.0  ;;  %v2186_v56 = vmul.f32 %v2004_v32, %v2004_v32  ;;  %v2455_v46 = vpop.f32.mrb[2].mxu1 }
 0x241   : > { %v2131_v29 = vadd.f32 %v2130_v47, %v2129_v12  ;;  %2086 = vst.msk [vmem:[%s4489_s30 + $0x98] sm:$0xff] %vm1553_vm4, %v2455_v46  ;;  %v2007_v48 = vpop.f32.mrb[3].mxu1  ;;  %v2189_v18 = vmul.f32 %v2455_v46, %v2455_v46  ;;  %v2237_v21 = vsel %vm1553_vm4, %v2188_v0, 0.0  ;;  %v2136_v30 = vsel %vm1553_vm4, %v2455_v46, 0.0 }
 0x242   : > { %v2233_v24 = vsel %vm1553_vm4, %v2186_v56, 0.0  ;;  %2084 = vst.msk [vmem:[%s4489_s30 + $0x88] sm:$0xff] %vm1553_vm4, %v2007_v48  ;;  %v2132_v51 = vsel %vm1553_vm4, %v2007_v48, 0.0  ;;  %v2187_v2 = vmul.f32 %v2007_v48, %v2007_v48 }
 0x243   : > { %v2234_v31 = vadd.f32 %v2233_v24, %v2232_v3  ;;  %v2133_v33 = vadd.f32 %v2132_v51, %v2131_v29  ;;  %v2239_v20 = vsel %vm1553_vm4, %v2189_v18, 0.0 }
 0x244   : > { %v2235_v49 = vsel %vm1553_vm4, %v2187_v2, 0.0 }
 0x245   : > { %v2135_v45 = vadd.f32 %v2134_v57, %v2133_v33  ;;  %v2236_v13 = vadd.f32 %v2235_v49, %v2234_v31 }
 0x247   : > { %v2238_v15 = vadd.f32 %v2237_v21, %v2236_v13  ;;  %v2137_v44 = vadd.f32 %v2136_v30, %v2135_v45 }
 0x249   : > { %v2240_v9 = vadd.f32 %v2239_v20, %v2238_v15 }
 0x256   : > { %v2458_v7 = vpop.f32.mrb[4].mxu1 }
 0x257   : > { %2089 = vst.msk [vmem:[%s4489_s30 + $0xb0] sm:$0xff] %vm1553_vm4, %v2458_v7  ;;  %v2020_v6 = vpop.f32.mrb[5].mxu1  ;;  %v2192_v26 = vmul.f32 %v2458_v7, %v2458_v7  ;;  %v2142_v43 = vsel %vm1553_vm4, %v2458_v7, 0.0 }
 0x258   : > { %2087 = vst.msk [vmem:[%s4489_s30 + $0xa0] sm:$0xff] %vm1553_vm4, %v2020_v6  ;;  %v2138_v1 = vsel %vm1553_vm4, %v2020_v6, 0.0  ;;  %v2190_v50 = vmul.f32 %v2020_v6, %v2020_v6  ;;  %v2459_v14 = vpop.f32.mrb[6].mxu1 }
 0x259   : > { %v2139_v10 = vadd.f32 %v2138_v1, %v2137_v44  ;;  %2090 = vst.msk [vmem:[%s4489_s30 + $0xb8] sm:$0xff] %vm1553_vm4, %v2459_v14  ;;  %v2023_v60 = vpop.f32.mrb[7].mxu1  ;;  %v2193_v23 = vmul.f32 %v2459_v14, %v2459_v14  ;;  %v2245_v41 = vsel %vm1553_vm4, %v2192_v26, 0.0  ;;  %v2144_v62 = vsel %vm1553_vm4, %v2459_v14, 0.0 }
 0x25a   : > { %v2241_v42 = vsel %vm1553_vm4, %v2190_v50, 0.0  ;;  %2088 = vst.msk [vmem:[%s4489_s30 + $0xa8] sm:$0xff] %vm1553_vm4, %v2023_v60  ;;  %v2140_v19 = vsel %vm1553_vm4, %v2023_v60, 0.0  ;;  %v2191_v25 = vmul.f32 %v2023_v60, %v2023_v60 }
 0x25b   : > { %v2242_v38 = vadd.f32 %v2241_v42, %v2240_v9  ;;  %v2141_v8 = vadd.f32 %v2140_v19, %v2139_v10  ;;  %v2247_v37 = vsel %vm1553_vm4, %v2193_v23, 0.0 }
 0x25c   : > { %v2243_v27 = vsel %vm1553_vm4, %v2191_v25, 0.0 }
 0x25d   : > { %v2143_v28 = vadd.f32 %v2142_v43, %v2141_v8  ;;  %v2244_v5 = vadd.f32 %v2243_v27, %v2242_v38 }
 0x25f   : > { %v2246_v16 = vadd.f32 %v2245_v41, %v2244_v5  ;;  %v2145_v63 = vadd.f32 %v2144_v62, %v2143_v28 }
 0x261   : > { %v2248_v22 = vadd.f32 %v2247_v37, %v2246_v16 }
 0x26e   : > { %v2462_v17 = vpop.f32.mrb[8].mxu1 }
 0x26f   : > { %2093 = vst.msk [vmem:[%s4489_s30 + $0xd0] sm:$0xff] %vm1553_vm4, %v2462_v17  ;;  %v2036_v61 = vpop.f32.mrb[9].mxu1  ;;  %v2196_v11 = vmul.f32 %v2462_v17, %v2462_v17  ;;  %v2150_v12 = vsel %vm1553_vm4, %v2462_v17, 0.0 }
 0x270   : > { %2091 = vst.msk [vmem:[%s4489_s30 + $0xc0] sm:$0xff] %vm1553_vm4, %v2036_v61  ;;  %v2146_v36 = vsel %vm1553_vm4, %v2036_v61, 0.0  ;;  %v2194_v40 = vmul.f32 %v2036_v61, %v2036_v61  ;;  %v2463_v59 = vpop.f32.mrb[10].mxu1 }
 0x271   : > { %v2147_v52 = vadd.f32 %v2146_v36, %v2145_v63  ;;  %2094 = vst.msk [vmem:[%s4489_s30 + $0xd8] sm:$0xff] %vm1553_vm4, %v2463_v59  ;;  %v2039_v54 = vpop.f32.mrb[11].mxu1  ;;  %v2197_v34 = vmul.f32 %v2463_v59, %v2463_v59  ;;  %v2253_v47 = vsel %vm1553_vm4, %v2196_v11, 0.0  ;;  %v2152_v56 = vsel %vm1553_vm4, %v2463_v59, 0.0 }
 0x272   : > { %v2249_v55 = vsel %vm1553_vm4, %v2194_v40, 0.0  ;;  %2092 = vst.msk [vmem:[%s4489_s30 + $0xc8] sm:$0xff] %vm1553_vm4, %v2039_v54  ;;  %v2148_v58 = vsel %vm1553_vm4, %v2039_v54, 0.0  ;;  %v2195_v53 = vmul.f32 %v2039_v54, %v2039_v54 }
 0x273   : > { %v2250_v4 = vadd.f32 %v2249_v55, %v2248_v22  ;;  %v2149_v39 = vadd.f32 %v2148_v58, %v2147_v52  ;;  %v2255_v48 = vsel %vm1553_vm4, %v2197_v34, 0.0 }
 0x274   : > { %v2251_v3 = vsel %vm1553_vm4, %v2195_v53, 0.0 }
 0x275   : > { %v2151_v35 = vadd.f32 %v2150_v12, %v2149_v39  ;;  %v2252_v32 = vadd.f32 %v2251_v3, %v2250_v4 }
 0x277   : > { %v2254_v46 = vadd.f32 %v2253_v47, %v2252_v32  ;;  %v2153_v29 = vadd.f32 %v2152_v56, %v2151_v35 }
 0x279   : > { %v2256_v0 = vadd.f32 %v2255_v48, %v2254_v46 }
 0x286   : > { %v2466_v24 = vpop.f32.mrb[12].mxu1 }
 0x287   : > { %2097 = vst.msk [vmem:[%s4489_s30 + $0xf0] sm:$0xff] %vm1553_vm4, %v2466_v24  ;;  %v2052_v51 = vpop.f32.mrb[13].mxu1  ;;  %v2200_v49 = vmul.f32 %v2466_v24, %v2466_v24  ;;  %v2158_v44 = vsel %vm1553_vm4, %v2466_v24, 0.0 }
 0x288   : > { %2095 = vst.msk [vmem:[%s4489_s30 + $0xe0] sm:$0xff] %vm1553_vm4, %v2052_v51  ;;  %v2154_v2 = vsel %vm1553_vm4, %v2052_v51, 0.0  ;;  %v2198_v31 = vmul.f32 %v2052_v51, %v2052_v51  ;;  %v2467_v33 = vpop.f32.mrb[14].mxu1 }
 0x289   : > { %v2155_v57 = vadd.f32 %v2154_v2, %v2153_v29  ;;  %2098 = vst.msk [vmem:[%s4489_s30 + $0xf8] sm:$0xff] %vm1553_vm4, %v2467_v33  ;;  %v2055_v18 = vpop.f32.mrb[15].mxu1  ;;  %v2201_v20 = vmul.f32 %v2467_v33, %v2467_v33  ;;  %v2261_v1 = vsel %vm1553_vm4, %v2200_v49, 0.0  ;;  %v2160_v50 = vsel %vm1553_vm4, %v2467_v33, 0.0 }
 0x28a   : > { %v2257_v45 = vsel %vm1553_vm4, %v2198_v31, 0.0  ;;  %2096 = vst.msk [vmem:[%s4489_s30 + $0xe8] sm:$0xff] %vm1553_vm4, %v2055_v18  ;;  %v2156_v13 = vsel %vm1553_vm4, %v2055_v18, 0.0  ;;  %v2199_v21 = vmul.f32 %v2055_v18, %v2055_v18 }
 0x28b   : > { %v2258_v30 = vadd.f32 %v2257_v45, %v2256_v0  ;;  %v2157_v15 = vadd.f32 %v2156_v13, %v2155_v57  ;;  %v2263_v60 = vsel %vm1553_vm4, %v2201_v20, 0.0 }
 0x28c   : > { %v2259_v9 = vsel %vm1553_vm4, %v2199_v21, 0.0 }
 0x28d   : > { %v2159_v7 = vadd.f32 %v2158_v44, %v2157_v15  ;;  %v2260_v6 = vadd.f32 %v2259_v9, %v2258_v30 }
 0x28f   : > { %v2161_v14 = vadd.f32 %v2160_v50, %v2159_v7  ;;  %v2262_v10 = vadd.f32 %v2261_v1, %v2260_v6 }
 0x291   : > { %v2162_v26 = vrot.slane %v2161_v14, 4  ;;  %v2264_v42 = vadd.f32 %v2263_v60, %v2262_v10 }
 0x293   : > { %v2163_v19 = vadd.f32 %v2162_v26, %v2161_v14  ;;  %v2265_v25 = vrot.slane %v2264_v42, 4 }
 0x295   : > { %v2164_v38 = vrot.slane %v2163_v19, 2  ;;  %v2266_v8 = vadd.f32 %v2265_v25, %v2264_v42 }
 0x297   : > { %v2165_v43 = vadd.f32 %v2164_v38, %v2163_v19  ;;  %v2267_v23 = vrot.slane %v2266_v8, 2 }
 0x299   : > { %v2166_v27 = vrot.slane %v2165_v43, 1  ;;  %v2268_v28 = vadd.f32 %v2267_v23, %v2266_v8 }
 0x29b   : > { %v2167_v5 = vadd.f32 %v2166_v27, %v2165_v43  ;;  %v2269_v41 = vrot.slane %v2268_v28, 1 }
 0x29d   : > { %2169 = vst.msk [vmem:[%s265_s8] sm:$0x1] %vm2168_vm13, %v2167_v5  ;;  %v2270_v62 = vadd.f32 %v2269_v41, %v2268_v28 }
 0x29f   : > { %2271 = vst.msk [vmem:[%s268_s11] sm:$0x1] %vm2168_vm13, %v2270_v62 }
 0x2a0 PF: > { %s17_s21 = sadd.s32 1, %s3144_s21  }
 0x2a1   : > { %p14_p4 = scmp.ge.s32.totalorder %s17_s21, 4  }
 0x2a3   :  { %16 = sbr.rel (!%p14_p4) target bundleno = 1 (0x1), region = 90 }

// kernel: basic_block_nhwc.3
= control target key start
LH: loop header
LB: loop body
LE: loop exit
PB: predicated region body
PF: predicated region fallthrough
CT: control target
= control target key end

     0   :  { %s3012_s15 = smov 0   ;;  %s4371_s0 = inlined_call_operand.vmem [shape: f32[2,16,16,4], index: 0, kind: input, shape index: {}]   ;;  %s4372_s1 = inlined_call_operand.vmem [shape: bf16[36,4], index: 1, kind: input, shape index: {}]   ;;  %s4373_s2 = inlined_call_operand.vmem [shape: f32[2,16,16,4], index: 2, kind: output, shape index: {0}]   ;;  %s4374_s3 = inlined_call_operand.vmem [shape: f32[2,1,4], index: 3, kind: output, shape index: {1}]   ;;  %s4375_s4 = inlined_call_operand.vmem [shape: f32[2,1,4], index: 4, kind: output, shape index: {2}]  }
   0x1 LB: > { %s2213_s16 = sadd.s32 4294967295, %s2976_s15   ;;  %p2217_p0 = scmp.ge.s32.totalorder %s2976_s15, 1  ;;  %s2976_s15 = sphi %s3012_s15, %s15_s15  }
   0x2   : > { %p167_p1 = scmp.lt.s32.totalorder %s2976_s15, 3 }
   0x4   : > { %p168_p2 = pnand %p2217_p0, %p167_p1 }
   0x6   : > { %171 = sbr.rel (%p168_p2) target bundleno = 647 (0x287), region = 28 }
   0xd   : > { %vm281_vm0 = vcmask 1040384   ;;  %p199_p3 = scmp.lt.s32.totalorder %s2213_s16, 1  ;;  %v2978_v0 = vmov 0.0   ;;  %vm447_vm1 = vcmask 1046528   ;;  %vm624_vm2 = vcmask 1045504   ;;  %s2979_s21 = smov 4  }
   0xe   : > { %v3020_v1 = vrot.slane %v2978_v0, 7  ;;  %s2980_s22 = smov 8   ;;  %s2981_s23 = smov 12   ;;  %vm1738_vm3 = vcmask 1041408   ;;  %vm1389_vm4 = vcmask 31744   ;;  %vm1422_vm5 = vcmask 64512  }
   0xf   : > { %s4548_s16 = smov (!%p199_p3, %s2213_s16), 1  ;;  %s2982_s26 = smov 16   ;;  %vm1455_vm6 = vcmask 97280   ;;  %vm1488_vm7 = vcmask 130048   ;;  %vm1521_vm8 = vcmask 162816   ;;  %vm1554_vm9 = vcmask 195584  }
  0x10   : > { %4439 = vst [vmem:[#allocation2_spill] sm:$0xff] %v3020_v1  ;;  %v3026_v2 = vsel %vm281_vm0, 0.0, %v3020_v1  ;;  %v398_v3 = vsel %vm281_vm0, %v3020_v1, 0.0  ;;  %v449_v4 = vrot.slane %v3020_v1, 1  ;;  %v626_v5 = vrot.slane %v3020_v1, 2  ;;  %s2243_s17 = sshll.u32 %s4548_s16, 8  ;;  %s211_s14 = scalar_lea.vmem %s4374_s3, %s4548_s16 }
  0x11   : > { %4440 = vst [vmem:[#allocation3_spill] sm:$0xff] %v3026_v2  ;;  %v448_v6 = vrot.slane %v3026_v2, 1  ;;  %v451_v7 = vrot.slane %v398_v3, 1  ;;  %v628_v8 = vrot.slane %v398_v3, 2  ;;  %v625_v9 = vrot.slane %v3026_v2, 2  ;;  %s3040_s20 = scalar_lea.vmem %s4371_s0, %s2243_s17  ;;  %s2983_s29 = smov 20  }
  0x12   : > { %v218_v12 = vld [vmem:[%s3040_s20 + $0x10] sm:$0xff]  ;;  %v219_v13 = vld [vmem:[%s3040_s20 + $0x18] sm:$0xff]  ;;  %v216_v14 = vld [vmem:[%s3040_s20] sm:$0xff]  ;;  %s2984_s6 = smov 24   ;;  %s2985_s7 = smov 28   ;;  %vm1587_vm10 = vcmask 228352  }
  0x13   : > { %v450_v10 = vsel %vm447_vm1, %v448_v6, %v449_v4  ;;  %v452_v11 = vsel %vm447_vm1, %v449_v4, %v451_v7  ;;  %v3048_v15 = vsel %vm624_vm2, %v625_v9, %v626_v5  ;;  %v3051_v16 = vsel %vm624_vm2, %v626_v5, %v628_v8  ;;  %v217_v20 = vld [vmem:[%s3040_s20 + $0x8] sm:$0xff]  ;;  %v220_v21 = vld [vmem:[%s3040_s20 + $0x20] sm:$0xff]  ;;  %v222_v27 = vld [vmem:[%s3040_s20 + $0x30] sm:$0xff]  ;;  %s2986_s8 = smov 32   ;;  %s4230_s11 = scalar_lea.vmem %s4373_s2, %s2243_s17 }
  0x14   : > { %v3053_v17 = vpack.i.bf16 %v452_v11, %v450_v10  ;;  %v287_v18 = vrot.slane %v218_v12, 7  ;;  %v288_v19 = vrot.slane %v219_v13, 7  ;;  %v221_v22 = vld [vmem:[%s3040_s20 + $0x28] sm:$0xff]  ;;  %v284_v23 = vrot.slane %v216_v14, 7  ;;  %v223_v44 = vld [vmem:[%s3040_s20 + $0x38] sm:$0xff]  ;;  %v224_v45 = vld [vmem:[%s3040_s20 + $0x40] sm:$0xff]  ;;  %s214_s19 = scalar_lea.vmem %s4375_s4, %s4548_s16 }
  0x15   : > { %v285_v24 = vrot.slane %v217_v20, 7  ;;  %v290_v25 = vrot.slane %v220_v21, 7  ;;  %v291_v26 = vrot.slane %v221_v22, 7  ;;  %v293_v31 = vrot.slane %v222_v27, 7  ;;  %v225_v54 = vld [vmem:[%s3040_s20 + $0x48] sm:$0xff]  ;;  %v226_v59 = vld [vmem:[%s3040_s20 + $0x50] sm:$0xff] }
  0x16   : > { %4441 = vst [vmem:[#allocation4_spill] sm:$0xff] %v3053_v17  ;;  %2328 = vrot.lane.b32.xlu0 %v3053_v17, %s2979_s21  ;;  %v3062_v28 = vsel %vm281_vm0, %v287_v18, %v288_v19  ;;  %v3065_v29 = vsel %vm281_vm0, 0.0, %v287_v18  ;;  %v3068_v30 = vsel %vm281_vm0, %v288_v19, 0.0  ;;  %v3078_v37 = vsel %vm281_vm0, 0.0, %v284_v23  ;;  %v227_v0 = vld [vmem:[%s3040_s20 + $0x58] sm:$0xff]  ;;  %v228_v22 = vld [vmem:[%s3040_s20 + $0x60] sm:$0xff] }
  0x17   : > { %v458_v32 = vrot.slane %v3065_v29, 1  ;;  %v459_v33 = vrot.slane %v3062_v28, 1  ;;  %v461_v34 = vrot.slane %v3068_v30, 1  ;;  %v3075_v36 = vsel %vm281_vm0, %v284_v23, %v285_v24  ;;  %v229_v23 = vld [vmem:[%s3040_s20 + $0x68] sm:$0xff] }
  0x18   : > { %v3081_v38 = vsel %vm281_vm0, %v285_v24, 0.0  ;;  %v3084_v39 = vsel %vm281_vm0, %v290_v25, %v291_v26  ;;  %v453_v42 = vrot.slane %v3078_v37, 1  ;;  %v454_v43 = vrot.slane %v3075_v36, 1 }
  0x19   : > { %v460_v40 = vsel %vm447_vm1, %v458_v32, %v459_v33  ;;  %v462_v41 = vsel %vm447_vm1, %v459_v33, %v461_v34  ;;  %v456_v47 = vrot.slane %v3081_v38, 1  ;;  %v3096_v48 = vsel %vm281_vm0, 0.0, %v290_v25  ;;  %v231_v32 = vld [vmem:[%s3040_s20 + $0x78] sm:$0xff]  ;;  %v232_v33 = vld [vmem:[%s3040_s20 + $0x80] sm:$0xff] }
  0x1a   : > { %v3092_v46 = vpack.i.bf16 %v462_v41, %v460_v40  ;;  %v3099_v49 = vsel %vm281_vm0, %v291_v26, 0.0  ;;  %v455_v50 = vsel %vm447_vm1, %v453_v42, %v454_v43  ;;  %v463_v51 = vrot.slane %v3096_v48, 1 }
  0x1b   : > { %v464_v52 = vrot.slane %v3084_v39, 1  ;;  %v466_v53 = vrot.slane %v3099_v49, 1  ;;  %v457_v55 = vsel %vm447_vm1, %v454_v43, %v456_v47  ;;  %v294_v56 = vrot.slane %v223_v44, 7 }
  0x1c   : > { %4442 = vst [vmem:[#allocation5_spill] sm:$0xff] %v3092_v46  ;;  %2338 = vrot.lane.b32.xlu1 %v3092_v46, %s2979_s21  ;;  %v3110_v57 = vsel %vm281_vm0, 0.0, %v293_v31  ;;  %v296_v58 = vrot.slane %v224_v45, 7  ;;  %v3113_v60 = vpack.i.bf16 %v457_v55, %v455_v50  ;;  %v297_v6 = vrot.slane %v225_v54, 7 }
  0x1d   : > { %v465_v61 = vsel %vm447_vm1, %v463_v51, %v464_v52  ;;  %v467_v62 = vsel %vm447_vm1, %v464_v52, %v466_v53  ;;  %v468_v63 = vrot.slane %v3110_v57, 1  ;;  %v3122_v4 = vsel %vm281_vm0, %v293_v31, %v294_v56  ;;  %v230_v31 = vld [vmem:[%s3040_s20 + $0x70] sm:$0xff]  ;;  %v233_v53 = vld [vmem:[%s3040_s20 + $0x88] sm:$0xff] }
  0x1e   : > { %v3119_v3 = vpack.i.bf16 %v467_v62, %v465_v61  ;;  %v3125_v5 = vsel %vm281_vm0, %v294_v56, 0.0  ;;  %2333 = vrot.lane.b32.xlu0 %v3113_v60, %s2979_s21  ;;  %v469_v7 = vrot.slane %v3122_v4, 1  ;;  %v3132_v9 = vsel %vm281_vm0, 0.0, %v296_v58 }
  0x1f   : > { %v471_v8 = vrot.slane %v3125_v5, 1  ;;  %v299_v10 = vrot.slane %v226_v59, 7  ;;  %v3137_v11 = vsel %vm281_vm0, %v296_v58, %v297_v6  ;;  %v3140_v12 = vsel %vm281_vm0, %v297_v6, 0.0 }
  0x20   : > { %4443 = vst [vmem:[#allocation6_spill] sm:$0xff] %v3119_v3  ;;  %2343 = vrot.lane.b32.xlu1 %v3119_v3, %s2979_s21  ;;  %v473_v13 = vrot.slane %v3132_v9, 1  ;;  %v300_v14 = vrot.slane %v227_v0, 7  ;;  %v470_v18 = vsel %vm447_vm1, %v468_v63, %v469_v7  ;;  %v474_v20 = vrot.slane %v3137_v11, 1 }
  0x21   : > { %v472_v19 = vsel %vm447_vm1, %v469_v7, %v471_v8  ;;  %v476_v21 = vrot.slane %v3140_v12, 1  ;;  %v3155_v26 = vsel %vm281_vm0, 0.0, %v299_v10  ;;  %v302_v45 = vrot.slane %v228_v22, 7 }
  0x22   : > { %v3149_v24 = vpack.i.bf16 %v472_v19, %v470_v18  ;;  %v3152_v25 = vsel %vm281_vm0, %v299_v10, %v300_v14  ;;  %4446 = vst [vmem:[#allocation9_spill] sm:$0xff] %v3155_v26  ;;  %v3158_v27 = vsel %vm281_vm0, %v300_v14, 0.0  ;;  %v475_v34 = vsel %vm447_vm1, %v473_v13, %v474_v20 }
  0x23   : > { %4445 = vst [vmem:[#allocation8_spill] sm:$0xff] %v3152_v25  ;;  %v477_v40 = vsel %vm447_vm1, %v474_v20, %v476_v21  ;;  %v478_v41 = vrot.slane %v3155_v26, 1  ;;  %v479_v42 = vrot.slane %v3152_v25, 1  ;;  %v481_v44 = vrot.slane %v3158_v27, 1  ;;  %v234_v20 = vld [vmem:[%s3040_s20 + $0x90] sm:$0xff]  ;;  %v235_v21 = vld [vmem:[%s3040_s20 + $0x98] sm:$0xff] }
  0x24   : > { %4444 = vst [vmem:[#allocation7_spill] sm:$0xff] %v3149_v24  ;;  %2348 = vrot.lane.b32.xlu0 %v3149_v24, %s2979_s21  ;;  %v3169_v43 = vpack.i.bf16 %v477_v40, %v475_v34  ;;  %v303_v47 = vrot.slane %v229_v23, 7  ;;  %v305_v51 = vrot.slane %v230_v31, 7  ;;  %v306_v52 = vrot.slane %v231_v32, 7  ;;  %v237_v34 = vld [vmem:[%s3040_s20 + $0xa8] sm:$0xff] }
  0x25   : > { %v480_v50 = vsel %vm447_vm1, %v478_v41, %v479_v42  ;;  %v308_v54 = vrot.slane %v232_v33, 7  ;;  %v482_v55 = vsel %vm447_vm1, %v479_v42, %v481_v44  ;;  %v3181_v58 = vsel %vm281_vm0, 0.0, %v302_v45  ;;  %v236_v33 = vld [vmem:[%s3040_s20 + $0xa0] sm:$0xff] }
  0x26   : > { %4447 = vst [vmem:[#allocation10_spill] sm:$0xff] %v3169_v43  ;;  %2353 = vrot.lane.b32.xlu1 %v3169_v43, %s2979_s21  ;;  %v3178_v56 = vsel %vm281_vm0, %v302_v45, %v303_v47  ;;  %4449 = vst [vmem:[#allocation12_spill] sm:$0xff] %v3181_v58  ;;  %v3184_v59 = vsel %vm281_vm0, %v303_v47, 0.0  ;;  %v3186_v61 = vpack.i.bf16 %v482_v55, %v480_v50  ;;  %v483_v62 = vrot.slane %v3181_v58, 1 }
  0x27   : > { %4448 = vst [vmem:[#allocation11_spill] sm:$0xff] %v3178_v56  ;;  %v484_v63 = vrot.slane %v3178_v56, 1  ;;  %v486_v0 = vrot.slane %v3184_v59, 1  ;;  %v3192_v6 = vsel %vm281_vm0, %v305_v51, %v306_v52  ;;  %v3195_v7 = vsel %vm281_vm0, 0.0, %v305_v51 }
  0x28   : > { %4450 = vst [vmem:[#allocation13_spill] sm:$0xff] %v3186_v61  ;;  %4451 = vst [vmem:[#allocation14_spill] sm:$0xff] %v3192_v6  ;;  %v3198_v8 = vsel %vm281_vm0, %v306_v52, 0.0  ;;  %v309_v10 = vrot.slane %v233_v53, 7  ;;  %2358 = vrot.lane.b32.xlu0 %v3186_v61, %s2979_s21  ;;  %v488_v18 = vrot.slane %v3195_v7, 1  ;;  %v489_v19 = vrot.slane %v3192_v6, 1 }
  0x29   : > { %4452 = vst [vmem:[#allocation15_spill] sm:$0xff] %v3195_v7  ;;  %v485_v13 = vsel %vm447_vm1, %v483_v62, %v484_v63  ;;  %v487_v14 = vsel %vm447_vm1, %v484_v63, %v486_v0  ;;  %v491_v23 = vrot.slane %v3198_v8, 1  ;;  %v3215_v32 = vsel %vm281_vm0, 0.0, %v308_v54  ;;  %v238_v62 = vld [vmem:[%s3040_s20 + $0xb0] sm:$0xff] }
  0x2a   : > { %v3208_v22 = vpack.i.bf16 %v487_v14, %v485_v13  ;;  %v3212_v31 = vsel %vm281_vm0, %v308_v54, %v309_v10  ;;  %4455 = vst [vmem:[#allocation18_spill] sm:$0xff] %v3215_v32  ;;  %v490_v40 = vsel %vm447_vm1, %v488_v18, %v489_v19  ;;  %v3221_v41 = vsel %vm281_vm0, %v309_v10, 0.0 }
  0x2b   : > { %4454 = vst [vmem:[#allocation17_spill] sm:$0xff] %v3212_v31  ;;  %v493_v42 = vrot.slane %v3215_v32, 1  ;;  %v494_v44 = vrot.slane %v3212_v31, 1  ;;  %v492_v45 = vsel %vm447_vm1, %v489_v19, %v491_v23  ;;  %v496_v47 = vrot.slane %v3221_v41, 1 }
  0x2c   : > { %4453 = vst [vmem:[#allocation16_spill] sm:$0xff] %v3208_v22  ;;  %2363 = vrot.lane.b32.xlu1 %v3208_v22, %s2979_s21  ;;  %v311_v50 = vrot.slane %v234_v20, 7  ;;  %v312_v51 = vrot.slane %v235_v21, 7  ;;  %v3229_v52 = vpack.i.bf16 %v492_v45, %v490_v40  ;;  %v314_v54 = vrot.slane %v236_v33, 7  ;;  %v239_v21 = vld [vmem:[%s3040_s20 + $0xb8] sm:$0xff] }
  0x2d   : > { %v495_v53 = vsel %vm447_vm1, %v493_v42, %v494_v44  ;;  %v315_v55 = vrot.slane %v237_v34, 7  ;;  %v497_v63 = vsel %vm447_vm1, %v494_v44, %v496_v47  ;;  %v317_v40 = vrot.slane %v238_v62, 7  ;;  %v240_v42 = vld [vmem:[%s3040_s20 + $0xc0] sm:$0xff]  ;;  %v241_v44 = vld [vmem:[%s3040_s20 + $0xc8] sm:$0xff] }
  0x2e   : > { %4456 = vst [vmem:[#allocation19_spill] sm:$0xff] %v3229_v52  ;;  %v3235_v0 = vsel %vm281_vm0, %v311_v50, %v312_v51  ;;  %v3238_v10 = vsel %vm281_vm0, 0.0, %v311_v50  ;;  %v3241_v13 = vsel %vm281_vm0, %v312_v51, 0.0  ;;  %2368 = vrot.lane.b32.xlu0 %v3229_v52, %s2979_s21  ;;  %v3245_v14 = vpack.i.bf16 %v497_v63, %v495_v53  ;;  %v242_v53 = vld [vmem:[%s3040_s20 + $0xd0] sm:$0xff] }
  0x2f   : > { %4457 = vst [vmem:[#allocation20_spill] sm:$0xff] %v3235_v0  ;;  %4458 = vst [vmem:[#allocation21_spill] sm:$0xff] %v3238_v10  ;;  %v498_v18 = vrot.slane %v3238_v10, 1  ;;  %v499_v19 = vrot.slane %v3235_v0, 1  ;;  %v501_v20 = vrot.slane %v3241_v13, 1  ;;  %v3252_v23 = vsel %vm281_vm0, %v314_v54, %v315_v55 }
  0x30   : > { %4459 = vst [vmem:[#allocation22_spill] sm:$0xff] %v3245_v14  ;;  %4460 = vst [vmem:[#allocation23_spill] sm:$0xff] %v3252_v23  ;;  %v3255_v33 = vsel %vm281_vm0, 0.0, %v314_v54  ;;  %v3258_v34 = vsel %vm281_vm0, %v315_v55, 0.0  ;;  %2373 = vrot.lane.b32.xlu1 %v3245_v14, %s2979_s21  ;;  %v504_v51 = vrot.slane %v3252_v23, 1  ;;  %v318_v62 = vrot.slane %v239_v21, 7 }
  0x31   : > { %4461 = vst [vmem:[#allocation24_spill] sm:$0xff] %v3255_v33  ;;  %v500_v45 = vsel %vm447_vm1, %v498_v18, %v499_v19  ;;  %v502_v47 = vsel %vm447_vm1, %v499_v19, %v501_v20  ;;  %v503_v50 = vrot.slane %v3255_v33, 1  ;;  %v506_v55 = vrot.slane %v3258_v34, 1  ;;  %v243_v19 = vld [vmem:[%s3040_s20 + $0xd8] sm:$0xff]  ;;  %v244_v14 = vld [vmem:[%s3040_s20 + $0xe0] sm:$0xff] }
  0x32   : > { %v3269_v54 = vpack.i.bf16 %v502_v47, %v500_v45  ;;  %v3273_v63 = vsel %vm281_vm0, 0.0, %v317_v40  ;;  %v320_v18 = vrot.slane %v240_v42, 7  ;;  %v321_v2 = vrot.slane %v241_v44, 7 }
  0x33   : > { %4463 = vst [vmem:[#allocation26_spill] sm:$0xff] %v3273_v63  ;;  %v505_v35 = vsel %vm447_vm1, %v503_v50, %v504_v51  ;;  %v508_v17 = vrot.slane %v3273_v63, 1  ;;  %v507_v20 = vsel %vm447_vm1, %v504_v51, %v506_v55  ;;  %v3282_v45 = vsel %vm281_vm0, %v317_v40, %v318_v62 }
  0x34   : > { %4462 = vst [vmem:[#allocation25_spill] sm:$0xff] %v3269_v54  ;;  %2378 = vrot.lane.b32.xlu0 %v3269_v54, %s2979_s21  ;;  %4464 = vst [vmem:[#allocation27_spill] sm:$0xff] %v3282_v45  ;;  %v3285_v21 = vsel %vm281_vm0, %v318_v62, 0.0  ;;  %v323_v47 = vrot.slane %v242_v53, 7  ;;  %v3287_v50 = vpack.i.bf16 %v507_v20, %v505_v35  ;;  %v509_v42 = vrot.slane %v3282_v45, 1 }
  0x35   : > { %v511_v44 = vrot.slane %v3285_v21, 1  ;;  %v3292_v1 = vsel %vm281_vm0, %v320_v18, %v321_v2  ;;  %v3295_v51 = vsel %vm281_vm0, 0.0, %v320_v18  ;;  %v3298_v40 = vsel %vm281_vm0, %v321_v2, 0.0  ;;  %v245_v18 = vld [vmem:[%s3040_s20 + $0xe8] sm:$0xff] }
  0x36   : > { %4465 = vst [vmem:[#allocation28_spill] sm:$0xff] %v3287_v50  ;;  %4466 = vst [vmem:[#allocation29_spill] sm:$0xff] %v3292_v1  ;;  %v514_v55 = vrot.slane %v3292_v1, 1  ;;  %v324_v62 = vrot.slane %v243_v19, 7  ;;  %2383 = vrot.lane.b32.xlu1 %v3287_v50, %s2979_s21  ;;  %v510_v35 = vsel %vm447_vm1, %v508_v17, %v509_v42  ;;  %v513_v20 = vrot.slane %v3295_v51, 1 }
  0x37   : > { %4467 = vst [vmem:[#allocation30_spill] sm:$0xff] %v3295_v51  ;;  %v512_v53 = vsel %vm447_vm1, %v509_v42, %v511_v44  ;;  %v516_v54 = vrot.slane %v3298_v40, 1  ;;  %v3315_v19 = vsel %vm281_vm0, 0.0, %v323_v47  ;;  %v327_v61 = vrot.slane %v245_v18, 7 }
  0x38   : > { %v3309_v52 = vpack.i.bf16 %v512_v53, %v510_v35  ;;  %v3312_v2 = vsel %vm281_vm0, %v323_v47, %v324_v62  ;;  %v3318_v50 = vsel %vm281_vm0, %v324_v62, 0.0  ;;  %v515_v17 = vsel %vm447_vm1, %v513_v20, %v514_v55 }
  0x39   : > { %v517_v42 = vsel %vm447_vm1, %v514_v55, %v516_v54  ;;  %v518_v44 = vrot.slane %v3315_v19, 1  ;;  %v519_v22 = vrot.slane %v3312_v2, 1  ;;  %v521_v53 = vrot.slane %v3318_v50, 1 }
  0x3a   : > { %4468 = vst [vmem:[#allocation31_spill] sm:$0xff] %v3309_v52  ;;  %2388 = vrot.lane.b32.xlu0 %v3309_v52, %s2979_s21  ;;  %v3326_v35 = vpack.i.bf16 %v517_v42, %v515_v17  ;;  %v326_v47 = vrot.slane %v244_v14, 7  ;;  %v3332_v20 = vpack.i.bf16 %v3051_v16, %v3048_v15  ;;  %v630_v54 = vrot.slane %v3078_v37, 2 }
  0x3b   : > { %v520_v62 = vsel %vm447_vm1, %v518_v44, %v519_v22  ;;  %v522_v55 = vsel %vm447_vm1, %v519_v22, %v521_v53  ;;  %v3345_v14 = vsel %vm281_vm0, %v327_v61, 0.0  ;;  %v633_v22 = vrot.slane %v3081_v38, 2 }
  0x3c   : > { %4469 = vst [vmem:[#allocation32_spill] sm:$0xff] %v3326_v35  ;;  %4470 = vst [vmem:[#allocation33_spill] sm:$0xff] %v3332_v20  ;;  %2393 = vrot.lane.b32.xlu1 %v3326_v35, %s2979_s21  ;;  %v3339_v17 = vsel %vm281_vm0, %v326_v47, %v327_v61  ;;  %v3342_v42 = vsel %vm281_vm0, 0.0, %v326_v47  ;;  %v3347_v18 = vpack.i.bf16 %v522_v55, %v520_v62  ;;  %v526_v44 = vrot.slane %v3345_v14, 1 }
  0x3d   : > { %v523_v15 = vrot.slane %v3342_v42, 1  ;;  %v524_v16 = vrot.slane %v3339_v17, 1  ;;  %v631_v35 = vrot.slane %v3075_v36, 2  ;;  %v635_v53 = vrot.slane %v3065_v29, 2 }
  0x3e   : > { %4471 = vst [vmem:[#allocation34_spill] sm:$0xff] %v3347_v18  ;;  %v636_v47 = vrot.slane %v3062_v28, 2  ;;  %2398 = vrot.lane.b32.xlu0 %v3347_v18, %s2979_s21  ;;  %v640_v55 = vrot.slane %v3096_v48, 2  ;;  %v641_v52 = vrot.slane %v3084_v39, 2  ;;  %v4472_v18 = vrot.slane %v3068_v30, 2 }
  0x3f   : > { %v525_v61 = vsel %vm447_vm1, %v523_v15, %v524_v16  ;;  %v527_v62 = vsel %vm447_vm1, %v524_v16, %v526_v44  ;;  %v632_v24 = vsel %vm624_vm2, %v630_v54, %v631_v35  ;;  %v634_v38 = vsel %vm624_vm2, %v631_v35, %v633_v22 }
  0x40   : > { %v3362_v43 = vpack.i.bf16 %v527_v62, %v525_v61  ;;  %v637_v3 = vsel %vm624_vm2, %v635_v53, %v636_v47  ;;  %v3367_v46 = vpack.i.bf16 %v634_v38, %v632_v24  ;;  %v639_v15 = vsel %vm624_vm2, %v636_v47, %v4472_v18 }
  0x41   : > { %v642_v16 = vsel %vm624_vm2, %v640_v55, %v641_v52  ;;  %v643_v44 = vrot.slane %v3099_v49, 2  ;;  %v3376_v61 = vpack.i.bf16 %v639_v15, %v637_v3  ;;  %v645_v54 = vrot.slane %v3110_v57, 2 }
  0x42   : > { %2403 = vrot.lane.b32.xlu1 %v3362_v43, %s2979_s21  ;;  %v646_v35 = vrot.slane %v3122_v4, 2  ;;  %v648_v24 = vrot.slane %v3125_v5, 2  ;;  %2408 = vrot.lane.b32.xlu0 %v3332_v20, %s2980_s22  ;;  %v650_v18 = vrot.slane %v3132_v9, 2  ;;  %v651_v49 = vrot.slane %v3137_v11, 2 }
  0x43   : > { %v644_v30 = vsel %vm624_vm2, %v641_v52, %v643_v44  ;;  %v653_v22 = vrot.slane %v3140_v12, 2  ;;  %v655_v47 = vrot.slane %v3155_v26, 2  ;;  %v656_v55 = vrot.slane %v3152_v25, 2 }
  0x44   : > { %v647_v3 = vsel %vm624_vm2, %v645_v54, %v646_v35  ;;  %v649_v53 = vsel %vm624_vm2, %v646_v35, %v648_v24  ;;  %v3390_v62 = vpack.i.bf16 %v644_v30, %v642_v16  ;;  %v652_v5 = vsel %vm624_vm2, %v650_v18, %v651_v49 }
  0x45   : > { %v654_v52 = vsel %vm624_vm2, %v651_v49, %v653_v22  ;;  %v658_v38 = vrot.slane %v3158_v27, 2  ;;  %v660_v12 = vrot.slane %v3181_v58, 2  ;;  %v661_v15 = vrot.slane %v3178_v56, 2 }
  0x46   : > { %2413 = vrot.lane.b32.xlu1 %v3367_v46, %s2980_s22  ;;  %2418 = vrot.lane.b32.xlu0 %v3376_v61, %s2980_s22  ;;  %v3402_v16 = vpack.i.bf16 %v649_v53, %v647_v3  ;;  %v657_v44 = vsel %vm624_vm2, %v655_v47, %v656_v55  ;;  %v663_v54 = vrot.slane %v3184_v59, 2  ;;  %v665_v24 = vrot.slane %v3195_v7, 2 }
  0x47   : > { %v659_v35 = vsel %vm624_vm2, %v656_v55, %v658_v38  ;;  %v666_v30 = vrot.slane %v3192_v6, 2  ;;  %v668_v27 = vrot.slane %v3198_v8, 2  ;;  %v3410_v18 = vpack.i.bf16 %v654_v52, %v652_v5 }
  0x48   : > { %v3414_v49 = vpack.i.bf16 %v659_v35, %v657_v44  ;;  %v662_v22 = vsel %vm624_vm2, %v660_v12, %v661_v15  ;;  %v664_v3 = vsel %vm624_vm2, %v661_v15, %v663_v54  ;;  %v670_v59 = vrot.slane %v3215_v32, 2 }
  0x49   : > { %v671_v53 = vrot.slane %v3212_v31, 2  ;;  %v673_v8 = vrot.slane %v3221_v41, 2  ;;  %v675_v47 = vrot.slane %v3238_v10, 2  ;;  %v676_v5 = vrot.slane %v3235_v0, 2 }
  0x4a   : > { %2423 = vrot.lane.b32.xlu1 %v3390_v62, %s2980_s22  ;;  %2428 = vrot.lane.b32.xlu0 %v3402_v16, %s2980_s22  ;;  %v667_v55 = vsel %vm624_vm2, %v665_v24, %v666_v30  ;;  %v669_v52 = vsel %vm624_vm2, %v666_v30, %v668_v27  ;;  %v678_v38 = vrot.slane %v3241_v13, 2  ;;  %v3430_v12 = vpack.i.bf16 %v664_v3, %v662_v22 }
  0x4b   : > { %v680_v15 = vrot.slane %v3255_v33, 2  ;;  %v681_v44 = vrot.slane %v3252_v23, 2  ;;  %v683_v41 = vrot.slane %v3258_v34, 2  ;;  %v3437_v54 = vpack.i.bf16 %v669_v52, %v667_v55 }
  0x4c   : > { %v672_v35 = vsel %vm624_vm2, %v670_v59, %v671_v53  ;;  %v674_v13 = vsel %vm624_vm2, %v671_v53, %v673_v8  ;;  %v677_v24 = vsel %vm624_vm2, %v675_v47, %v676_v5  ;;  %v679_v30 = vsel %vm624_vm2, %v676_v5, %v678_v38 }
  0x4d   : > { %v685_v27 = vrot.slane %v3273_v63, 2  ;;  %v686_v22 = vrot.slane %v3282_v45, 2  ;;  %v688_v3 = vrot.slane %v3285_v21, 2  ;;  %v690_v34 = vrot.slane %v3295_v51, 2 }
  0x4e   : > { %2433 = vrot.lane.b32.xlu1 %v3410_v18, %s2980_s22  ;;  %2438 = vrot.lane.b32.xlu0 %v3414_v49, %s2980_s22  ;;  %v691_v20 = vrot.slane %v3292_v1, 2  ;;  %v693_v55 = vrot.slane %v3298_v40, 2  ;;  %v3451_v59 = vpack.i.bf16 %v674_v13, %v672_v35  ;;  %v682_v53 = vsel %vm624_vm2, %v680_v15, %v681_v44 }
  0x4f   : > { %v684_v8 = vsel %vm624_vm2, %v681_v44, %v683_v41  ;;  %v3457_v47 = vpack.i.bf16 %v679_v30, %v677_v24  ;;  %v695_v21 = vrot.slane %v3315_v19, 2  ;;  %v696_v5 = vrot.slane %v3312_v2, 2 }
  0x50   : > { %v698_v40 = vrot.slane %v3318_v50, 2  ;;  %v687_v52 = vsel %vm624_vm2, %v685_v27, %v686_v22  ;;  %v689_v38 = vsel %vm624_vm2, %v686_v22, %v688_v3  ;;  %v3464_v35 = vpack.i.bf16 %v684_v8, %v682_v53 }
  0x51   : > { %v692_v15 = vsel %vm624_vm2, %v690_v34, %v691_v20  ;;  %v694_v44 = vsel %vm624_vm2, %v691_v20, %v693_v55  ;;  %v700_v41 = vrot.slane %v3342_v42, 2  ;;  %v701_v13 = vrot.slane %v3339_v17, 2 }
  0x52   : > { %2443 = vrot.lane.b32.xlu1 %v3430_v12, %s2980_s22  ;;  %2448 = vrot.lane.b32.xlu0 %v3437_v54, %s2980_s22  ;;  %v3474_v50 = vpack.i.bf16 %v689_v38, %v687_v52  ;;  %v697_v24 = vsel %vm624_vm2, %v695_v21, %v696_v5  ;;  %v699_v30 = vsel %vm624_vm2, %v696_v5, %v698_v40  ;;  %v703_v27 = vrot.slane %v3345_v14, 2  ;;  %v2967_v38 = vld [vmem:[%s4372_s1] sm:$0xff]  }
  0x53   : > { %v3479_v22 = vpack.i.bf16 %v694_v44, %v692_v15  ;;  %v3483_v20 = vpack.i.bf16 %v699_v30, %v697_v24  ;;  %v702_v3 = vsel %vm624_vm2, %v700_v41, %v701_v13  ;;  %v2487_v14 = vpack.i.bf16 %v3075_v36, %v3078_v37  ;;  %2264 = vmatprep.subr.bf16.mxu0 %v2967_v38  ;;  %v2968_v15 = vld [vmem:[%s4372_s1 + $0x8] sm:$0xff]   ;;  %v4473_v44 = vld [vmem:[#allocation5_spill] sm:$0xff]  ;;  %v2969_v41 = vld [vmem:[%s4372_s1 + $0x10] ss:$0 sps:$4 sm:$0x33]  }
  0x54   : > { %v704_v34 = vsel %vm624_vm2, %v701_v13, %v703_v27  ;;  %v2492_v53 = vpack.i.bf16 %v3062_v28, %v3065_v29  ;;  %v2497_v8 = vpack.i.bf16 %v3084_v39, %v3096_v48  ;;  %v2502_v21 = vpack.i.bf16 %v3122_v4, %v3110_v57  ;;  %2302 = vmatprep.subr.bf16.mxu1 %v2967_v38  ;;  %v4475_v13 = vld [vmem:[#allocation7_spill] sm:$0xff] }
  0x55   : > { %v3491_v55 = vpack.i.bf16 %v704_v34, %v702_v3  ;;  %v2507_v5 = vpack.i.bf16 %v3137_v11, %v3132_v9  ;;  %v2512_v40 = vpack.i.bf16 %v3152_v25, %v3155_v26  ;;  %v2517_v52 = vpack.i.bf16 %v3178_v56, %v3181_v58  ;;  %2265 = vmatpush3.bf16.msra.mxu0 %v2967_v38 }
  0x56   : > { %2453 = vrot.lane.b32.xlu1 %v3451_v59, %s2980_s22  ;;  %2458 = vrot.lane.b32.xlu0 %v3457_v47, %s2980_s22  ;;  %vm1620_vm11 = vcmask 261120   ;;  %vm1689_vm12 = vcmask 293888   ;;  %vm2004_vm13 = vcmask 24576  }
  0x57   : > { %2305 = vmatpush3.bf16.msra.mxu1 %v2967_v38  ;;  %2266 = vmatprep.subr.bf16.mxu0 %v2968_v15 }
  0x58   : > { %2303 = vmatprep.subr.bf16.mxu1 %v2968_v15 }
  0x59   : > { %2267 = vmatpush3.bf16.msra.mxu0 %v2968_v15 }
  0x5a   : > { %2463 = vrot.lane.b32.xlu1 %v3464_v35, %s2980_s22  ;;  %2468 = vrot.lane.b32.xlu0 %v3474_v50, %s2980_s22 }
  0x5b   : > { %2306 = vmatpush3.bf16.msra.mxu1 %v2968_v15  ;;  %2308 = vmatprep.subr.msk.bf16.mxu0 %vm1738_vm3, %v2969_v41 }
  0x5c   : > { %2309 = vmatprep.subr.msk.bf16.mxu1 %vm1738_vm3, %v2969_v41 }
  0x5e   : > { %2473 = vrot.lane.b32.xlu1 %v3479_v22, %s2980_s22  ;;  %2478 = vrot.lane.b32.xlu0 %v3483_v20, %s2980_s22 }
  0x62   : > { %2483 = vrot.lane.b32.xlu1 %v3491_v55, %s2980_s22  ;;  %2488 = vrot.lane.b32.xlu0 %v2487_v14, %s2981_s23  ;;  %v4477_v14 = vld [vmem:[#allocation13_spill] sm:$0xff] }
  0x66   : > { %2493 = vrot.lane.b32.xlu1 %v2492_v53, %s2981_s23  ;;  %2498 = vrot.lane.b32.xlu0 %v2497_v8, %s2981_s23 }
  0x6a   : > { %2503 = vrot.lane.b32.xlu1 %v2502_v21, %s2981_s23  ;;  %2508 = vrot.lane.b32.xlu0 %v2507_v5, %s2981_s23 }
  0x6e   : > { %2513 = vrot.lane.b32.xlu1 %v2512_v40, %s2981_s23  ;;  %2518 = vrot.lane.b32.xlu0 %v2517_v52, %s2981_s23 }
  0x72   : > { %2523 = vrot.lane.b32.xlu1 %v3113_v60, %s2982_s26  ;;  %2528 = vrot.lane.b32.xlu0 %v4473_v44, %s2982_s26  ;;  %v1740_v60 = vsel %vm1738_vm3, %v2969_v41, 0  ;;  %v4485_v41 = vld [vmem:[#allocation19_spill] sm:$0xff] }
  0x73   : > { %2269 = vmatpush3.bf16.msra.mxu0 %v1740_v60  ;;  %2307 = vmatpush3.bf16.msra.mxu1 %v1740_v60 }
  0x76   : > { %2533 = vrot.lane.b32.xlu1 %v3367_v46, %s2983_s29  ;;  %2538 = vrot.lane.b32.xlu0 %v3376_v61, %s2983_s29  ;;  %v4474_v46 = vld [vmem:[#allocation6_spill] sm:$0xff] }
  0x7a   : > { %2543 = vrot.lane.b32.xlu1 %v2492_v53, %s2984_s6  ;;  %2548 = vrot.lane.b32.xlu0 %v2497_v8, %s2984_s6 }
  0x7e   : > { %2553 = vrot.lane.b32.xlu1 %v4473_v44, %s2985_s7  ;;  %2558 = vrot.lane.b32.xlu0 %v4474_v46, %s2985_s7 }
  0x82   : > { %2563 = vrot.lane.b32.xlu1 %v3376_v61, %s2986_s8  ;;  %2568 = vrot.lane.b32.xlu0 %v3390_v62, %s2986_s8 }
  0x86   : > { %2573 = vrot.lane.b32.xlu1 %v4474_v46, %s2982_s26  ;;  %2578 = vrot.lane.b32.xlu0 %v4475_v13, %s2982_s26  ;;  %v2702_v46 = vpack.i.bf16 %v3212_v31, %v3215_v32  ;;  %v4492_v32 = vld [vmem:[#allocation25_spill] sm:$0xff] }
  0x88   : > { %v3553_v24 = vpop.permute.xlu0 %2328 }
  0x8a   : > { %2583 = vrot.lane.b32.xlu1 %v3390_v62, %s2983_s29  ;;  %2588 = vrot.lane.b32.xlu0 %v3402_v16, %s2983_s29  ;;  %v4476_v62 = vld [vmem:[#allocation10_spill] sm:$0xff] }
  0x8e   : > { %2593 = vrot.lane.b32.xlu1 %v2502_v21, %s2984_s6  ;;  %v3556_v61 = vpop.permute.xlu1 %2338  ;;  %2598 = vrot.lane.b32.xlu0 %v2507_v5, %s2984_s6 }
  0x90   : > { %v3559_v30 = vpop.permute.xlu0 %2333 }
  0x92   : > { %2603 = vrot.lane.b32.xlu1 %v4475_v13, %s2985_s7  ;;  %v3563_v27 = vpop.permute.xlu1 %2343  ;;  %2608 = vrot.lane.b32.xlu0 %v4476_v62, %s2985_s7 }
  0x96   : > { %2613 = vrot.lane.b32.xlu1 %v3402_v16, %s2986_s8  ;;  %v3569_v3 = vpop.permute.xlu0 %2348  ;;  %2618 = vrot.lane.b32.xlu0 %v3410_v18, %s2986_s8 }
  0x98   : > { %v3573_v34 = vpop.permute.xlu1 %2353 }
  0x9a   : > { %2623 = vrot.lane.b32.xlu1 %v4476_v62, %s2982_s26  ;;  %2628 = vrot.lane.b32.xlu0 %v4477_v14, %s2982_s26  ;;  %v3579_v53 = vpop.permute.xlu0 %2358 }
  0x9e   : > { %2633 = vrot.lane.b32.xlu1 %v3410_v18, %s2983_s29  ;;  %v3583_v8 = vpop.permute.xlu1 %2363  ;;  %2638 = vrot.lane.b32.xlu0 %v3414_v49, %s2983_s29  ;;  %v4481_v18 = vld [vmem:[#allocation16_spill] sm:$0xff] }
  0xa0   : > { %v3587_v16 = vpop.permute.xlu0 %2368 }
  0xa1   : > { %4478 = vst [vmem:[#allocation5_spill] sm:$0xff] %v3587_v16 }
  0xa2   : > { %2643 = vrot.lane.b32.xlu1 %v2512_v40, %s2984_s6  ;;  %2648 = vrot.lane.b32.xlu0 %v2517_v52, %s2984_s6  ;;  %v3591_v21 = vpop.permute.xlu1 %2373  ;;  %v2672_v40 = vpack.i.bf16 %v3192_v6, %v3195_v7 }
  0xa3   : > { %4479 = vst [vmem:[#allocation6_spill] sm:$0xff] %v3591_v21 }
  0xa6   : > { %2653 = vrot.lane.b32.xlu1 %v4477_v14, %s2985_s7  ;;  %v3595_v5 = vpop.permute.xlu0 %2378  ;;  %2658 = vrot.lane.b32.xlu0 %v4481_v18, %s2985_s7 }
  0xa7   : > { %4480 = vst [vmem:[#allocation7_spill] sm:$0xff] %v3595_v5 }
  0xa8   : > { %v3599_v38 = vpop.permute.xlu1 %2383 }
  0xa9   : > { %4482 = vst [vmem:[#allocation10_spill] sm:$0xff] %v3599_v38 }
  0xaa   : > { %2663 = vrot.lane.b32.xlu1 %v3414_v49, %s2986_s8  ;;  %2668 = vrot.lane.b32.xlu0 %v3430_v12, %s2986_s8 }
  0xac   : > { %v3607_v52 = vpop.permute.xlu0 %2388 }
  0xad   : > { %4483 = vst [vmem:[#allocation13_spill] sm:$0xff] %v3607_v52 }
  0xae   : > { %2673 = vrot.lane.b32.xlu1 %v2672_v40, %s2981_s23  ;;  %v3610_v15 = vpop.permute.xlu1 %2393  ;;  %2678 = vrot.lane.b32.xlu0 %v4481_v18, %s2982_s26  ;;  %v4486_v18 = vld [vmem:[#allocation22_spill] sm:$0xff] }
  0xaf   : > { %4484 = vst [vmem:[#allocation16_spill] sm:$0xff] %v3610_v15 }
  0xb0   : > { %v2399_v44 = vpop.permute.xlu0 %2398 }
  0xb1   : > { %v2400_v31 = vunpack.i.l.bf16 %v2399_v44 }
  0xb2   : > { %2683 = vrot.lane.b32.xlu1 %v4485_v41, %s2982_s26  ;;  %2688 = vrot.lane.b32.xlu0 %v3430_v12, %s2983_s29 }
  0xb4   : > { %v2404_v49 = vpop.permute.xlu1 %2403  ;;  %v3618_v60 = vpop.permute.xlu0 %2408 }
  0xb5   : > { %v2406_v6 = vunpack.i.h.bf16 %v2404_v49 }
  0xb6   : > { %2693 = vrot.lane.b32.xlu1 %v3437_v54, %s2983_s29  ;;  %2698 = vrot.lane.b32.xlu0 %v2672_v40, %s2984_s6 }
  0xb8   : > { %v3625_v13 = vpop.permute.xlu1 %2413  ;;  %v3627_v62 = vpop.permute.xlu0 %2418 }
  0xb9   : > { %v2415_v21 = vunpack.i.l.bf16 %v3625_v13 }
  0xba   : > { %2703 = vrot.lane.b32.xlu1 %v2702_v46, %s2984_s6  ;;  %2708 = vrot.lane.b32.xlu0 %v4485_v41, %s2985_s7  ;;  %v2732_v41 = vpack.i.bf16 %v3235_v0, %v3238_v10  ;;  %v2401_v0 = vunpack.i.h.bf16 %v2399_v44 }
  0xbc   : > { %v3632_v12 = vpop.permute.xlu1 %2423  ;;  %v3634_v14 = vpop.permute.xlu0 %2428 }
  0xbe   : > { %2713 = vrot.lane.b32.xlu1 %v4486_v18, %s2985_s7  ;;  %2718 = vrot.lane.b32.xlu0 %v3437_v54, %s2986_s8 }
  0xc0   : > { %v3640_v40 = vpop.permute.xlu1 %2433  ;;  %v3642_v15 = vpop.permute.xlu0 %2438 }
  0xc1   : > { %4487 = vst [vmem:[#allocation19_spill] sm:$0xff] %v3642_v15 }
  0xc2   : > { %2723 = vrot.lane.b32.xlu1 %v3451_v59, %s2986_s8  ;;  %2728 = vrot.lane.b32.xlu0 %v2702_v46, %s2981_s23 }
  0xc4   : > { %v3649_v52 = vpop.permute.xlu1 %2443  ;;  %v3651_v38 = vpop.permute.xlu0 %2448 }
  0xc5   : > { %4488 = vst [vmem:[#allocation22_spill] sm:$0xff] %v3649_v52  ;;  %4489 = vst [vmem:[#allocation35_spill] sm:$0xff] %v3651_v38  ;;  %v2411_v38 = vunpack.i.h.bf16 %v3618_v60 }
  0xc6   : > { %2733 = vrot.lane.b32.xlu1 %v2732_v41, %s2981_s23  ;;  %2738 = vrot.lane.b32.xlu0 %v4486_v18, %s2982_s26  ;;  %v2762_v18 = vpack.i.bf16 %v3252_v23, %v3255_v33  ;;  %v1418_v33 = vsel %vm1389_vm4, %v3315_v19, %v2400_v31 }
  0xc8   : > { %v3656_v54 = vpop.permute.xlu1 %2453  ;;  %v3658_v5 = vpop.permute.xlu0 %2458 }
  0xc9   : > { %4490 = vst [vmem:[#allocation36_spill] sm:$0xff] %v3656_v54  ;;  %4491 = vst [vmem:[#allocation37_spill] sm:$0xff] %v3658_v5 }
  0xca   : > { %2743 = vrot.lane.b32.xlu1 %v4492_v32, %s2982_s26  ;;  %2748 = vrot.lane.b32.xlu0 %v3451_v59, %s2983_s29  ;;  %v2405_v59 = vunpack.i.l.bf16 %v2404_v49 }
  0xcc   : > { %v3664_v46 = vpop.permute.xlu1 %2463  ;;  %v3666_v10 = vpop.permute.xlu0 %2468  ;;  %v1420_v31 = vsel %vm1389_vm4, %v3342_v42, %v2405_v59 }
  0xcd   : > { %4493 = vst [vmem:[#allocation25_spill] sm:$0xff] %v3664_v46  ;;  %4494 = vst [vmem:[#allocation38_spill] sm:$0xff] %v3666_v10  ;;  %v1419_v10 = vsel %vm1389_vm4, %v3312_v2, %v2401_v0  ;;  %v1421_v0 = vsel %vm1389_vm4, %v3339_v17, %v2406_v6 }
  0xce   : > { %2753 = vrot.lane.b32.xlu1 %v3457_v47, %s2983_s29  ;;  %2758 = vrot.lane.b32.xlu0 %v2732_v41, %s2984_s6 }
  0xd0   : > { %v3673_v5 = vpop.permute.xlu1 %2473  ;;  %v2479_v7 = vpop.permute.xlu0 %2478 }
  0xd1   : > { %4495 = vst [vmem:[#allocation39_spill] sm:$0xff] %v3673_v5  ;;  %v2481_v54 = vunpack.i.h.bf16 %v2479_v7  ;;  %v2480_v46 = vunpack.i.l.bf16 %v2479_v7 }
  0xd2   : > { %2763 = vrot.lane.b32.xlu1 %v2762_v18, %s2984_s6  ;;  %2768 = vrot.lane.b32.xlu0 %v4492_v32, %s2985_s7  ;;  %v4498_v32 = vld [vmem:[#allocation28_spill] sm:$0xff] }
  0xd3   : > { %v3683_v44 = vsel %vm1422_vm5, %v1418_v33, %v2480_v46  ;;  %v3686_v41 = vsel %vm1422_vm5, %v1419_v10, %v2481_v54  ;;  %v2792_v46 = vpack.i.bf16 %v3282_v45, %v3273_v63  ;;  %v3740_v63 = vpack.i.bf16 %v3292_v1, %v3295_v51  ;;  %v4503_v1 = vld [vmem:[#allocation2_spill] sm:$0xff] }
  0xd4   : > { %4496 = vst [vmem:[#allocation40_spill] sm:$0xff] %v3683_v44  ;;  %4497 = vst [vmem:[#allocation41_spill] sm:$0xff] %v3686_v41  ;;  %v2484_v49 = vpop.permute.xlu1 %2483  ;;  %v3688_v23 = vpop.permute.xlu0 %2488  ;;  %v2331_v41 = vunpack.i.h.bf16 %v3553_v24  ;;  %v2335_v45 = vunpack.i.l.bf16 %v3559_v30  ;;  %v2410_v51 = vunpack.i.l.bf16 %v3618_v60 }
  0xd5   : > { %v2486_v7 = vunpack.i.h.bf16 %v2484_v49  ;;  %v2485_v5 = vunpack.i.l.bf16 %v2484_v49  ;;  %v2490_v56 = vunpack.i.l.bf16 %v3688_v23 }
  0xd6   : > { %2773 = vrot.lane.b32.xlu1 %v4498_v32, %s2985_s7  ;;  %2778 = vrot.lane.b32.xlu0 %v3457_v47, %s2986_s8  ;;  %v1392_v25 = vsel %vm1389_vm4, %v3078_v37, %v2335_v45 }
  0xd7   : > { %v3697_v33 = vsel %vm1422_vm5, %v1421_v0, %v2486_v7  ;;  %v3700_v10 = vsel %vm1422_vm5, %v1420_v31, %v2485_v5  ;;  %v246_v5 = vld [vmem:[%s3040_s20 + $0xf0] sm:$0xff]  ;;  %v247_v7 = vld [vmem:[%s3040_s20 + $0xf8] sm:$0xff]  ;;  %v4502_v31 = vld [vmem:[#allocation31_spill] sm:$0xff] }
  0xd8   : > { %4499 = vst [vmem:[#allocation28_spill] sm:$0xff] %v3697_v33  ;;  %4500 = vst [vmem:[#allocation42_spill] sm:$0xff] %v3700_v10  ;;  %v3704_v54 = vpop.permute.xlu1 %2493  ;;  %v3706_v6 = vpop.permute.xlu0 %2498  ;;  %v330_v10 = vrot.slane %v247_v7, 7  ;;  %v2336_v7 = vunpack.i.h.bf16 %v3559_v30  ;;  %v2491_v30 = vunpack.i.h.bf16 %v3688_v23 }
  0xd9   : > { %v2495_v26 = vunpack.i.l.bf16 %v3704_v54 }
  0xda   : > { %2783 = vrot.lane.b32.xlu1 %v3464_v35, %s2986_s8  ;;  %2788 = vrot.lane.b32.xlu0 %v2762_v18, %s2981_s23  ;;  %v329_v18 = vrot.slane %v246_v5, 7  ;;  %v3768_v60 = vsel %vm281_vm0, %v330_v10, 0.0  ;;  %v1393_v23 = vsel %vm1389_vm4, %v3075_v36, %v2336_v7 }
  0xdc   : > { %v3713_v59 = vpop.permute.xlu1 %2503  ;;  %v3715_v49 = vpop.permute.xlu0 %2508  ;;  %v3748_v5 = vsel %vm281_vm0, %v329_v18, %v330_v10 }
  0xde   : > { %2793 = vrot.lane.b32.xlu1 %v2792_v46, %s2981_s23  ;;  %2798 = vrot.lane.b32.xlu0 %v4498_v32, %s2982_s26  ;;  %v2330_v32 = vunpack.i.l.bf16 %v3553_v24  ;;  %v3751_v24 = vsel %vm281_vm0, 0.0, %v329_v18  ;;  %v4504_v18 = vld [vmem:[#allocation3_spill] sm:$0xff] }
  0xe0   : > { %v3720_v47 = vpop.permute.xlu1 %2513  ;;  %v3724_v0 = vpop.permute.xlu0 %2518  ;;  %v1390_v58 = vsel %vm1389_vm4, %v4504_v18, %v2330_v32 }
  0xe1   : > { %4501 = vst [vmem:[#allocation43_spill] sm:$0xff] %v3724_v0  ;;  %v1423_v0 = vsel %vm1422_vm5, %v1390_v58, %v2410_v51  ;;  %v4505_v58 = vld [vmem:[#allocation32_spill] sm:$0xff] }
  0xe2   : > { %2803 = vrot.lane.b32.xlu1 %v4502_v31, %s2982_s26  ;;  %2808 = vrot.lane.b32.xlu0 %v3464_v35, %s2983_s29  ;;  %v3745_v35 = vpack.i.bf16 %v3312_v2, %v3315_v19  ;;  %v1391_v2 = vsel %vm1389_vm4, %v4503_v1, %v2331_v41  ;;  %v2416_v19 = vunpack.i.h.bf16 %v3625_v13  ;;  %v2496_v41 = vunpack.i.h.bf16 %v3704_v54 }
  0xe3   : > { %v1424_v10 = vsel %vm1422_vm5, %v1391_v2, %v2411_v38  ;;  %v1425_v54 = vsel %vm1422_vm5, %v1392_v25, %v2415_v21  ;;  %v1456_v36 = vsel %vm1455_vm6, %v1423_v0, %v2490_v56 }
  0xe4   : > { %v3730_v33 = vpop.permute.xlu1 %2523  ;;  %v3733_v44 = vpop.permute.xlu0 %2528  ;;  %v1457_v7 = vsel %vm1455_vm6, %v1424_v10, %v2491_v30  ;;  %v1458_v25 = vsel %vm1455_vm6, %v1425_v54, %v2495_v26 }
  0xe5   : > { %v2526_v13 = vunpack.i.h.bf16 %v3730_v33  ;;  %v2525_v32 = vunpack.i.l.bf16 %v3730_v33  ;;  %v2531_v37 = vunpack.i.h.bf16 %v3733_v44  ;;  %v2530_v45 = vunpack.i.l.bf16 %v3733_v44 }
  0xe6   : > { %2813 = vrot.lane.b32.xlu1 %v3474_v50, %s2983_s29  ;;  %2818 = vrot.lane.b32.xlu0 %v2792_v46, %s2984_s6 }
  0xe7   : > { %v1489_v44 = vsel %vm1488_vm7, %v1456_v36, %v2525_v32  ;;  %v1490_v30 = vsel %vm1488_vm7, %v1457_v7, %v2526_v13 }
  0xe8   : > { %v2534_v46 = vpop.permute.xlu1 %2533  ;;  %v2539_v16 = vpop.permute.xlu0 %2538 }
  0xe9   : > { %v2536_v21 = vunpack.i.h.bf16 %v2534_v46  ;;  %v2535_v38 = vunpack.i.l.bf16 %v2534_v46  ;;  %v2541_v56 = vunpack.i.h.bf16 %v2539_v16  ;;  %v2540_v33 = vunpack.i.l.bf16 %v2539_v16 }
  0xea   : > { %2823 = vrot.lane.b32.xlu1 %v3740_v63, %s2984_s6  ;;  %2828 = vrot.lane.b32.xlu0 %v4502_v31, %s2985_s7  ;;  %v1426_v31 = vsel %vm1422_vm5, %v1393_v23, %v2416_v19 }
  0xeb   : > { %v1459_v51 = vsel %vm1455_vm6, %v1426_v31, %v2496_v41  ;;  %v1491_v41 = vsel %vm1488_vm7, %v1458_v25, %v2530_v45  ;;  %v1523_v16 = vsel %vm1521_vm8, %v1490_v30, %v2536_v21 }
  0xec   : > { %v2544_v52 = vpop.permute.xlu1 %2543  ;;  %v2549_v15 = vpop.permute.xlu0 %2548  ;;  %v1492_v46 = vsel %vm1488_vm7, %v1459_v51, %v2531_v37 }
  0xed   : > { %v2546_v0 = vunpack.i.h.bf16 %v2544_v52  ;;  %v2545_v2 = vunpack.i.l.bf16 %v2544_v52  ;;  %v2551_v23 = vunpack.i.h.bf16 %v2549_v15  ;;  %v2550_v10 = vunpack.i.l.bf16 %v2549_v15 }
  0xee   : > { %2833 = vrot.lane.b32.xlu1 %v4505_v58, %s2985_s7  ;;  %2838 = vrot.lane.b32.xlu0 %v3474_v50, %s2986_s8  ;;  %v1522_v50 = vsel %vm1521_vm8, %v1489_v44, %v2535_v38  ;;  %v1524_v15 = vsel %vm1521_vm8, %v1491_v41, %v2540_v33  ;;  %v1525_v13 = vsel %vm1521_vm8, %v1492_v46, %v2541_v56  ;;  %v2341_v46 = vunpack.i.h.bf16 %v3556_v61 }
  0xef   : > { %v1555_v36 = vsel %vm1554_vm9, %v1522_v50, %v2545_v2  ;;  %v1556_v7 = vsel %vm1554_vm9, %v1523_v16, %v2546_v0  ;;  %v1557_v45 = vsel %vm1554_vm9, %v1524_v15, %v2550_v10  ;;  %v1558_v25 = vsel %vm1554_vm9, %v1525_v13, %v2551_v23 }
  0xf0   : > { %v2554_v19 = vpop.permute.xlu1 %2553  ;;  %v2559_v26 = vpop.permute.xlu0 %2558  ;;  %v3829_v50 = vpack.i.bf16 %v3339_v17, %v3342_v42  ;;  %v2340_v16 = vunpack.i.l.bf16 %v3556_v61  ;;  %v4507_v17 = vrot.slane %v3748_v5, 1  ;;  %v4508_v42 = vrot.slane %v3751_v24, 1 }
  0xf1   : > { %v2556_v54 = vunpack.i.h.bf16 %v2554_v19  ;;  %v2555_v31 = vunpack.i.l.bf16 %v2554_v19  ;;  %v2561_v52 = vunpack.i.h.bf16 %v2559_v26  ;;  %v2560_v32 = vunpack.i.l.bf16 %v2559_v26 }
  0xf2   : > { %2843 = vrot.lane.b32.xlu1 %v3479_v22, %s2986_s8  ;;  %2848 = vrot.lane.b32.xlu0 %v3740_v63, %s2981_s23  ;;  %v3848_v61 = vsel %vm447_vm1, %v4508_v42, %v4507_v17  ;;  %v2346_v15 = vunpack.i.h.bf16 %v3563_v27  ;;  %v2345_v13 = vunpack.i.l.bf16 %v3563_v27  ;;  %v1394_v27 = vsel %vm1389_vm4, %v3065_v29, %v2340_v16 }
  0xf3   : > { %v1588_v63 = vsel %vm1587_vm10, %v1555_v36, %v2555_v31  ;;  %v1589_v56 = vsel %vm1587_vm10, %v1556_v7, %v2556_v54  ;;  %v1590_v33 = vsel %vm1587_vm10, %v1557_v45, %v2560_v32  ;;  %v1591_v0 = vsel %vm1587_vm10, %v1558_v25, %v2561_v52  ;;  %v4506_v52 = vld [vmem:[#allocation34_spill] sm:$0xff] }
  0xf4   : > { %v2564_v37 = vpop.permute.xlu1 %2563  ;;  %v2569_v38 = vpop.permute.xlu0 %2568  ;;  %v3841_v32 = vpack.i.bf16 %v3748_v5, %v3751_v24  ;;  %v2421_v36 = vunpack.i.h.bf16 %v3627_v62  ;;  %v2426_v45 = vunpack.i.h.bf16 %v3632_v12  ;;  %v2425_v25 = vunpack.i.l.bf16 %v3632_v12 }
  0xf5   : > { %v2566_v51 = vunpack.i.h.bf16 %v2564_v37  ;;  %v2565_v21 = vunpack.i.l.bf16 %v2564_v37  ;;  %v2571_v19 = vunpack.i.h.bf16 %v2569_v38  ;;  %v2570_v44 = vunpack.i.l.bf16 %v2569_v38 }
  0xf6   : > { %2853 = vrot.lane.b32.xlu1 %v3745_v35, %s2981_s23  ;;  %2858 = vrot.lane.b32.xlu0 %v4505_v58, %s2982_s26  ;;  %v902_v58 = vrot.slane %v3768_v60, 1  ;;  %v1395_v37 = vsel %vm1389_vm4, %v3062_v28, %v2341_v46  ;;  %v1000_v28 = vrot.slane %v3751_v24, 2  ;;  %v2506_v12 = vunpack.i.h.bf16 %v3713_v59 }
  0xf7   : > { %v1621_v2 = vsel %vm1620_vm11, %v1588_v63, %v2565_v21  ;;  %v1622_v30 = vsel %vm1620_vm11, %v1589_v56, %v2566_v51  ;;  %v1623_v23 = vsel %vm1620_vm11, %v1590_v33, %v2570_v44  ;;  %v1624_v10 = vsel %vm1620_vm11, %v1591_v0, %v2571_v19 }
  0xf8   : > { %v2574_v26 = vpop.permute.xlu1 %2573  ;;  %v1653_v41 = vpack.c.bf16 %v1622_v30, %v1621_v2  ;;  %v1654_v54 = vpack.c.bf16 %v1624_v10, %v1623_v23  ;;  %v3825_v31 = vpop.permute.xlu0 %2578  ;;  %v4509_v21 = vmov %v4507_v17  ;;  %v2501_v19 = vunpack.i.h.bf16 %v3706_v6 }
  0xf9   : > { %v3861_v38 = vsel %vm447_vm1, %v4509_v21, %v902_v58  ;;  %v2505_v44 = vunpack.i.l.bf16 %v3713_v59  ;;  %v1001_v63 = vrot.slane %v3748_v5, 2  ;;  %v1003_v29 = vrot.slane %v3768_v60, 2 }
  0xfa   : > { %2863 = vrot.lane.b32.xlu1 %v4506_v52, %s2982_s26  ;;  %2270 = vmatprep.mubr.msk.bf16.mxu0 %vm1689_vm12, %v1653_v41  ;;  %v1397_v56 = vsel %vm1389_vm4, %v3084_v39, %v2346_v15  ;;  %v1428_v33 = vsel %vm1422_vm5, %v1395_v37, %v2421_v36  ;;  %v2575_v23 = vunpack.i.l.bf16 %v2574_v26  ;;  %v2581_v39 = vunpack.i.h.bf16 %v3825_v31 }
  0xfb   : > { %2868 = vrot.lane.b32.xlu0 %v3479_v22, %s2983_s29  ;;  %2271 = vmatmul.mubr.msk.bf16.vlgmr.msra.gmra.mrb[0].mxu0 %vm1689_vm12, %v1654_v54  ;;  %v2420_v22 = vunpack.i.l.bf16 %v3627_v62  ;;  %v2500_v62 = vunpack.i.l.bf16 %v3706_v6  ;;  %v1396_v6 = vsel %vm1389_vm4, %v3096_v48, %v2345_v13  ;;  %v1430_v59 = vsel %vm1422_vm5, %v1397_v56, %v2426_v45 }
  0xfc   : > { %v2584_v7 = vpop.permute.xlu1 %2583  ;;  %v2589_v51 = vpop.permute.xlu0 %2588  ;;  %v1429_v30 = vsel %vm1422_vm5, %v1396_v6, %v2425_v25  ;;  %v1461_v46 = vsel %vm1455_vm6, %v1428_v33, %v2501_v19  ;;  %v2580_v48 = vunpack.i.l.bf16 %v3825_v31  ;;  %v1463_v58 = vsel %vm1455_vm6, %v1430_v59, %v2506_v12 }
  0xfd   : > { %v1427_v0 = vsel %vm1422_vm5, %v1394_v27, %v2420_v22  ;;  %v1462_v54 = vsel %vm1455_vm6, %v1429_v30, %v2505_v44  ;;  %v2586_v16 = vunpack.i.h.bf16 %v2584_v7  ;;  %v2585_v17 = vunpack.i.l.bf16 %v2584_v7 }
  0xfe   : > { %2873 = vrot.lane.b32.xlu1 %v3483_v20, %s2983_s29  ;;  %v1460_v41 = vsel %vm1455_vm6, %v1427_v0, %v2500_v62  ;;  %v2590_v42 = vunpack.i.l.bf16 %v2589_v51  ;;  %v1496_v21 = vsel %vm1488_vm7, %v1463_v58, %v2581_v39  ;;  %v1495_v27 = vsel %vm1488_vm7, %v1462_v54, %v2580_v48 }
  0xff   : > { %2878 = vrot.lane.b32.xlu0 %v3745_v35, %s2984_s6  ;;  %v2576_v35 = vunpack.i.h.bf16 %v2574_v26  ;;  %v2591_v26 = vunpack.i.h.bf16 %v2589_v51  ;;  %v1493_v22 = vsel %vm1488_vm7, %v1460_v41, %v2575_v23  ;;  %v2430_v24 = vunpack.i.l.bf16 %v3634_v14 }
 0x100   : > { %v2594_v2 = vpop.permute.xlu1 %2593  ;;  %v2599_v10 = vpop.permute.xlu0 %2598  ;;  %v1528_v44 = vsel %vm1521_vm8, %v1495_v27, %v2590_v42  ;;  %v2436_v5 = vunpack.i.h.bf16 %v3640_v40 }
 0x101   : > { %v2596_v15 = vunpack.i.h.bf16 %v2594_v2  ;;  %v2595_v13 = vunpack.i.l.bf16 %v2594_v2  ;;  %v1494_v31 = vsel %vm1488_vm7, %v1461_v46, %v2576_v35  ;;  %v2601_v37 = vunpack.i.h.bf16 %v2599_v10 }
 0x102   : > { %2883 = vrot.lane.b32.xlu1 %v3829_v50, %s2984_s6  ;;  %v2600_v45 = vunpack.i.l.bf16 %v2599_v10  ;;  %v1527_v51 = vsel %vm1521_vm8, %v1494_v31, %v2586_v16  ;;  %v1529_v56 = vsel %vm1521_vm8, %v1496_v21, %v2591_v26  ;;  %v1002_v31 = vsel %vm624_vm2, %v1000_v28, %v1001_v63 }
 0x103   : > { %2888 = vrot.lane.b32.xlu0 %v4506_v52, %s2985_s7  ;;  %v1526_v52 = vsel %vm1521_vm8, %v1493_v22, %v2585_v17  ;;  %v1560_v33 = vsel %vm1554_vm9, %v1527_v51, %v2596_v15  ;;  %v1562_v59 = vsel %vm1554_vm9, %v1529_v56, %v2601_v37  ;;  %v2351_v15 = vunpack.i.h.bf16 %v3569_v3 }
 0x104   : > { %v2604_v36 = vpop.permute.xlu1 %2603  ;;  %v2609_v25 = vpop.permute.xlu0 %2608  ;;  %v1559_v6 = vsel %vm1554_vm9, %v1526_v52, %v2595_v13  ;;  %v1561_v2 = vsel %vm1554_vm9, %v1528_v44, %v2600_v45  ;;  %v2350_v22 = vunpack.i.l.bf16 %v3569_v3  ;;  %v1004_v3 = vsel %vm624_vm2, %v1001_v63, %v1003_v29 }
 0x105   : > { %v2606_v7 = vunpack.i.h.bf16 %v2604_v36  ;;  %v2605_v19 = vunpack.i.l.bf16 %v2604_v36  ;;  %v2611_v62 = vunpack.i.h.bf16 %v2609_v25  ;;  %v2610_v12 = vunpack.i.l.bf16 %v2609_v25 }
 0x106   : > { %2893 = vrot.lane.b32.xlu1 %v3362_v43, %s2985_s7  ;;  %v2356_v37 = vunpack.i.h.bf16 %v3573_v34  ;;  %v1399_v60 = vsel %vm1389_vm4, %v3122_v4, %v2351_v15  ;;  %v2435_v63 = vunpack.i.l.bf16 %v3640_v40  ;;  %v3950_v45 = vpack.i.bf16 %v1004_v3, %v1002_v31 }
 0x107   : > { %2898 = vrot.lane.b32.xlu0 %v3483_v20, %s2986_s8  ;;  %v1592_v10 = vsel %vm1587_vm10, %v1559_v6, %v2605_v19  ;;  %v1593_v20 = vsel %vm1587_vm10, %v1560_v33, %v2606_v7  ;;  %v1594_v39 = vsel %vm1587_vm10, %v1561_v2, %v2610_v12  ;;  %v1595_v48 = vsel %vm1587_vm10, %v1562_v59, %v2611_v62 }
 0x108   : > { %v2614_v0 = vpop.permute.xlu1 %2613  ;;  %v2619_v23 = vpop.permute.xlu0 %2618  ;;  %v2510_v25 = vunpack.i.l.bf16 %v3715_v49  ;;  %v1401_v4 = vsel %vm1389_vm4, %v3137_v11, %v2356_v37  ;;  %v2516_v40 = vunpack.i.h.bf16 %v3720_v47  ;;  %v2515_v21 = vunpack.i.l.bf16 %v3720_v47 }
 0x109   : > { %v2616_v30 = vunpack.i.h.bf16 %v2614_v0  ;;  %v2615_v35 = vunpack.i.l.bf16 %v2614_v0  ;;  %v2621_v41 = vunpack.i.h.bf16 %v2619_v23  ;;  %v2620_v46 = vunpack.i.l.bf16 %v2619_v23 }
 0x10a   : > { %2903 = vrot.lane.b32.xlu1 %v3491_v55, %s2986_s8 }
 0x10b   : > { %v1625_v54 = vsel %vm1620_vm11, %v1592_v10, %v2615_v35  ;;  %v1626_v58 = vsel %vm1620_vm11, %v1593_v20, %v2616_v30  ;;  %2908 = vrot.lane.b32.xlu0 %v3829_v50, %s2981_s23  ;;  %v1627_v17 = vsel %vm1620_vm11, %v1594_v39, %v2620_v46  ;;  %v1628_v26 = vsel %vm1620_vm11, %v1595_v48, %v2621_v41 }
 0x10c   : > { %v1655_v16 = vpack.c.bf16 %v1626_v58, %v1625_v54  ;;  %v2624_v42 = vpop.permute.xlu1 %2623  ;;  %v1656_v13 = vpack.c.bf16 %v1628_v26, %v1627_v17  ;;  %v2629_v36 = vpop.permute.xlu0 %2628  ;;  %v2922_v50 = vpack.i.bf16 %v3861_v38, %v3848_v61  ;;  %v2355_v61 = vunpack.i.l.bf16 %v3573_v34 }
 0x10d   : > { %v2431_v38 = vunpack.i.h.bf16 %v3634_v14  ;;  %v2511_v34 = vunpack.i.h.bf16 %v3715_v49  ;;  %v2942_v14 = vpack.i.bf16 %v4503_v1, %v4504_v18  ;;  %v1434_v1 = vsel %vm1422_vm5, %v1401_v4, %v2436_v5 }
 0x10e   : > { %2913 = vrot.lane.b32.xlu1 %v3841_v32, %s2981_s23  ;;  %2274 = vmatprep.mubr.msk.bf16.mxu0 %vm1689_vm12, %v1655_v16  ;;  %v2626_v11 = vunpack.i.h.bf16 %v2624_v42  ;;  %v2625_v19 = vunpack.i.l.bf16 %v2624_v42  ;;  %v2630_v62 = vunpack.i.l.bf16 %v2629_v36  ;;  %v1467_v12 = vsel %vm1455_vm6, %v1434_v1, %v2516_v40 }
 0x10f   : > { %2918 = vrot.lane.b32.xlu0 %v3362_v43, %s2982_s26  ;;  %2275 = vmatmul.mubr.msk.bf16.gmra.mrb[4].mxu0 %vm1689_vm12, %v1656_v13  ;;  %v1398_v43 = vsel %vm1389_vm4, %v3110_v57, %v2350_v22  ;;  %v1400_v57 = vsel %vm1389_vm4, %v3132_v9, %v2355_v61  ;;  %v1432_v27 = vsel %vm1422_vm5, %v1399_v60, %v2431_v38  ;;  %v2365_v1 = vunpack.i.l.bf16 %v3583_v8 }
 0x110   : > { %v2634_v28 = vpop.permute.xlu1 %2633  ;;  %v2639_v29 = vpop.permute.xlu0 %2638  ;;  %v1431_v49 = vsel %vm1422_vm5, %v1398_v43, %v2430_v24  ;;  %v1433_v18 = vsel %vm1422_vm5, %v1400_v57, %v2435_v63  ;;  %v1465_v51 = vsel %vm1455_vm6, %v1432_v27, %v2511_v34  ;;  %v2366_v27 = vunpack.i.h.bf16 %v3583_v8 }
 0x111   : > { %v1464_v47 = vsel %vm1455_vm6, %v1431_v49, %v2510_v25  ;;  %v1466_v9 = vsel %vm1455_vm6, %v1433_v18, %v2515_v21  ;;  %v2636_v44 = vunpack.i.h.bf16 %v2634_v28  ;;  %v2635_v56 = vunpack.i.l.bf16 %v2634_v28  ;;  %v4510_v28 = vld [vmem:[#allocation4_spill] sm:$0xff]  ;;  %v4511_v21 = vld [vmem:[#allocation33_spill] sm:$0xff]  ;;  %v4512_v18 = vld [vmem:[#allocation19_spill] sm:$0xff] }
 0x112   : > { %2923 = vrot.lane.b32.xlu1 %v2922_v50, %s2982_s26  ;;  %v2641_v6 = vunpack.i.h.bf16 %v2639_v29  ;;  %v2640_v33 = vunpack.i.l.bf16 %v2639_v29  ;;  %v1497_v30 = vsel %vm1488_vm7, %v1464_v47, %v2625_v19  ;;  %v1498_v35 = vsel %vm1488_vm7, %v1465_v51, %v2626_v11 }
 0x113   : > { %2928 = vrot.lane.b32.xlu0 %v3491_v55, %s2983_s29  ;;  %v2631_v55 = vunpack.i.h.bf16 %v2629_v36  ;;  %v1499_v46 = vsel %vm1488_vm7, %v1466_v9, %v2630_v62  ;;  %v1531_v54 = vsel %vm1521_vm8, %v1498_v35, %v2636_v44  ;;  %v2361_v49 = vunpack.i.h.bf16 %v3579_v53 }
 0x114   : > { %v2644_v7 = vpop.permute.xlu1 %2643  ;;  %v2649_v52 = vpop.permute.xlu0 %2648  ;;  %v1532_v17 = vsel %vm1521_vm8, %v1499_v46, %v2640_v33  ;;  %v2441_v11 = vunpack.i.h.bf16 %v4512_v18  ;;  %v2440_v19 = vunpack.i.l.bf16 %v4512_v18 }
 0x115   : > { %v2646_v0 = vunpack.i.h.bf16 %v2644_v7  ;;  %v2645_v2 = vunpack.i.l.bf16 %v2644_v7  ;;  %v2651_v23 = vunpack.i.h.bf16 %v2649_v52  ;;  %v2650_v10 = vunpack.i.l.bf16 %v2649_v52  ;;  %v4513_v52 = vld [vmem:[#allocation22_spill] sm:$0xff] }
 0x116   : > { %2933 = vrot.lane.b32.xlu1 %v3950_v45, %s2983_s29  ;;  %v1500_v41 = vsel %vm1488_vm7, %v1467_v12, %v2631_v55  ;;  %v2446_v47 = vunpack.i.h.bf16 %v4513_v52  ;;  %v2445_v51 = vunpack.i.l.bf16 %v4513_v52  ;;  %v4514_v55 = vld [vmem:[#allocation43_spill] sm:$0xff]  ;;  %v4515_v12 = vld [vmem:[#allocation8_spill] sm:$0xff] }
 0x117   : > { %2938 = vrot.lane.b32.xlu0 %v3841_v32, %s2984_s6  ;;  %v1530_v32 = vsel %vm1521_vm8, %v1497_v30, %v2635_v56  ;;  %v1533_v26 = vsel %vm1521_vm8, %v1500_v41, %v2641_v6  ;;  %v1564_v15 = vsel %vm1554_vm9, %v1531_v54, %v2646_v0  ;;  %v1565_v36 = vsel %vm1554_vm9, %v1532_v17, %v2650_v10  ;;  %v4517_v6 = vld [vmem:[#allocation11_spill] sm:$0xff] }
 0x118   : > { %v2654_v59 = vpop.permute.xlu1 %2653  ;;  %v2659_v20 = vpop.permute.xlu0 %2658  ;;  %v1563_v42 = vsel %vm1554_vm9, %v1530_v32, %v2645_v2  ;;  %v1566_v22 = vsel %vm1554_vm9, %v1533_v26, %v2651_v23  ;;  %v2520_v62 = vunpack.i.l.bf16 %v4514_v55  ;;  %v1403_v44 = vsel %vm1389_vm4, %v4515_v12, %v2361_v49  ;;  %v4518_v23 = vld [vmem:[#allocation12_spill] sm:$0xff] }
 0x119   : > { %v2656_v39 = vunpack.i.h.bf16 %v2654_v59  ;;  %v2655_v48 = vunpack.i.l.bf16 %v2654_v59  ;;  %v2661_v58 = vunpack.i.h.bf16 %v2659_v20  ;;  %v2660_v16 = vunpack.i.l.bf16 %v2659_v20 }
 0x11a   : > { %2943 = vrot.lane.b32.xlu1 %v2942_v14, %s2984_s6  ;;  %v1405_v8 = vsel %vm1389_vm4, %v4517_v6, %v2366_v27  ;;  %v2521_v33 = vunpack.i.h.bf16 %v4514_v55  ;;  %v1404_v10 = vsel %vm1389_vm4, %v4518_v23, %v2365_v1  ;;  %v1436_v41 = vsel %vm1422_vm5, %v1403_v44, %v2441_v11 }
 0x11b   : > { %2948 = vrot.lane.b32.xlu0 %v2922_v50, %s2985_s7  ;;  %v1596_v61 = vsel %vm1587_vm10, %v1563_v42, %v2655_v48  ;;  %v1597_v50 = vsel %vm1587_vm10, %v1564_v15, %v2656_v39  ;;  %v1598_v60 = vsel %vm1587_vm10, %v1565_v36, %v2660_v16  ;;  %v1599_v5 = vsel %vm1587_vm10, %v1566_v22, %v2661_v58 }
 0x11c   : > { %v2664_v13 = vpop.permute.xlu1 %2663  ;;  %v2669_v37 = vpop.permute.xlu0 %2668  ;;  %v1438_v46 = vsel %vm1422_vm5, %v1405_v8, %v2446_v47  ;;  %v1437_v39 = vsel %vm1422_vm5, %v1404_v10, %v2445_v51  ;;  %v1469_v16 = vsel %vm1455_vm6, %v1436_v41, %v2521_v33 }
 0x11d   : > { %v2666_v31 = vunpack.i.h.bf16 %v2664_v13  ;;  %v2665_v3 = vunpack.i.l.bf16 %v2664_v13  ;;  %v2671_v38 = vunpack.i.h.bf16 %v2669_v37  ;;  %v2670_v24 = vunpack.i.l.bf16 %v2669_v37 }
 0x11e   : > { %2953 = vrot.lane.b32.xlu1 %v4510_v28, %s2985_s7 }
 0x11f   : > { %v1629_v63 = vsel %vm1620_vm11, %v1596_v61, %v2665_v3  ;;  %v1630_v29 = vsel %vm1620_vm11, %v1597_v50, %v2666_v31  ;;  %2958 = vrot.lane.b32.xlu0 %v3950_v45, %s2986_s8  ;;  %v1631_v34 = vsel %vm1620_vm11, %v1598_v60, %v2670_v24  ;;  %v1632_v25 = vsel %vm1620_vm11, %v1599_v5, %v2671_v38 }
 0x120   : > { %v1657_v43 = vpack.c.bf16 %v1630_v29, %v1629_v63  ;;  %v2674_v14 = vpop.permute.xlu1 %2673  ;;  %v1658_v4 = vpack.c.bf16 %v1632_v25, %v1631_v34  ;;  %v2679_v40 = vpop.permute.xlu0 %2678  ;;  %v2360_v45 = vunpack.i.l.bf16 %v3579_v53  ;;  %v4516_v53 = vld [vmem:[#allocation9_spill] sm:$0xff] }
 0x121   : > { %v2676_v2 = vunpack.i.h.bf16 %v2674_v14  ;;  %v2675_v59 = vunpack.i.l.bf16 %v2674_v14  ;;  %v2681_v30 = vunpack.i.h.bf16 %v2679_v40  ;;  %v2680_v35 = vunpack.i.l.bf16 %v2679_v40 }
 0x122   : > { %2963 = vrot.lane.b32.xlu1 %v4511_v21, %s2986_s8  ;;  %2278 = vmatprep.mubr.msk.bf16.mxu0 %vm1689_vm12, %v1657_v43  ;;  %v1402_v56 = vsel %vm1389_vm4, %v4516_v53, %v2360_v45 }
 0x123   : > { %2279 = vmatmul.mubr.msk.bf16.gmra.mrb[8].mxu0 %vm1689_vm12, %v1658_v4  ;;  %v1435_v20 = vsel %vm1422_vm5, %v1402_v56, %v2440_v19  ;;  %v1471_v13 = vsel %vm1455_vm6, %v1438_v46, %v2676_v2  ;;  %v1470_v36 = vsel %vm1455_vm6, %v1437_v39, %v2675_v59  ;;  %v1502_v31 = vsel %vm1488_vm7, %v1469_v16, %v2681_v30  ;;  %v4520_v30 = vld [vmem:[#allocation6_spill] sm:$0xff]  ;;  %v4522_v39 = vld [vmem:[#allocation36_spill] sm:$0xff] }
 0x124   : > { %v2684_v57 = vpop.permute.xlu1 %2683  ;;  %v2689_v7 = vpop.permute.xlu0 %2688  ;;  %v1468_v48 = vsel %vm1455_vm6, %v1435_v20, %v2520_v62  ;;  %v2375_v10 = vunpack.i.l.bf16 %v4520_v30  ;;  %v4521_v20 = vld [vmem:[#allocation35_spill] sm:$0xff]  ;;  %v4523_v16 = vld [vmem:[#allocation14_spill] sm:$0xff] }
 0x125   : > { %v2691_v32 = vunpack.i.h.bf16 %v2689_v7  ;;  %v2690_v54 = vunpack.i.l.bf16 %v2689_v7  ;;  %v2685_v17 = vunpack.i.l.bf16 %v2684_v57  ;;  %v1501_v22 = vsel %vm1488_vm7, %v1468_v48, %v2680_v35 }
 0x126   : > { %v2686_v3 = vunpack.i.h.bf16 %v2684_v57  ;;  %v2376_v35 = vunpack.i.h.bf16 %v4520_v30  ;;  %v2451_v41 = vunpack.i.h.bf16 %v4521_v20  ;;  %v2450_v46 = vunpack.i.l.bf16 %v4521_v20 }
 0x127   : > { %v1534_v38 = vsel %vm1521_vm8, %v1501_v22, %v2690_v54  ;;  %v1535_v24 = vsel %vm1521_vm8, %v1502_v31, %v2691_v32  ;;  %v1503_v63 = vsel %vm1488_vm7, %v1470_v36, %v2685_v17  ;;  %v2456_v48 = vunpack.i.h.bf16 %v4522_v39 }
 0x128   : > { %v2694_v9 = vpop.permute.xlu1 %2693  ;;  %v2699_v0 = vpop.permute.xlu0 %2698  ;;  %v1504_v57 = vsel %vm1488_vm7, %v1471_v13, %v2686_v3  ;;  %v2455_v32 = vunpack.i.l.bf16 %v4522_v39 }
 0x129   : > { %v2701_v26 = vunpack.i.h.bf16 %v2699_v0  ;;  %v2700_v42 = vunpack.i.l.bf16 %v2699_v0  ;;  %v2695_v37 = vunpack.i.l.bf16 %v2694_v9  ;;  %v2696_v28 = vunpack.i.h.bf16 %v2694_v9  ;;  %v4519_v0 = vld [vmem:[#allocation5_spill] sm:$0xff] }
 0x12a   : > { %v2371_v2 = vunpack.i.h.bf16 %v4519_v0  ;;  %v2370_v59 = vunpack.i.l.bf16 %v4519_v0 }
 0x12b   : > { %v1567_v29 = vsel %vm1554_vm9, %v1534_v38, %v2700_v42  ;;  %v1568_v43 = vsel %vm1554_vm9, %v1535_v24, %v2701_v26  ;;  %v1536_v49 = vsel %vm1521_vm8, %v1503_v63, %v2695_v37  ;;  %v1537_v7 = vsel %vm1521_vm8, %v1504_v57, %v2696_v28  ;;  %v4524_v26 = vld [vmem:[#allocation15_spill] sm:$0xff] }
 0x12c   : > { %v2704_v58 = vpop.permute.xlu1 %2703  ;;  %v2709_v15 = vpop.permute.xlu0 %2708  ;;  %v1407_v17 = vsel %vm1389_vm4, %v4523_v16, %v2371_v2  ;;  %v1406_v42 = vsel %vm1389_vm4, %v4524_v26, %v2370_v59 }
 0x12d   : > { %v2711_v61 = vunpack.i.h.bf16 %v2709_v15  ;;  %v2710_v50 = vunpack.i.l.bf16 %v2709_v15  ;;  %v2705_v60 = vunpack.i.l.bf16 %v2704_v58  ;;  %v2706_v34 = vunpack.i.h.bf16 %v2704_v58  ;;  %v4525_v15 = vld [vmem:[#allocation17_spill] sm:$0xff] }
 0x12e   : > { %v1409_v13 = vsel %vm1389_vm4, %v4525_v15, %v2376_v35  ;;  %v1439_v24 = vsel %vm1422_vm5, %v1406_v42, %v2450_v46  ;;  %v1440_v28 = vsel %vm1422_vm5, %v1407_v17, %v2451_v41 }
 0x12f   : > { %v1600_v45 = vsel %vm1587_vm10, %v1567_v29, %v2710_v50  ;;  %v1601_v27 = vsel %vm1587_vm10, %v1568_v43, %v2711_v61  ;;  %v1569_v1 = vsel %vm1554_vm9, %v1536_v49, %v2705_v60  ;;  %v1570_v52 = vsel %vm1554_vm9, %v1537_v7, %v2706_v34  ;;  %v4526_v50 = vld [vmem:[#allocation18_spill] sm:$0xff] }
 0x130   : > { %v2714_v5 = vpop.permute.xlu1 %2713  ;;  %v2719_v25 = vpop.permute.xlu0 %2718  ;;  %v1408_v38 = vsel %vm1389_vm4, %v4526_v50, %v2375_v10  ;;  %v1442_v60 = vsel %vm1422_vm5, %v1409_v13, %v2456_v48 }
 0x131   : > { %v2716_v14 = vunpack.i.h.bf16 %v2714_v5  ;;  %v2715_v4 = vunpack.i.l.bf16 %v2714_v5  ;;  %v2721_v40 = vunpack.i.h.bf16 %v2719_v25  ;;  %v2720_v21 = vunpack.i.l.bf16 %v2719_v25 }
 0x132   : > { %v1441_v5 = vsel %vm1422_vm5, %v1408_v38, %v2455_v32 }
 0x133   : > { %v1633_v18 = vsel %vm1620_vm11, %v1600_v45, %v2720_v21  ;;  %v1634_v11 = vsel %vm1620_vm11, %v1601_v27, %v2721_v40  ;;  %v1602_v9 = vsel %vm1587_vm10, %v1569_v1, %v2715_v4  ;;  %v1603_v12 = vsel %vm1587_vm10, %v1570_v52, %v2716_v14 }
 0x134   : > { %v2724_v19 = vpop.permute.xlu1 %2723  ;;  %v1659_v47 = vpack.c.bf16 %v1634_v11, %v1633_v18  ;;  %v2729_v62 = vpop.permute.xlu0 %2728 }
 0x135   : > { %v2726_v51 = vunpack.i.h.bf16 %v2724_v19  ;;  %v2725_v55 = vunpack.i.l.bf16 %v2724_v19  ;;  %v2730_v54 = vunpack.i.l.bf16 %v2729_v62  ;;  %v2731_v36 = vunpack.i.h.bf16 %v2729_v62 }
 0x136   : > { %2282 = vmatprep.mubr.msk.bf16.mxu0 %vm1689_vm12, %v1659_v47 }
 0x137   : > { %v1635_v44 = vsel %vm1620_vm11, %v1602_v9, %v2725_v55  ;;  %v1636_v53 = vsel %vm1620_vm11, %v1603_v12, %v2726_v51  ;;  %v1472_v63 = vsel %vm1455_vm6, %v1439_v24, %v2730_v54  ;;  %v1473_v25 = vsel %vm1455_vm6, %v1440_v28, %v2731_v36  ;;  %v4529_v24 = vld [vmem:[#allocation37_spill] sm:$0xff] }
 0x138   : > { %v1660_v56 = vpack.c.bf16 %v1636_v53, %v1635_v44  ;;  %v2734_v6 = vpop.permute.xlu1 %2733  ;;  %v2739_v8 = vpop.permute.xlu0 %2738  ;;  %v2461_v28 = vunpack.i.h.bf16 %v4529_v24 }
 0x139   : > { %v2736_v31 = vunpack.i.h.bf16 %v2734_v6  ;;  %v2735_v3 = vunpack.i.l.bf16 %v2734_v6  ;;  %v2741_v37 = vunpack.i.h.bf16 %v2739_v8  ;;  %v2740_v61 = vunpack.i.l.bf16 %v2739_v8 }
 0x13a   : > { %2283 = vmatmul.mubr.msk.bf16.gmra.mrb[12].mxu0 %vm1689_vm12, %v1660_v56 }
 0x13b   : > { %v1475_v57 = vsel %vm1455_vm6, %v1442_v60, %v2736_v31  ;;  %v1474_v49 = vsel %vm1455_vm6, %v1441_v5, %v2735_v3  ;;  %v1505_v45 = vsel %vm1488_vm7, %v1472_v63, %v2740_v61  ;;  %v1506_v27 = vsel %vm1488_vm7, %v1473_v25, %v2741_v37  ;;  %v4528_v37 = vld [vmem:[#allocation10_spill] sm:$0xff]  ;;  %v4530_v5 = vld [vmem:[#allocation25_spill] sm:$0xff]  ;;  %v4531_v25 = vld [vmem:[#allocation20_spill] sm:$0xff] }
 0x13c   : > { %v2744_v33 = vpop.permute.xlu1 %2743  ;;  %v2749_v23 = vpop.permute.xlu0 %2748  ;;  %v2386_v61 = vunpack.i.h.bf16 %v4528_v37  ;;  %v2385_v38 = vunpack.i.l.bf16 %v4528_v37  ;;  %v2460_v60 = vunpack.i.l.bf16 %v4529_v24  ;;  %v2466_v63 = vunpack.i.h.bf16 %v4530_v5 }
 0x13d   : > { %v2751_v29 = vunpack.i.h.bf16 %v2749_v23  ;;  %v2750_v43 = vunpack.i.l.bf16 %v2749_v23  ;;  %v2745_v14 = vunpack.i.l.bf16 %v2744_v33  ;;  %v2746_v7 = vunpack.i.h.bf16 %v2744_v33 }
 0x13f   : > { %v1538_v19 = vsel %vm1521_vm8, %v1505_v45, %v2750_v43  ;;  %v1539_v52 = vsel %vm1521_vm8, %v1506_v27, %v2751_v29  ;;  %v1507_v62 = vsel %vm1488_vm7, %v1474_v49, %v2745_v14  ;;  %v1508_v0 = vsel %vm1488_vm7, %v1475_v57, %v2746_v7 }
 0x140   : > { %v2754_v58 = vpop.permute.xlu1 %2753  ;;  %v2759_v22 = vpop.permute.xlu0 %2758  ;;  %v2465_v29 = vunpack.i.l.bf16 %v4530_v5 }
 0x141   : > { %v2761_v4 = vunpack.i.h.bf16 %v2759_v22  ;;  %v2760_v40 = vunpack.i.l.bf16 %v2759_v22  ;;  %v2755_v1 = vunpack.i.l.bf16 %v2754_v58  ;;  %v2756_v47 = vunpack.i.h.bf16 %v2754_v58  ;;  %v4527_v22 = vld [vmem:[#allocation7_spill] sm:$0xff] }
 0x142   : > { %v2381_v31 = vunpack.i.h.bf16 %v4527_v22  ;;  %v2380_v3 = vunpack.i.l.bf16 %v4527_v22 }
 0x143   : > { %v1571_v9 = vsel %vm1554_vm9, %v1538_v19, %v2760_v40  ;;  %v1572_v12 = vsel %vm1554_vm9, %v1539_v52, %v2761_v4  ;;  %v1540_v2 = vsel %vm1521_vm8, %v1507_v62, %v2755_v1  ;;  %v1541_v35 = vsel %vm1521_vm8, %v1508_v0, %v2756_v47  ;;  %v4532_v4 = vld [vmem:[#allocation21_spill] sm:$0xff] }
 0x144   : > { %v2764_v34 = vpop.permute.xlu1 %2763  ;;  %v2769_v21 = vpop.permute.xlu0 %2768  ;;  %v1411_v14 = vsel %vm1389_vm4, %v4531_v25, %v2381_v31  ;;  %v1410_v40 = vsel %vm1389_vm4, %v4532_v4, %v2380_v3 }
 0x145   : > { %v2771_v18 = vunpack.i.h.bf16 %v2769_v21  ;;  %v2770_v11 = vunpack.i.l.bf16 %v2769_v21  ;;  %v2765_v51 = vunpack.i.l.bf16 %v2764_v34  ;;  %v2766_v44 = vunpack.i.h.bf16 %v2764_v34  ;;  %v4533_v21 = vld [vmem:[#allocation23_spill] sm:$0xff] }
 0x146   : > { %v1413_v57 = vsel %vm1389_vm4, %v4533_v21, %v2386_v61  ;;  %v1443_v52 = vsel %vm1422_vm5, %v1410_v40, %v2460_v60  ;;  %v1444_v47 = vsel %vm1422_vm5, %v1411_v14, %v2461_v28 }
 0x147   : > { %v1604_v59 = vsel %vm1587_vm10, %v1571_v9, %v2770_v11  ;;  %v1605_v30 = vsel %vm1587_vm10, %v1572_v12, %v2771_v18  ;;  %v1573_v23 = vsel %vm1554_vm9, %v1540_v2, %v2765_v51  ;;  %v1574_v46 = vsel %vm1554_vm9, %v1541_v35, %v2766_v44  ;;  %v4534_v11 = vld [vmem:[#allocation24_spill] sm:$0xff] }
 0x148   : > { %v2774_v55 = vpop.permute.xlu1 %2773  ;;  %v2779_v53 = vpop.permute.xlu0 %2778  ;;  %v1412_v19 = vsel %vm1389_vm4, %v4534_v11, %v2385_v38  ;;  %v1446_v51 = vsel %vm1422_vm5, %v1413_v57, %v2466_v63 }
 0x149   : > { %v2776_v56 = vunpack.i.h.bf16 %v2774_v55  ;;  %v2775_v6 = vunpack.i.l.bf16 %v2774_v55  ;;  %v2781_v8 = vunpack.i.h.bf16 %v2779_v53  ;;  %v2780_v33 = vunpack.i.l.bf16 %v2779_v53 }
 0x14a   : > { %v1445_v55 = vsel %vm1422_vm5, %v1412_v19, %v2465_v29 }
 0x14b   : > { %v1637_v20 = vsel %vm1620_vm11, %v1604_v59, %v2780_v33  ;;  %v1638_v41 = vsel %vm1620_vm11, %v1605_v30, %v2781_v8  ;;  %v1606_v58 = vsel %vm1587_vm10, %v1573_v23, %v2775_v6  ;;  %v1607_v16 = vsel %vm1587_vm10, %v1574_v46, %v2776_v56 }
 0x14c   : > { %v2784_v10 = vpop.permute.xlu1 %2783  ;;  %v2789_v32 = vpop.permute.xlu0 %2788  ;;  %v1661_v54 = vpack.c.bf16 %v1638_v41, %v1637_v20 }
 0x14d   : > { %v2786_v39 = vunpack.i.h.bf16 %v2784_v10  ;;  %v2785_v48 = vunpack.i.l.bf16 %v2784_v10  ;;  %v2790_v43 = vunpack.i.l.bf16 %v2789_v32  ;;  %v2791_v49 = vunpack.i.h.bf16 %v2789_v32 }
 0x14e   : > { %2286 = vmatprep.mubr.msk.bf16.mxu1 %vm1689_vm12, %v1661_v54 }
 0x14f   : > { %v1639_v17 = vsel %vm1620_vm11, %v1606_v58, %v2785_v48  ;;  %v1640_v26 = vsel %vm1620_vm11, %v1607_v16, %v2786_v39  ;;  %v1476_v62 = vsel %vm1455_vm6, %v1443_v52, %v2790_v43  ;;  %v1477_v53 = vsel %vm1455_vm6, %v1444_v47, %v2791_v49  ;;  %v4537_v52 = vld [vmem:[#allocation38_spill] sm:$0xff] }
 0x150   : > { %v1662_v42 = vpack.c.bf16 %v1640_v26, %v1639_v17  ;;  %v2794_v15 = vpop.permute.xlu1 %2793  ;;  %v2799_v13 = vpop.permute.xlu0 %2798  ;;  %v2471_v47 = vunpack.i.h.bf16 %v4537_v52 }
 0x151   : > { %v2796_v27 = vunpack.i.h.bf16 %v2794_v15  ;;  %v2795_v7 = vunpack.i.l.bf16 %v2794_v15  ;;  %v2801_v1 = vunpack.i.h.bf16 %v2799_v13  ;;  %v2800_v18 = vunpack.i.l.bf16 %v2799_v13 }
 0x152   : > { %2287 = vmatmul.mubr.msk.bf16.vlgmr.msra.gmra.mrb[0].mxu1 %vm1689_vm12, %v1662_v42 }
 0x153   : > { %v1479_v0 = vsel %vm1455_vm6, %v1446_v51, %v2796_v27  ;;  %v1478_v2 = vsel %vm1455_vm6, %v1445_v55, %v2795_v7  ;;  %v1509_v59 = vsel %vm1488_vm7, %v1476_v62, %v2800_v18  ;;  %v1510_v30 = vsel %vm1488_vm7, %v1477_v53, %v2801_v1  ;;  %v4536_v1 = vld [vmem:[#allocation16_spill] sm:$0xff]  ;;  %v4538_v55 = vld [vmem:[#allocation39_spill] sm:$0xff] }
 0x154   : > { %v2804_v36 = vpop.permute.xlu1 %2803  ;;  %v2809_v50 = vpop.permute.xlu0 %2808  ;;  %v2396_v18 = vunpack.i.h.bf16 %v4536_v1  ;;  %v2395_v19 = vunpack.i.l.bf16 %v4536_v1  ;;  %v2470_v51 = vunpack.i.l.bf16 %v4537_v52  ;;  %v2476_v62 = vunpack.i.h.bf16 %v4538_v55  ;;  %v4539_v53 = vld [vmem:[#allocation27_spill] sm:$0xff] }
 0x155   : > { %v2811_v9 = vunpack.i.h.bf16 %v2809_v50  ;;  %v2810_v12 = vunpack.i.l.bf16 %v2809_v50  ;;  %v2805_v56 = vunpack.i.l.bf16 %v2804_v36  ;;  %v2806_v35 = vunpack.i.h.bf16 %v2804_v36 }
 0x157   : > { %v1542_v41 = vsel %vm1521_vm8, %v1509_v59, %v2810_v12  ;;  %v1543_v46 = vsel %vm1521_vm8, %v1510_v30, %v2811_v9  ;;  %v1511_v54 = vsel %vm1488_vm7, %v1478_v2, %v2805_v56  ;;  %v1512_v22 = vsel %vm1488_vm7, %v1479_v0, %v2806_v35 }
 0x158   : > { %v2814_v34 = vpop.permute.xlu1 %2813  ;;  %v2819_v45 = vpop.permute.xlu0 %2818  ;;  %v2475_v9 = vunpack.i.l.bf16 %v4538_v55 }
 0x159   : > { %v2821_v6 = vunpack.i.h.bf16 %v2819_v45  ;;  %v2820_v8 = vunpack.i.l.bf16 %v2819_v45  ;;  %v2815_v23 = vunpack.i.l.bf16 %v2814_v34  ;;  %v2816_v39 = vunpack.i.h.bf16 %v2814_v34  ;;  %v4535_v45 = vld [vmem:[#allocation13_spill] sm:$0xff] }
 0x15a   : > { %v2391_v27 = vunpack.i.h.bf16 %v4535_v45  ;;  %v2390_v7 = vunpack.i.l.bf16 %v4535_v45 }
 0x15b   : > { %v1575_v58 = vsel %vm1554_vm9, %v1542_v41, %v2820_v8  ;;  %v1576_v16 = vsel %vm1554_vm9, %v1543_v46, %v2821_v6  ;;  %v1544_v31 = vsel %vm1521_vm8, %v1511_v54, %v2815_v23  ;;  %v1545_v61 = vsel %vm1521_vm8, %v1512_v22, %v2816_v39  ;;  %v4540_v6 = vld [vmem:[#allocation26_spill] sm:$0xff] }
 0x15c   : > { %v2824_v44 = vpop.permute.xlu1 %2823  ;;  %v2829_v33 = vpop.permute.xlu0 %2828  ;;  %v1415_v56 = vsel %vm1389_vm4, %v4539_v53, %v2391_v27  ;;  %v1414_v8 = vsel %vm1389_vm4, %v4540_v6, %v2390_v7 }
 0x15d   : > { %v2831_v10 = vunpack.i.h.bf16 %v2829_v33  ;;  %v2830_v20 = vunpack.i.l.bf16 %v2829_v33  ;;  %v2825_v48 = vunpack.i.l.bf16 %v2824_v44  ;;  %v2826_v17 = vunpack.i.h.bf16 %v2824_v44  ;;  %v4541_v33 = vld [vmem:[#allocation29_spill] sm:$0xff] }
 0x15e   : > { %v1417_v0 = vsel %vm1389_vm4, %v4541_v33, %v2396_v18  ;;  %v1447_v46 = vsel %vm1422_vm5, %v1414_v8, %v2470_v51  ;;  %v1448_v39 = vsel %vm1422_vm5, %v1415_v56, %v2471_v47 }
 0x15f   : > { %v1608_v3 = vsel %vm1587_vm10, %v1575_v58, %v2830_v20  ;;  %v1609_v37 = vsel %vm1587_vm10, %v1576_v16, %v2831_v10  ;;  %v1577_v50 = vsel %vm1554_vm9, %v1544_v31, %v2825_v48  ;;  %v1578_v60 = vsel %vm1554_vm9, %v1545_v61, %v2826_v17  ;;  %v4542_v20 = vld [vmem:[#allocation30_spill] sm:$0xff] }
 0x160   : > { %v2834_v32 = vpop.permute.xlu1 %2833  ;;  %v2839_v26 = vpop.permute.xlu0 %2838  ;;  %v1416_v41 = vsel %vm1389_vm4, %v4542_v20, %v2395_v19  ;;  %v1450_v48 = vsel %vm1422_vm5, %v1417_v0, %v2476_v62 }
 0x161   : > { %v2836_v42 = vunpack.i.h.bf16 %v2834_v32  ;;  %v2835_v15 = vunpack.i.l.bf16 %v2834_v32  ;;  %v2841_v13 = vunpack.i.h.bf16 %v2839_v26  ;;  %v2840_v36 = vunpack.i.l.bf16 %v2839_v26 }
 0x162   : > { %v1449_v32 = vsel %vm1422_vm5, %v1416_v41, %v2475_v9 }
 0x163   : > { %v1641_v38 = vsel %vm1620_vm11, %v1608_v3, %v2840_v36  ;;  %v1642_v24 = vsel %vm1620_vm11, %v1609_v37, %v2841_v13  ;;  %v1610_v34 = vsel %vm1587_vm10, %v1577_v50, %v2835_v15  ;;  %v1611_v25 = vsel %vm1587_vm10, %v1578_v60, %v2836_v42 }
 0x164   : > { %v2844_v28 = vpop.permute.xlu1 %2843  ;;  %v1663_v5 = vpack.c.bf16 %v1642_v24, %v1641_v38  ;;  %v2849_v43 = vpop.permute.xlu0 %2848 }
 0x165   : > { %v2846_v63 = vunpack.i.h.bf16 %v2844_v28  ;;  %v2845_v29 = vunpack.i.l.bf16 %v2844_v28  ;;  %v2850_v12 = vunpack.i.l.bf16 %v2849_v43  ;;  %v2851_v2 = vunpack.i.h.bf16 %v2849_v43 }
 0x166   : > { %2290 = vmatprep.mubr.msk.bf16.mxu1 %vm1689_vm12, %v1663_v5 }
 0x167   : > { %v1643_v14 = vsel %vm1620_vm11, %v1610_v34, %v2845_v29  ;;  %v1644_v4 = vsel %vm1620_vm11, %v1611_v25, %v2846_v63  ;;  %v1480_v54 = vsel %vm1455_vm6, %v1447_v46, %v2850_v12  ;;  %v1481_v26 = vsel %vm1455_vm6, %v1448_v39, %v2851_v2 }
 0x168   : > { %v1664_v40 = vpack.c.bf16 %v1644_v4, %v1643_v14  ;;  %v2854_v21 = vpop.permute.xlu1 %2853  ;;  %v2859_v57 = vpop.permute.xlu0 %2858 }
 0x169   : > { %v2856_v30 = vunpack.i.h.bf16 %v2854_v21  ;;  %v2855_v35 = vunpack.i.l.bf16 %v2854_v21  ;;  %v2861_v23 = vunpack.i.h.bf16 %v2859_v57  ;;  %v2860_v10 = vunpack.i.l.bf16 %v2859_v57 }
 0x16a   : > { %2291 = vmatmul.mubr.msk.bf16.gmra.mrb[4].mxu1 %vm1689_vm12, %v1664_v40 }
 0x16b   : > { %v1483_v22 = vsel %vm1455_vm6, %v1450_v48, %v2856_v30  ;;  %v1482_v31 = vsel %vm1455_vm6, %v1449_v32, %v2855_v35  ;;  %v1513_v3 = vsel %vm1488_vm7, %v1480_v54, %v2860_v10  ;;  %v1514_v37 = vsel %vm1488_vm7, %v1481_v26, %v2861_v23  ;;  %v4543_v48 = vld [vmem:[#allocation40_spill] sm:$0xff] }
 0x16c   : > { %v2864_v49 = vpop.permute.xlu1 %2863 }
 0x16d   : > { %v2869_v11 = vpop.permute.xlu0 %2868  ;;  %v2865_v42 = vunpack.i.l.bf16 %v2864_v49  ;;  %v2866_v61 = vunpack.i.h.bf16 %v2864_v49 }
 0x16e   : > { %v2871_v58 = vunpack.i.h.bf16 %v2869_v11  ;;  %v2870_v16 = vunpack.i.l.bf16 %v2869_v11 }
 0x16f   : > { %v1515_v43 = vsel %vm1488_vm7, %v1482_v31, %v2865_v42  ;;  %v1516_v45 = vsel %vm1488_vm7, %v1483_v22, %v2866_v61  ;;  %v4545_v22 = vld [vmem:[#allocation28_spill] sm:$0xff] }
 0x170   : > { %v2874_v44 = vpop.permute.xlu1 %2873  ;;  %v1546_v28 = vsel %vm1521_vm8, %v1513_v3, %v2870_v16  ;;  %v1547_v60 = vsel %vm1521_vm8, %v1514_v37, %v2871_v58  ;;  %v4546_v3 = vld [vmem:[#allocation42_spill] sm:$0xff] }
 0x171   : > { %v2879_v59 = vpop.permute.xlu0 %2878  ;;  %v2875_v50 = vunpack.i.l.bf16 %v2874_v44  ;;  %v2876_v5 = vunpack.i.h.bf16 %v2874_v44 }
 0x172   : > { %v2881_v15 = vunpack.i.h.bf16 %v2879_v59  ;;  %v2880_v13 = vunpack.i.l.bf16 %v2879_v59 }
 0x173   : > { %v1548_v27 = vsel %vm1521_vm8, %v1515_v43, %v2875_v50  ;;  %v1549_v18 = vsel %vm1521_vm8, %v1516_v45, %v2876_v5 }
 0x174   : > { %v2884_v17 = vpop.permute.xlu1 %2883  ;;  %v1579_v34 = vsel %vm1554_vm9, %v1546_v28, %v2880_v13  ;;  %v1580_v25 = vsel %vm1554_vm9, %v1547_v60, %v2881_v15 }
 0x175   : > { %v2889_v36 = vpop.permute.xlu0 %2888  ;;  %v2885_v63 = vunpack.i.l.bf16 %v2884_v17  ;;  %v2886_v14 = vunpack.i.h.bf16 %v2884_v17  ;;  %v4544_v17 = vld [vmem:[#allocation41_spill] sm:$0xff] }
 0x176   : > { %v2891_v38 = vunpack.i.h.bf16 %v2889_v36  ;;  %v2890_v24 = vunpack.i.l.bf16 %v2889_v36 }
 0x177   : > { %v1581_v11 = vsel %vm1554_vm9, %v1548_v27, %v2885_v63  ;;  %v1582_v51 = vsel %vm1554_vm9, %v1549_v18, %v2886_v14 }
 0x178   : > { %v2894_v29 = vpop.permute.xlu1 %2893  ;;  %v1612_v7 = vsel %vm1587_vm10, %v1579_v34, %v2890_v24  ;;  %v1613_v1 = vsel %vm1587_vm10, %v1580_v25, %v2891_v38 }
 0x179   : > { %v2899_v4 = vpop.permute.xlu0 %2898  ;;  %v2896_v40 = vunpack.i.h.bf16 %v2894_v29  ;;  %v2895_v21 = vunpack.i.l.bf16 %v2894_v29 }
 0x17a   : > { %v2901_v57 = vunpack.i.h.bf16 %v2899_v4  ;;  %v2900_v49 = vunpack.i.l.bf16 %v2899_v4 }
 0x17b   : > { %v1614_v44 = vsel %vm1587_vm10, %v1581_v11, %v2895_v21  ;;  %v1615_v53 = vsel %vm1587_vm10, %v1582_v51, %v2896_v40 }
 0x17c   : > { %v1645_v19 = vsel %vm1620_vm11, %v1612_v7, %v2900_v49  ;;  %v1646_v52 = vsel %vm1620_vm11, %v1613_v1, %v2901_v57  ;;  %v2904_v47 = vpop.permute.xlu1 %2903 }
 0x17d   : > { %v1665_v55 = vpack.c.bf16 %v1646_v52, %v1645_v19  ;;  %v2906_v62 = vunpack.i.h.bf16 %v2904_v47  ;;  %v2905_v9 = vunpack.i.l.bf16 %v2904_v47  ;;  %v2909_v12 = vpop.permute.xlu0 %2908 }
 0x17e   : > { %v2910_v30 = vunpack.i.l.bf16 %v2909_v12  ;;  %v2911_v23 = vunpack.i.h.bf16 %v2909_v12 }
 0x17f   : > { %v1647_v56 = vsel %vm1620_vm11, %v1614_v44, %v2905_v9  ;;  %v1648_v6 = vsel %vm1620_vm11, %v1615_v53, %v2906_v62  ;;  %2294 = vmatprep.mubr.msk.bf16.mxu1 %vm1689_vm12, %v1665_v55 }
 0x180   : > { %v1666_v8 = vpack.c.bf16 %v1648_v6, %v1647_v56  ;;  %v2914_v33 = vpop.permute.xlu1 %2913  ;;  %v1484_v32 = vsel %vm1455_vm6, %v4543_v48, %v2910_v30  ;;  %v1485_v26 = vsel %vm1455_vm6, %v4544_v17, %v2911_v23 }
 0x181   : > { %v2919_v0 = vpop.permute.xlu0 %2918  ;;  %v2916_v20 = vunpack.i.h.bf16 %v2914_v33  ;;  %v2915_v41 = vunpack.i.l.bf16 %v2914_v33 }
 0x182   : > { %2295 = vmatmul.mubr.msk.bf16.gmra.mrb[8].mxu1 %vm1689_vm12, %v1666_v8  ;;  %v2921_v46 = vunpack.i.h.bf16 %v2919_v0  ;;  %v2920_v39 = vunpack.i.l.bf16 %v2919_v0 }
 0x183   : > { %v1487_v31 = vsel %vm1455_vm6, %v4545_v22, %v2916_v20  ;;  %v1486_v37 = vsel %vm1455_vm6, %v4546_v3, %v2915_v41 }
 0x184   : > { %v2924_v2 = vpop.permute.xlu1 %2923  ;;  %v1517_v61 = vsel %vm1488_vm7, %v1484_v32, %v2920_v39  ;;  %v1518_v50 = vsel %vm1488_vm7, %v1485_v26, %v2921_v46 }
 0x185   : > { %v2929_v59 = vpop.permute.xlu0 %2928  ;;  %v2925_v42 = vunpack.i.l.bf16 %v2924_v2  ;;  %v2926_v38 = vunpack.i.h.bf16 %v2924_v2 }
 0x186   : > { %v2931_v54 = vunpack.i.h.bf16 %v2929_v59  ;;  %v2930_v58 = vunpack.i.l.bf16 %v2929_v59 }
 0x187   : > { %v1519_v25 = vsel %vm1488_vm7, %v1486_v37, %v2925_v42  ;;  %v1520_v7 = vsel %vm1488_vm7, %v1487_v31, %v2926_v38 }
 0x188   : > { %v2934_v35 = vpop.permute.xlu1 %2933  ;;  %v1550_v5 = vsel %vm1521_vm8, %v1517_v61, %v2930_v58  ;;  %v1551_v63 = vsel %vm1521_vm8, %v1518_v50, %v2931_v54 }
 0x189   : > { %v2939_v10 = vpop.permute.xlu0 %2938  ;;  %v2935_v24 = vunpack.i.l.bf16 %v2934_v35  ;;  %v2936_v29 = vunpack.i.h.bf16 %v2934_v35 }
 0x18a   : > { %v2941_v15 = vunpack.i.h.bf16 %v2939_v10  ;;  %v2940_v13 = vunpack.i.l.bf16 %v2939_v10 }
 0x18b   : > { %v1552_v1 = vsel %vm1521_vm8, %v1519_v25, %v2935_v24  ;;  %v1553_v19 = vsel %vm1521_vm8, %v1520_v7, %v2936_v29 }
 0x18c   : > { %v2944_v16 = vpop.permute.xlu1 %2943  ;;  %v1583_v14 = vsel %vm1554_vm9, %v1550_v5, %v2940_v13  ;;  %v1584_v4 = vsel %vm1554_vm9, %v1551_v63, %v2941_v15 }
 0x18d   : > { %v2949_v36 = vpop.permute.xlu0 %2948  ;;  %v2945_v43 = vunpack.i.l.bf16 %v2944_v16  ;;  %v2946_v40 = vunpack.i.h.bf16 %v2944_v16 }
 0x18e   : > { %v2951_v28 = vunpack.i.h.bf16 %v2949_v36  ;;  %v2950_v60 = vunpack.i.l.bf16 %v2949_v36 }
 0x18f   : > { %v1585_v52 = vsel %vm1554_vm9, %v1552_v1, %v2945_v43  ;;  %v1586_v62 = vsel %vm1554_vm9, %v1553_v19, %v2946_v40 }
 0x190   : > { %v2954_v34 = vpop.permute.xlu1 %2953  ;;  %v1616_v18 = vsel %vm1587_vm10, %v1583_v14, %v2950_v60  ;;  %v1617_v11 = vsel %vm1587_vm10, %v1584_v4, %v2951_v28 }
 0x191   : > { %v2959_v21 = vpop.permute.xlu0 %2958  ;;  %v2956_v57 = vunpack.i.h.bf16 %v2954_v34  ;;  %v2955_v49 = vunpack.i.l.bf16 %v2954_v34 }
 0x192   : > { %v2961_v45 = vunpack.i.h.bf16 %v2959_v21  ;;  %v2960_v27 = vunpack.i.l.bf16 %v2959_v21 }
 0x193   : > { %v1618_v53 = vsel %vm1587_vm10, %v1585_v52, %v2955_v49  ;;  %v1619_v56 = vsel %vm1587_vm10, %v1586_v62, %v2956_v57 }
 0x194   : > { %v1649_v47 = vsel %vm1620_vm11, %v1616_v18, %v2960_v27  ;;  %v1650_v51 = vsel %vm1620_vm11, %v1617_v11, %v2961_v45  ;;  %v2964_v55 = vpop.permute.xlu1 %2963 }
 0x195   : > { %v1667_v9 = vpack.c.bf16 %v1650_v51, %v1649_v47  ;;  %v2966_v12 = vunpack.i.h.bf16 %v2964_v55  ;;  %v2965_v44 = vunpack.i.l.bf16 %v2964_v55 }
 0x197   : > { %v1651_v6 = vsel %vm1620_vm11, %v1618_v53, %v2965_v44  ;;  %v1652_v8 = vsel %vm1620_vm11, %v1619_v56, %v2966_v12  ;;  %2298 = vmatprep.mubr.msk.bf16.mxu1 %vm1689_vm12, %v1667_v9 }
 0x198   : > { %v1668_v33 = vpack.c.bf16 %v1652_v8, %v1651_v6 }
 0x19a   : > { %2299 = vmatmul.mubr.msk.bf16.gmra.mrb[12].mxu1 %vm1689_vm12, %v1668_v33 }
 0x1ce   : > { %v2272_v0 = vpop.f32.mrb[0].mxu0 }
 0x1cf   : > { %1905 = vst.msk [vmem:[%s4230_s11 + $0x10] sm:$0xff] %vm1389_vm4, %v2272_v0  ;;  %v1776_v2 = vpop.f32.mrb[1].mxu0  ;;  %v2008_v23 = vmul.f32 %v2272_v0, %v2272_v0  ;;  %v1938_v39 = vsel %vm1389_vm4, %v2272_v0, 0.0 }
 0x1d0   : > { %1903 = vst.msk [vmem:[%s4230_s11] sm:$0xff] %vm1389_vm4, %v1776_v2  ;;  %v2006_v59 = vmul.f32 %v1776_v2, %v1776_v2  ;;  %v2273_v30 = vpop.f32.mrb[2].mxu0  ;;  %v1935_v10 = vsel %vm1389_vm4, %v1776_v2, 0.0 }
 0x1d1   : > { %1906 = vst.msk [vmem:[%s4230_s11 + $0x18] sm:$0xff] %vm1389_vm4, %v2273_v30  ;;  %v1779_v35 = vpop.f32.mrb[3].mxu0  ;;  %v2009_v32 = vmul.f32 %v2273_v30, %v2273_v30  ;;  %v2041_v17 = vsel %vm1389_vm4, %v2008_v23, 0.0  ;;  %v1940_v26 = vsel %vm1389_vm4, %v2273_v30, 0.0 }
 0x1d2   : > { %1904 = vst.msk [vmem:[%s4230_s11 + $0x8] sm:$0xff] %vm1389_vm4, %v1779_v35  ;;  %v1936_v20 = vsel %vm1389_vm4, %v1779_v35, 0.0  ;;  %v2007_v41 = vmul.f32 %v1779_v35, %v1779_v35  ;;  %v2038_v48 = vsel %vm1389_vm4, %v2006_v59, 0.0 }
 0x1d3   : > { %v1937_v46 = vadd.f32 %v1936_v20, %v1935_v10  ;;  %v2043_v13 = vsel %vm1389_vm4, %v2009_v32, 0.0 }
 0x1d4   : > { %v2039_v54 = vsel %vm1389_vm4, %v2007_v41, 0.0 }
 0x1d5   : > { %v1939_v58 = vadd.f32 %v1938_v39, %v1937_v46  ;;  %v2040_v16 = vadd.f32 %v2039_v54, %v2038_v48 }
 0x1d7   : > { %v2042_v42 = vadd.f32 %v2041_v17, %v2040_v16  ;;  %v1941_v15 = vadd.f32 %v1940_v26, %v1939_v58 }
 0x1d9   : > { %v2044_v36 = vadd.f32 %v2043_v13, %v2042_v42 }
 0x1e2   : > { %v2276_v22 = vpop.f32.mrb[4].mxu0 }
 0x1e3   : > { %1909 = vst.msk [vmem:[%s4230_s11 + $0x30] sm:$0xff] %vm1389_vm4, %v2276_v22  ;;  %v1792_v31 = vpop.f32.mrb[5].mxu0  ;;  %v2012_v24 = vmul.f32 %v2276_v22, %v2276_v22  ;;  %v1946_v43 = vsel %vm1389_vm4, %v2276_v22, 0.0 }
 0x1e4   : > { %1907 = vst.msk [vmem:[%s4230_s11 + $0x20] sm:$0xff] %vm1389_vm4, %v1792_v31  ;;  %v1942_v3 = vsel %vm1389_vm4, %v1792_v31, 0.0  ;;  %v2010_v37 = vmul.f32 %v1792_v31, %v1792_v31  ;;  %v2277_v61 = vpop.f32.mrb[6].mxu0 }
 0x1e5   : > { %v1943_v50 = vadd.f32 %v1942_v3, %v1941_v15  ;;  %1910 = vst.msk [vmem:[%s4230_s11 + $0x38] sm:$0xff] %vm1389_vm4, %v2277_v61  ;;  %v1795_v38 = vpop.f32.mrb[7].mxu0  ;;  %v2013_v34 = vmul.f32 %v2277_v61, %v2277_v61  ;;  %v2049_v40 = vsel %vm1389_vm4, %v2012_v24, 0.0  ;;  %v1948_v21 = vsel %vm1389_vm4, %v2277_v61, 0.0 }
 0x1e6   : > { %v2045_v28 = vsel %vm1389_vm4, %v2010_v37, 0.0  ;;  %1908 = vst.msk [vmem:[%s4230_s11 + $0x28] sm:$0xff] %vm1389_vm4, %v1795_v38  ;;  %v1944_v60 = vsel %vm1389_vm4, %v1795_v38, 0.0  ;;  %v2011_v5 = vmul.f32 %v1795_v38, %v1795_v38 }
 0x1e7   : > { %v2046_v63 = vadd.f32 %v2045_v28, %v2044_v36  ;;  %v1945_v29 = vadd.f32 %v1944_v60, %v1943_v50  ;;  %v2051_v45 = vsel %vm1389_vm4, %v2013_v34, 0.0 }
 0x1e8   : > { %v2047_v25 = vsel %vm1389_vm4, %v2011_v5, 0.0 }
 0x1e9   : > { %v1947_v14 = vadd.f32 %v1946_v43, %v1945_v29  ;;  %v2048_v4 = vadd.f32 %v2047_v25, %v2046_v63 }
 0x1eb   : > { %v2050_v57 = vadd.f32 %v2049_v40, %v2048_v4  ;;  %v1949_v49 = vadd.f32 %v1948_v21, %v1947_v14 }
 0x1ed   : > { %v2052_v27 = vadd.f32 %v2051_v45, %v2050_v57 }
 0x1f6   : > { %v2280_v7 = vpop.f32.mrb[8].mxu0 }
 0x1f7   : > { %1913 = vst.msk [vmem:[%s4230_s11 + $0x50] sm:$0xff] %vm1389_vm4, %v2280_v7  ;;  %v1808_v1 = vpop.f32.mrb[9].mxu0  ;;  %v2016_v51 = vmul.f32 %v2280_v7, %v2280_v7  ;;  %v1954_v53 = vsel %vm1389_vm4, %v2280_v7, 0.0 }
 0x1f8   : > { %1911 = vst.msk [vmem:[%s4230_s11 + $0x40] sm:$0xff] %vm1389_vm4, %v1808_v1  ;;  %v1950_v18 = vsel %vm1389_vm4, %v1808_v1, 0.0  ;;  %v2014_v11 = vmul.f32 %v1808_v1, %v1808_v1  ;;  %v2281_v19 = vpop.f32.mrb[10].mxu0 }
 0x1f9   : > { %v1951_v52 = vadd.f32 %v1950_v18, %v1949_v49  ;;  %1914 = vst.msk [vmem:[%s4230_s11 + $0x58] sm:$0xff] %vm1389_vm4, %v2281_v19  ;;  %v1811_v47 = vpop.f32.mrb[11].mxu0  ;;  %v2017_v56 = vmul.f32 %v2281_v19, %v2281_v19  ;;  %v2057_v0 = vsel %vm1389_vm4, %v2016_v51, 0.0  ;;  %v1956_v2 = vsel %vm1389_vm4, %v2281_v19, 0.0 }
 0x1fa   : > { %v2053_v55 = vsel %vm1389_vm4, %v2014_v11, 0.0  ;;  %1912 = vst.msk [vmem:[%s4230_s11 + $0x48] sm:$0xff] %vm1389_vm4, %v1811_v47  ;;  %v1952_v62 = vsel %vm1389_vm4, %v1811_v47, 0.0  ;;  %v2015_v9 = vmul.f32 %v1811_v47, %v1811_v47 }
 0x1fb   : > { %v2054_v12 = vadd.f32 %v2053_v55, %v2052_v27  ;;  %v1953_v44 = vadd.f32 %v1952_v62, %v1951_v52  ;;  %v2059_v35 = vsel %vm1389_vm4, %v2017_v56, 0.0 }
 0x1fc   : > { %v2055_v6 = vsel %vm1389_vm4, %v2015_v9, 0.0 }
 0x1fd   : > { %v1955_v8 = vadd.f32 %v1954_v53, %v1953_v44  ;;  %v2056_v33 = vadd.f32 %v2055_v6, %v2054_v12 }
 0x1ff   : > { %v2058_v59 = vadd.f32 %v2057_v0, %v2056_v33  ;;  %v1957_v30 = vadd.f32 %v1956_v2, %v1955_v8 }
 0x201   : > { %v2060_v23 = vadd.f32 %v2059_v35, %v2058_v59 }
 0x20d   : > { %v2284_v10 = vpop.f32.mrb[12].mxu0 }
 0x20e   : > { %1917 = vst.msk [vmem:[%s4230_s11 + $0x70] sm:$0xff] %vm1389_vm4, %v2284_v10  ;;  %v1824_v20 = vpop.f32.mrb[13].mxu0  ;;  %v2020_v54 = vmul.f32 %v2284_v10, %v2284_v10  ;;  %v1962_v15 = vsel %vm1389_vm4, %v2284_v10, 0.0 }
 0x20f   : > { %1915 = vst.msk [vmem:[%s4230_s11 + $0x60] sm:$0xff] %vm1389_vm4, %v1824_v20  ;;  %v1958_v41 = vsel %vm1389_vm4, %v1824_v20, 0.0  ;;  %v2018_v46 = vmul.f32 %v1824_v20, %v1824_v20  ;;  %v2285_v39 = vpop.f32.mrb[14].mxu0 }
 0x210   : > { %v1959_v48 = vadd.f32 %v1958_v41, %v1957_v30  ;;  %1918 = vst.msk [vmem:[%s4230_s11 + $0x78] sm:$0xff] %vm1389_vm4, %v2285_v39  ;;  %v1827_v32 = vpop.f32.mrb[15].mxu0  ;;  %v2021_v13 = vmul.f32 %v2285_v39, %v2285_v39  ;;  %v2065_v3 = vsel %vm1389_vm4, %v2020_v54, 0.0  ;;  %v1964_v37 = vsel %vm1389_vm4, %v2285_v39, 0.0 }
 0x211   : > { %v2061_v58 = vsel %vm1389_vm4, %v2018_v46, 0.0  ;;  %1916 = vst.msk [vmem:[%s4230_s11 + $0x68] sm:$0xff] %vm1389_vm4, %v1827_v32  ;;  %v1960_v16 = vsel %vm1389_vm4, %v1827_v32, 0.0  ;;  %v2019_v17 = vmul.f32 %v1827_v32, %v1827_v32 }
 0x212   : > { %v2062_v26 = vadd.f32 %v2061_v58, %v2060_v23  ;;  %v1961_v42 = vadd.f32 %v1960_v16, %v1959_v48  ;;  %v2067_v38 = vsel %vm1389_vm4, %v2021_v13, 0.0 }
 0x213   : > { %v2063_v36 = vsel %vm1389_vm4, %v2019_v17, 0.0 }
 0x214   : > { %v1963_v22 = vadd.f32 %v1962_v15, %v1961_v42  ;;  %v2064_v31 = vadd.f32 %v2063_v36, %v2062_v26 }
 0x216   : > { %v2066_v61 = vadd.f32 %v2065_v3, %v2064_v31  ;;  %v1965_v50 = vadd.f32 %v1964_v37, %v1963_v22 }
 0x218   : > { %v2068_v24 = vadd.f32 %v2067_v38, %v2066_v61 }
 0x225   : > { %v2288_v28 = vpop.f32.mrb[0].mxu1 }
 0x226   : > { %1921 = vst.msk [vmem:[%s4230_s11 + $0x90] sm:$0xff] %vm1389_vm4, %v2288_v28  ;;  %v1840_v60 = vpop.f32.mrb[1].mxu1  ;;  %v2024_v25 = vmul.f32 %v2288_v28, %v2288_v28  ;;  %v1970_v49 = vsel %vm1389_vm4, %v2288_v28, 0.0 }
 0x227   : > { %1919 = vst.msk [vmem:[%s4230_s11 + $0x80] sm:$0xff] %vm1389_vm4, %v1840_v60  ;;  %v1966_v5 = vsel %vm1389_vm4, %v1840_v60, 0.0  ;;  %v2022_v63 = vmul.f32 %v1840_v60, %v1840_v60  ;;  %v2289_v29 = vpop.f32.mrb[2].mxu1 }
 0x228   : > { %v1967_v43 = vadd.f32 %v1966_v5, %v1965_v50  ;;  %1922 = vst.msk [vmem:[%s4230_s11 + $0x98] sm:$0xff] %vm1389_vm4, %v2289_v29  ;;  %v1843_v34 = vpop.f32.mrb[3].mxu1  ;;  %v2025_v45 = vmul.f32 %v2289_v29, %v2289_v29  ;;  %v2073_v18 = vsel %vm1389_vm4, %v2024_v25, 0.0  ;;  %v1972_v11 = vsel %vm1389_vm4, %v2289_v29, 0.0 }
 0x229   : > { %v2069_v14 = vsel %vm1389_vm4, %v2022_v63, 0.0  ;;  %1920 = vst.msk [vmem:[%s4230_s11 + $0x88] sm:$0xff] %vm1389_vm4, %v1843_v34  ;;  %v1968_v4 = vsel %vm1389_vm4, %v1843_v34, 0.0  ;;  %v2023_v40 = vmul.f32 %v1843_v34, %v1843_v34 }
 0x22a   : > { %v2070_v21 = vadd.f32 %v2069_v14, %v2068_v24  ;;  %v1969_v57 = vadd.f32 %v1968_v4, %v1967_v43  ;;  %v2075_v47 = vsel %vm1389_vm4, %v2025_v45, 0.0 }
 0x22b   : > { %v2071_v27 = vsel %vm1389_vm4, %v2023_v40, 0.0 }
 0x22c   : > { %v1971_v7 = vadd.f32 %v1970_v49, %v1969_v57  ;;  %v2072_v1 = vadd.f32 %v2071_v27, %v2070_v21 }
 0x22e   : > { %v2074_v19 = vadd.f32 %v2073_v18, %v2072_v1  ;;  %v1973_v52 = vadd.f32 %v1972_v11, %v1971_v7 }
 0x230   : > { %v2076_v51 = vadd.f32 %v2075_v47, %v2074_v19 }
 0x23d   : > { %v2292_v55 = vpop.f32.mrb[4].mxu1 }
 0x23e   : > { %1925 = vst.msk [vmem:[%s4230_s11 + $0xb0] sm:$0xff] %vm1389_vm4, %v2292_v55  ;;  %v1856_v62 = vpop.f32.mrb[5].mxu1  ;;  %v2028_v6 = vmul.f32 %v2292_v55, %v2292_v55  ;;  %v1978_v30 = vsel %vm1389_vm4, %v2292_v55, 0.0 }
 0x23f   : > { %1923 = vst.msk [vmem:[%s4230_s11 + $0xa0] sm:$0xff] %vm1389_vm4, %v1856_v62  ;;  %v1974_v9 = vsel %vm1389_vm4, %v1856_v62, 0.0  ;;  %v2026_v12 = vmul.f32 %v1856_v62, %v1856_v62  ;;  %v2293_v44 = vpop.f32.mrb[6].mxu1 }
 0x240   : > { %v1975_v53 = vadd.f32 %v1974_v9, %v1973_v52  ;;  %1926 = vst.msk [vmem:[%s4230_s11 + $0xb8] sm:$0xff] %vm1389_vm4, %v2293_v44  ;;  %v1859_v56 = vpop.f32.mrb[7].mxu1  ;;  %v2029_v35 = vmul.f32 %v2293_v44, %v2293_v44  ;;  %v2081_v41 = vsel %vm1389_vm4, %v2028_v6, 0.0  ;;  %v1980_v46 = vsel %vm1389_vm4, %v2293_v44, 0.0 }
 0x241   : > { %v2077_v8 = vsel %vm1389_vm4, %v2026_v12, 0.0  ;;  %1924 = vst.msk [vmem:[%s4230_s11 + $0xa8] sm:$0xff] %vm1389_vm4, %v1859_v56  ;;  %v1976_v33 = vsel %vm1389_vm4, %v1859_v56, 0.0  ;;  %v2027_v0 = vmul.f32 %v1859_v56, %v1859_v56 }
 0x242   : > { %v2078_v2 = vadd.f32 %v2077_v8, %v2076_v51  ;;  %v1977_v59 = vadd.f32 %v1976_v33, %v1975_v53  ;;  %v2083_v32 = vsel %vm1389_vm4, %v2029_v35, 0.0 }
 0x243   : > { %v2079_v23 = vsel %vm1389_vm4, %v2027_v0, 0.0 }
 0x244   : > { %v1979_v10 = vadd.f32 %v1978_v30, %v1977_v59  ;;  %v2080_v20 = vadd.f32 %v2079_v23, %v2078_v2 }
 0x246   : > { %v2082_v39 = vadd.f32 %v2081_v41, %v2080_v20  ;;  %v1981_v48 = vadd.f32 %v1980_v46, %v1979_v10 }
 0x248   : > { %v2084_v54 = vadd.f32 %v2083_v32, %v2082_v39 }
 0x255   : > { %v2296_v58 = vpop.f32.mrb[8].mxu1 }
 0x256   : > { %1929 = vst.msk [vmem:[%s4230_s11 + $0xd0] sm:$0xff] %vm1389_vm4, %v2296_v58  ;;  %v1872_v16 = vpop.f32.mrb[9].mxu1  ;;  %v2032_v36 = vmul.f32 %v2296_v58, %v2296_v58  ;;  %v1986_v50 = vsel %vm1389_vm4, %v2296_v58, 0.0 }
 0x257   : > { %1927 = vst.msk [vmem:[%s4230_s11 + $0xc0] sm:$0xff] %vm1389_vm4, %v1872_v16  ;;  %v1982_v17 = vsel %vm1389_vm4, %v1872_v16, 0.0  ;;  %v2030_v26 = vmul.f32 %v1872_v16, %v1872_v16  ;;  %v2297_v42 = vpop.f32.mrb[10].mxu1 }
 0x258   : > { %v1983_v15 = vadd.f32 %v1982_v17, %v1981_v48  ;;  %1930 = vst.msk [vmem:[%s4230_s11 + $0xd8] sm:$0xff] %vm1389_vm4, %v2297_v42  ;;  %v1875_v13 = vpop.f32.mrb[11].mxu1  ;;  %v2033_v38 = vmul.f32 %v2297_v42, %v2297_v42  ;;  %v2089_v5 = vsel %vm1389_vm4, %v2032_v36, 0.0  ;;  %v1988_v63 = vsel %vm1389_vm4, %v2297_v42, 0.0 }
 0x259   : > { %v2085_v22 = vsel %vm1389_vm4, %v2030_v26, 0.0  ;;  %1928 = vst.msk [vmem:[%s4230_s11 + $0xc8] sm:$0xff] %vm1389_vm4, %v1875_v13  ;;  %v1984_v31 = vsel %vm1389_vm4, %v1875_v13, 0.0  ;;  %v2031_v3 = vmul.f32 %v1875_v13, %v1875_v13 }
 0x25a   : > { %v2086_v37 = vadd.f32 %v2085_v22, %v2084_v54  ;;  %v1985_v61 = vadd.f32 %v1984_v31, %v1983_v15  ;;  %v2091_v34 = vsel %vm1389_vm4, %v2033_v38, 0.0 }
 0x25b   : > { %v2087_v24 = vsel %vm1389_vm4, %v2031_v3, 0.0 }
 0x25c   : > { %v1987_v28 = vadd.f32 %v1986_v50, %v1985_v61  ;;  %v2088_v60 = vadd.f32 %v2087_v24, %v2086_v37 }
 0x25e   : > { %v2090_v29 = vadd.f32 %v2089_v5, %v2088_v60  ;;  %v1989_v43 = vadd.f32 %v1988_v63, %v1987_v28 }
 0x260   : > { %v2092_v25 = vadd.f32 %v2091_v34, %v2090_v29 }
 0x26d   : > { %v2300_v14 = vpop.f32.mrb[12].mxu1 }
 0x26e   : > { %1933 = vst.msk [vmem:[%s4230_s11 + $0xf0] sm:$0xff] %vm1389_vm4, %v2300_v14  ;;  %v1888_v4 = vpop.f32.mrb[13].mxu1  ;;  %v2036_v27 = vmul.f32 %v2300_v14, %v2300_v14  ;;  %v1994_v52 = vsel %vm1389_vm4, %v2300_v14, 0.0 }
 0x26f   : > { %1931 = vst.msk [vmem:[%s4230_s11 + $0xe0] sm:$0xff] %vm1389_vm4, %v1888_v4  ;;  %v1990_v40 = vsel %vm1389_vm4, %v1888_v4, 0.0  ;;  %v2034_v21 = vmul.f32 %v1888_v4, %v1888_v4  ;;  %v2301_v57 = vpop.f32.mrb[14].mxu1 }
 0x270   : > { %v1991_v49 = vadd.f32 %v1990_v40, %v1989_v43  ;;  %1934 = vst.msk [vmem:[%s4230_s11 + $0xf8] sm:$0xff] %vm1389_vm4, %v2301_v57  ;;  %v1891_v45 = vpop.f32.mrb[15].mxu1  ;;  %v2037_v47 = vmul.f32 %v2301_v57, %v2301_v57  ;;  %v2097_v9 = vsel %vm1389_vm4, %v2036_v27, 0.0  ;;  %v1996_v12 = vsel %vm1389_vm4, %v2301_v57, 0.0 }
 0x271   : > { %v2093_v7 = vsel %vm1389_vm4, %v2034_v21, 0.0  ;;  %1932 = vst.msk [vmem:[%s4230_s11 + $0xe8] sm:$0xff] %vm1389_vm4, %v1891_v45  ;;  %v1992_v1 = vsel %vm1389_vm4, %v1891_v45, 0.0  ;;  %v2035_v18 = vmul.f32 %v1891_v45, %v1891_v45 }
 0x272   : > { %v2094_v11 = vadd.f32 %v2093_v7, %v2092_v25  ;;  %v1993_v19 = vadd.f32 %v1992_v1, %v1991_v49  ;;  %v2099_v56 = vsel %vm1389_vm4, %v2037_v47, 0.0 }
 0x273   : > { %v2095_v51 = vsel %vm1389_vm4, %v2035_v18, 0.0 }
 0x274   : > { %v1995_v55 = vadd.f32 %v1994_v52, %v1993_v19  ;;  %v2096_v62 = vadd.f32 %v2095_v51, %v2094_v11 }
 0x276   : > { %v1997_v44 = vadd.f32 %v1996_v12, %v1995_v55  ;;  %v2098_v53 = vadd.f32 %v2097_v9, %v2096_v62 }
 0x278   : > { %v1998_v6 = vrot.slane %v1997_v44, 4  ;;  %v2100_v8 = vadd.f32 %v2099_v56, %v2098_v53 }
 0x27a   : > { %v1999_v33 = vadd.f32 %v1998_v6, %v1997_v44  ;;  %v2101_v0 = vrot.slane %v2100_v8, 4 }
 0x27c   : > { %v2000_v2 = vrot.slane %v1999_v33, 2  ;;  %v2102_v59 = vadd.f32 %v2101_v0, %v2100_v8 }
 0x27e   : > { %v2001_v30 = vadd.f32 %v2000_v2, %v1999_v33  ;;  %v2103_v35 = vrot.slane %v2102_v59, 2 }
 0x280   : > { %v2002_v23 = vrot.slane %v2001_v30, 1  ;;  %v2104_v10 = vadd.f32 %v2103_v35, %v2102_v59 }
 0x282   : > { %v2003_v20 = vadd.f32 %v2002_v23, %v2001_v30  ;;  %v2105_v41 = vrot.slane %v2104_v10, 1 }
 0x284   : > { %2005 = vst.msk [vmem:[%s211_s14] sm:$0x1] %vm2004_vm13, %v2003_v20  ;;  %v2106_v46 = vadd.f32 %v2105_v41, %v2104_v10 }
 0x286   : > { %2107 = vst.msk [vmem:[%s214_s19] sm:$0x1] %vm2004_vm13, %v2106_v46 }
 0x287 PF: > { %s15_s15 = sadd.s32 1, %s2976_s15  }
 0x288   : > { %p12_p4 = scmp.ge.s32.totalorder %s15_s15, 4  }
 0x28a   :  { %14 = sbr.rel (!%p12_p4) target bundleno = 1 (0x1), region = 82 }

</bundles_post_ra>
